<compile_context>
chip_gen: v7x
topology: tpu7x:2x2x1
jax: 0.10.0
libtpu: 0.0.40
codegen_flags: <defaults>
</compile_context>

<pallas_src>
import jax
import jax.numpy as jnp
from jax import lax
from jax.experimental import pallas as pl
from jax.experimental.pallas import tpu as pltpu

BN_EPS = 1e-5
VMEM_LIMIT = 32 * 1024 * 1024  # raises v5e's 16 MiB scoped default, safe on v6e/v7x

# tap offsets (dy, dx); t = ky*3 + kx ordering must match the weight matrices
_OFF9 = tuple((ky - 1, kx - 1) for ky in range(3) for kx in range(3))
# sub-pixel shifts for the transposed conv: q = sy*2 + sx
_OFF4 = ((0, 0), (0, 1), (1, 0), (1, 1))


# ---------------------------------------------------------------------------
# host-side helpers (tiny XLA work: weight re-layout, masks, BN scale/shift)
# ---------------------------------------------------------------------------
def _shift_masks(H, W, offsets):
    """(T, H*W) f32 masks: 1 where the shifted tap stays inside the image."""
    y = jnp.arange(H, dtype=jnp.int32)[:, None]
    x = jnp.arange(W, dtype=jnp.int32)[None, :]
    rows = []
    for dy, dx in offsets:
        ok = (y + dy >= 0) & (y + dy < H) & (x + dx >= 0) & (x + dx < W)
        rows.append(ok.astype(jnp.float32).reshape(H * W))
    return jnp.stack(rows, axis=0)


def _conv_wmat(w_oihw):
    """(Cout, C, 3, 3) -> (Cout, 9*C) with column order (ky*3+kx)*C + ci."""
    cout, c = w_oihw.shape[0], w_oihw.shape[1]
    return jnp.transpose(w_oihw, (0, 2, 3, 1)).reshape(cout, 9 * c)


def _upsample_weights(up_w, up_b):
    """Build the block weight matrix for the 4-phase sub-pixel decomposition.

    ConvTranspose2d(k=3, s=2, p=1, output_padding=1):
      out[2m,   2p  ] = A11 x[m,p]
      out[2m,   2p+1] = A10 x[m,p+1] + A12 x[m,p]
      out[2m+1, 2p  ] = A01 x[m+1,p] + A21 x[m,p]
      out[2m+1, 2p+1] = A00 x[m+1,p+1] + A02 x[m+1,p] + A20 x[m,p+1] + A22 x[m,p]
    with A(ky,kx)[co,ci] = up_w[ci,co,ky,kx]; out-of-range x entries are zero.
    """
    cin, cout = up_w.shape[0], up_w.shape[1]
    A = jnp.transpose(up_w, (2, 3, 1, 0))          # (ky, kx, Cout, Cin)
    w_big = jnp.zeros((4 * cout, 4 * cin), jnp.float32)
    placements = [  # (phase p, shift q, ky, kx)
        (0, 0, 1, 1),
        (1, 1, 1, 0), (1, 0, 1, 2),
        (2, 2, 0, 1), (2, 0, 2, 1),
        (3, 3, 0, 0), (3, 2, 0, 2), (3, 1, 2, 0), (3, 0, 2, 2),
    ]
    for p, q, ky, kx in placements:
        w_big = w_big.at[p * cout:(p + 1) * cout, q * cin:(q + 1) * cin].set(A[ky, kx])
    b_big = jnp.tile(up_b.astype(jnp.float32), 4).reshape(4 * cout, 1)
    return w_big.astype(jnp.bfloat16), b_big


def _bn_scale_shift(stats, count, gamma, beta):
    """Per-channel BN affine from accumulated [sum, sum_sq] (training-mode stats)."""
    mean = stats[:, 0] / count
    var = stats[:, 1] / count - mean * mean   # biased variance (PyTorch BN training)
    scale = gamma / jnp.sqrt(var + BN_EPS)
    shift = beta - mean * scale
    return scale, shift


# ---------------------------------------------------------------------------
# Pallas kernels
# ---------------------------------------------------------------------------
def _make_upsample_kernel(cin, H, W):
    """Sub-pixel ConvTranspose: one matmul producing all 4 output phases."""
    L = H * W

    def kernel(x_ref, m_ref, w_ref, b_ref, o_ref, col_ref):
        # x_ref: (Cin, L) f32;  m_ref: (4, L) f32;  w_ref: (4*Cout, 4*Cin) bf16
        # b_ref: (4*Cout, 1) f32;  o_ref: (4*Cout, L) f32;  col_ref: (4*Cin, L) f32
        x = x_ref[...]
        for q, (sy, sx) in enumerate(_OFF4):
            s = sy * W + sx
            rows = slice(q * cin, (q + 1) * cin)
            if s == 0:
                col_ref[rows, :] = x
            else:
                col_ref[rows, 0:L - s] = x[:, s:L] * m_ref[q:q + 1, 0:L - s]
                col_ref[rows, L - s:L] = jnp.zeros((cin, s), jnp.float32)
        acc = jnp.dot(w_ref[...], col_ref[...].astype(jnp.bfloat16),
                      preferred_element_type=jnp.float32)
        o_ref[...] = acc + b_ref[...]

    return kernel


def _make_conv_kernel(chans, fuse_in, H, W):
    """3x3 same conv as a single matmul on an in-VMEM im2col slab.

    - multiple inputs (concat fused in: weight columns are split per input)
    - optional per-input BN-affine + ReLU applied to the input path
    - per-channel [sum, sum_sq] BatchNorm stats accumulated across the grid
    """
    L = H * W
    n_in = len(chans)

    def kernel(*refs):
        i = 0
        x_refs = refs[i:i + n_in]; i += n_in
        ss_refs = ()
        if fuse_in:
            ss_refs = refs[i:i + 2 * n_in]; i += 2 * n_in
        m_ref, w_ref, b_ref = refs[i], refs[i + 1], refs[i + 2]
        o_ref, st_ref, col_ref = refs[i + 3], refs[i + 4], refs[i + 5]

        # Build the (9*sum(Cin), L) im2col slab with shifted, edge-masked copies.
        r0 = 0
        for j in range(n_in):
            C = chans[j]
            xj = x_refs[j][...]
            if fuse_in:  # previous layer's BN-affine + ReLU, fused into this conv
                xj = jnp.maximum(xj * ss_refs[2 * j][...] + ss_refs[2 * j + 1][...], 0.0)
            for t, (dy, dx) in enumerate(_OFF9):
                s = dy * W + dx
                rows = slice(r0 + t * C, r0 + (t + 1) * C)
                if dy == 0 and dx == 0:
                    col_ref[rows, :] = xj
                elif s > 0:
                    col_ref[rows, 0:L - s] = xj[:, s:L] * m_ref[t:t + 1, 0:L - s]
                    col_ref[rows, L - s:L] = jnp.zeros((C, s), jnp.float32)
                else:
                    k = -s
                    col_ref[rows, k:L] = xj[:, 0:L - k] * m_ref[t:t + 1, k:L]
                    col_ref[rows, 0:k] = jnp.zeros((C, k), jnp.float32)
            r0 += 9 * C

        # Single MXU matmul, K = 9*sum(Cin), lane-dense (Cout, L) output.
        acc = jnp.dot(w_ref[...], col_ref[...].astype(jnp.bfloat16),
                      preferred_element_type=jnp.float32)
        acc = acc + b_ref[...]
        o_ref[...] = acc

        # BatchNorm batch statistics accumulated across the (arbitrary) batch axis.
        @pl.when(pl.program_id(0) == 0)
        def _init():
            st_ref[...] = jnp.zeros_like(st_ref)

        st_ref[:, 0:1] += jnp.sum(acc, axis=1, keepdims=True)
        st_ref[:, 1:2] += jnp.sum(acc * acc, axis=1, keepdims=True)

    return kernel


def _bn_relu_kernel(x_ref, sc_ref, sh_ref, o_ref):
    o_ref[...] = jnp.maximum(x_ref[...] * sc_ref[...] + sh_ref[...], 0.0)


# ---------------------------------------------------------------------------
# pallas_call wrappers
# ---------------------------------------------------------------------------
def upsample_conv_transpose(x_flat, w_big, b_big, H, W):
    """x_flat: (N, Cin, H*W) -> phase outputs (N, 4*Cout, H*W)."""
    N, cin, L = x_flat.shape
    cout4 = w_big.shape[0]
    masks = _shift_masks(H, W, _OFF4)
    return pl.pallas_call(
        _make_upsample_kernel(cin, H, W),
        out_shape=jax.ShapeDtypeStruct((N, cout4, L), jnp.float32),
        grid=(N,),
        in_specs=[
            pl.BlockSpec((None, cin, L), lambda n: (n, 0, 0)),
            pl.BlockSpec((len(_OFF4), L), lambda n: (0, 0)),
            pl.BlockSpec((cout4, w_big.shape[1]), lambda n: (0, 0)),
            pl.BlockSpec((cout4, 1), lambda n: (0, 0)),
        ],
        out_specs=pl.BlockSpec((None, cout4, L), lambda n: (n, 0, 0)),
        scratch_shapes=[pltpu.VMEM((w_big.shape[1], L), jnp.float32)],
        compiler_params=pltpu.CompilerParams(
            dimension_semantics=("parallel",),      # megacore-friendly on v7x
            vmem_limit_bytes=VMEM_LIMIT),
    )(x_flat.astype(jnp.float32), masks, w_big, b_big)


def conv3x3_same_with_stats(xs, wmat, bias, H, W, in_scale_shift=None):
    """xs: list of (N, C_i, H*W) f32.  Returns conv output (N, Cout, H*W) and
    accumulated per-channel [sum, sum_sq] stats (Cout, 2)."""
    N = xs[0].shape[0]
    L = H * W
    chans = tuple(int(x.shape[1]) for x in xs)
    cout = int(wmat.shape[0])
    ktot = 9 * sum(chans)
    masks = _shift_masks(H, W, _OFF9)
    fuse = in_scale_shift is not None

    inputs, in_specs = [], []
    for x, c in zip(xs, chans):
        inputs.append(x.astype(jnp.float32))
        in_specs.append(pl.BlockSpec((None, c, L), lambda n: (n, 0, 0)))
    if fuse:
        for (sc, sh), c in zip(in_scale_shift, chans):
            inputs += [sc.reshape(c, 1).astype(jnp.float32),
                       sh.reshape(c, 1).astype(jnp.float32)]
            in_specs += [pl.BlockSpec((c, 1), lambda n: (0, 0)),
                         pl.BlockSpec((c, 1), lambda n: (0, 0))]
    inputs += [masks, wmat.astype(jnp.bfloat16),
               bias.reshape(cout, 1).astype(jnp.float32)]
    in_specs += [pl.BlockSpec((9, L), lambda n: (0, 0)),
                 pl.BlockSpec((cout, ktot), lambda n: (0, 0)),
                 pl.BlockSpec((cout, 1), lambda n: (0, 0))]

    y, st = pl.pallas_call(
        _make_conv_kernel(chans, fuse, H, W),
        out_shape=(jax.ShapeDtypeStruct((N, cout, L), jnp.float32),
                   jax.ShapeDtypeStruct((cout, 2), jnp.float32)),
        grid=(N,),
        in_specs=in_specs,
        out_specs=(pl.BlockSpec((None, cout, L), lambda n: (n, 0, 0)),
                   pl.BlockSpec((cout, 2), lambda n: (0, 0))),
        scratch_shapes=[pltpu.VMEM((ktot, L), jnp.float32)],
        compiler_params=pltpu.CompilerParams(
            # batch axis must be "arbitrary": the BN-stat output accumulates
            # across it (per-core partial stats would be needed to go parallel).
            dimension_semantics=("arbitrary",),
            vmem_limit_bytes=VMEM_LIMIT),
    )(*inputs)
    return y, st


def bn_relu(x, scale, shift):
    """Final BN-affine + ReLU, lane-dense (C, H*W) layout."""
    N, C, L = x.shape
    return pl.pallas_call(
        _bn_relu_kernel,
        out_shape=jax.ShapeDtypeStruct((N, C, L), jnp.float32),
        grid=(N,),
        in_specs=[pl.BlockSpec((None, C, L), lambda n: (n, 0, 0)),
                  pl.BlockSpec((C, 1), lambda n: (0, 0)),
                  pl.BlockSpec((C, 1), lambda n: (0, 0))],
        out_specs=pl.BlockSpec((None, C, L), lambda n: (n, 0, 0)),
        compiler_params=pltpu.CompilerParams(
            dimension_semantics=("parallel",),
            vmem_limit_bytes=VMEM_LIMIT),
    )(x, scale.reshape(C, 1).astype(jnp.float32),
      shift.reshape(C, 1).astype(jnp.float32))


# ---------------------------------------------------------------------------
# StackDecoder forward (NCHW in / NCHW out, PyTorch training-mode semantics)
# ---------------------------------------------------------------------------
def stack_decoder_forward(x_nchw, down_nchw, params):
    x = x_nchw.astype(jnp.float32)
    N, cin, H, W = x.shape
    cout = params["up_w"].shape[1]
    H2, W2 = 2 * H, 2 * W
    L2 = H2 * W2

    # --- upSample: ConvTranspose2d via 4-phase sub-pixel decomposition --------
    w_big, b_big = _upsample_weights(params["up_w"], params["up_b"])
    phases = upsample_conv_transpose(x.reshape(N, cin, H * W), w_big, b_big, H, W)
    up = (phases.reshape(N, 2, 2, cout, H, W)
                 .transpose(0, 3, 4, 1, 5, 2)          # (N, Cout, H, 2, W, 2)
                 .reshape(N, cout, L2))

    # --- _crop_concat: center-crop the skip; the concat itself is fused into
    #     convr1 (two-input kernel, weight split along Cin) ---------------------
    c = (down_nchw.shape[2] - H2) // 2
    skip = (down_nchw[:, :, c:c + H2, c:c + W2]
            .astype(jnp.float32).reshape(N, -1, L2))

    # --- convr1: conv3x3([up, skip]) + in-kernel BN1 batch stats ---------------
    w1 = params["c1_w"]                                  # (Cout, Cout+Csk, 3, 3)
    wmat1 = jnp.concatenate([_conv_wmat(w1[:, :cout]), _conv_wmat(w1[:, cout:])],
                            axis=1)
    y1, st1 = conv3x3_same_with_stats([up, skip], wmat1, params["c1_b"], H2, W2)
    sc1, sh1 = _bn_scale_shift(st1, N * L2, params["bn1_g"], params["bn1_b"])

    # --- convr2: BN1-affine + ReLU fused into the conv input path --------------
    wmat2 = _conv_wmat(params["c2_w"])
    y2, st2 = conv3x3_same_with_stats([y1], wmat2, params["c2_b"], H2, W2,
                                      in_scale_shift=[(sc1, sh1)])
    sc2, sh2 = _bn_scale_shift(st2, N * L2, params["bn2_g"], params["bn2_b"])

    # --- final BN2 + ReLU (standalone elementwise pass) ------------------------
    out = bn_relu(y2, sc2, sh2)
    return out.reshape(N, cout, H2, W2)


# ---------------------------------------------------------------------------
# Pure-JAX reference (lax convs, f32 HIGHEST) for a numerical sanity check
# ---------------------------------------------------------------------------
def _ref_forward(x, down, p):
    dn = ("NCHW", "OIHW", "NCHW")
    prec = lax.Precision.HIGHEST
    w_up = jnp.transpose(p["up_w"][:, :, ::-1, ::-1], (1, 0, 2, 3))
    up = lax.conv_general_dilated(x, w_up, (1, 1), [(1, 2), (1, 2)],
                                  lhs_dilation=(2, 2), dimension_numbers=dn,
                                  precision=prec)
    up = up + p["up_b"].reshape(1, -1, 1, 1)
    c = (down.shape[2] - up.shape[2]) // 2
    skip = down[:, :, c:down.shape[2] - c, c:down.shape[3] - c]
    cat = jnp.concatenate([up, skip], axis=1)

    def cbr(z, w, b, g, bb):
        z = lax.conv_general_dilated(z, w, (1, 1), [(1, 1), (1, 1)],
                                     dimension_numbers=dn, precision=prec)
        z = z + b.reshape(1, -1, 1, 1)
        mean = jnp.mean(z, axis=(0, 2, 3), keepdims=True)
        var = jnp.mean((z - mean) ** 2, axis=(0, 2, 3), keepdims=True)
        z = (z - mean) / jnp.sqrt(var + BN_EPS)
        z = z * g.reshape(1, -1, 1, 1) + bb.reshape(1, -1, 1, 1)
        return jnp.maximum(z, 0.0)

    z = cbr(cat, p["c1_w"], p["c1_b"], p["bn1_g"], p["bn1_b"])
    z = cbr(z, p["c2_w"], p["c2_b"], p["bn2_g"], p["bn2_b"])
    return z


# ---------------------------------------------------------------------------
if __name__ == "__main__":
    key = jax.random.PRNGKey(0)
    in_ch, out_ch = 8, 4            # skip tensor has in_ch - out_ch channels
    N, H, W = 2, 16, 16             # output spatial = (2H, 2W) = (32, 32)
    ks = jax.random.split(key, 12)

    params = {
        "up_w": 0.1 * jax.random.normal(ks[0], (in_ch, out_ch, 3, 3), jnp.float32),
        "up_b": 0.1 * jax.random.normal(ks[1], (out_ch,), jnp.float32),
        "c1_w": 0.1 * jax.random.normal(ks[2], (out_ch, in_ch, 3, 3), jnp.float32),
        "c1_b": 0.1 * jax.random.normal(ks[3], (out_ch,), jnp.float32),
        "bn1_g": 1.0 + 0.1 * jax.random.normal(ks[4], (out_ch,), jnp.float32),
        "bn1_b": 0.1 * jax.random.normal(ks[5], (out_ch,), jnp.float32),
        "c2_w": 0.1 * jax.random.normal(ks[6], (out_ch, out_ch, 3, 3), jnp.float32),
        "c2_b": 0.1 * jax.random.normal(ks[7], (out_ch,), jnp.float32),
        "bn2_g": 1.0 + 0.1 * jax.random.normal(ks[8], (out_ch,), jnp.float32),
        "bn2_b": 0.1 * jax.random.normal(ks[9], (out_ch,), jnp.float32),
    }

    x = jax.random.normal(ks[10], (N, in_ch, H, W), jnp.float32)
    # skip tensor is larger spatially so _crop_concat's center crop is exercised
    down = jax.random.normal(ks[11], (N, in_ch - out_ch, 2 * H + 4, 2 * W + 4),
                             jnp.float32)

    fwd = jax.jit(stack_decoder_forward)
    out = jax.block_until_ready(fwd(x, down, params))
    assert out.shape == (N, out_ch, 2 * H, 2 * W), out.shape

    ref = _ref_forward(x, down, params)
    max_err = float(jnp.max(jnp.abs(out - ref)))
    # tolerance: bf16 MXU operands (f32 accumulation) vs. f32-HIGHEST lax ref
    assert jnp.allclose(out, ref, atol=5e-2, rtol=5e-2), max_err

    print("KERNEL_OK")
</pallas_src>

<mosaic_0001>
module attributes {stable_mosaic.version = 11 : i64} {
  func.func @kernel(%arg0: i32, %arg1: memref<1x8x256xf32, #tpu.memory_space<vmem>>, %arg2: memref<4x256xf32, #tpu.memory_space<vmem>>, %arg3: memref<16x32xbf16, #tpu.memory_space<vmem>>, %arg4: memref<16x1xf32, #tpu.memory_space<vmem>>, %arg5: memref<1x16x256xf32, #tpu.memory_space<vmem>>, %arg6: memref<32x256xf32, #tpu.memory_space<vmem>>) attributes {dimension_semantics = [#tpu.dimension_semantics<parallel>], iteration_bounds = array<i64: 2>, scalar_prefetch = 0 : i64, scratch_operands = 1 : i64, tpu.core_type = #tpu.core_type<tc>, window_params = [{transform_indices = @transform_0, window_bounds = array<i64: 1, 8, 256>}, {pipeline_mode = #tpu.pipeline_mode<synchronous>, transform_indices = @transform_1, window_bounds = array<i64: 4, 256>}, {pipeline_mode = #tpu.pipeline_mode<synchronous>, transform_indices = @transform_2, window_bounds = array<i64: 16, 32>}, {pipeline_mode = #tpu.pipeline_mode<synchronous>, transform_indices = @transform_3, window_bounds = array<i64: 16, 1>}, {transform_indices = @transform_4, window_bounds = array<i64: 1, 16, 256>}]} {
    %c0 = arith.constant 0 : index
    %c0_0 = arith.constant 0 : index
    %c0_1 = arith.constant 0 : index
    %0 = vector.load %arg1[%c0, %c0_0, %c0_1] : memref<1x8x256xf32, #tpu.memory_space<vmem>>, vector<1x8x256xf32>
    %1 = vector.shape_cast %0 : vector<1x8x256xf32> to vector<8x256xf32>
    %c0_2 = arith.constant 0 : index
    %c0_3 = arith.constant 0 : index
    %2 = vector.load %arg6[%c0_2, %c0_3] : memref<32x256xf32, #tpu.memory_space<vmem>>, vector<8x256xf32>
    tpu.vector_store %arg6[%c0_2, %c0_3], %1 {strides = array<i32>} : memref<32x256xf32, #tpu.memory_space<vmem>>, vector<8x256xf32>,
    %3 = vector.extract_strided_slice %1 {offsets = [0, 1], sizes = [8, 255], strides = [1, 1]} : vector<8x256xf32> to vector<8x255xf32>
    %c1 = arith.constant 1 : index
    %c0_4 = arith.constant 0 : index
    %4 = vector.load %arg2[%c1, %c0_4] : memref<4x256xf32, #tpu.memory_space<vmem>>, vector<1x255xf32>
    %5 = vector.broadcast %4 : vector<1x255xf32> to vector<8x255xf32>
    %6 = arith.mulf %3, %5 : vector<8x255xf32>
    %c8 = arith.constant 8 : index
    %c0_5 = arith.constant 0 : index
    %7 = vector.load %arg6[%c8, %c0_5] : memref<32x256xf32, #tpu.memory_space<vmem>>, vector<8x255xf32>
    tpu.vector_store %arg6[%c8, %c0_5], %6 {strides = array<i32>} : memref<32x256xf32, #tpu.memory_space<vmem>>, vector<8x255xf32>,
    %cst = arith.constant 0.000000e+00 : f32
    %8 = vector.broadcast %cst : f32 to vector<8x1xf32>
    %c8_6 = arith.constant 8 : index
    %c255 = arith.constant 255 : index
    %9 = vector.load %arg6[%c8_6, %c255] : memref<32x256xf32, #tpu.memory_space<vmem>>, vector<8x1xf32>
    tpu.vector_store %arg6[%c8_6, %c255], %8 {strides = array<i32>} : memref<32x256xf32, #tpu.memory_space<vmem>>, vector<8x1xf32>,
    %10 = vector.extract_strided_slice %1 {offsets = [0, 16], sizes = [8, 240], strides = [1, 1]} : vector<8x256xf32> to vector<8x240xf32>
    %c2 = arith.constant 2 : index
    %c0_7 = arith.constant 0 : index
    %11 = vector.load %arg2[%c2, %c0_7] : memref<4x256xf32, #tpu.memory_space<vmem>>, vector<1x240xf32>
    %12 = vector.broadcast %11 : vector<1x240xf32> to vector<8x240xf32>
    %13 = arith.mulf %10, %12 : vector<8x240xf32>
    %c16 = arith.constant 16 : index
    %c0_8 = arith.constant 0 : index
    %14 = vector.load %arg6[%c16, %c0_8] : memref<32x256xf32, #tpu.memory_space<vmem>>, vector<8x240xf32>
    tpu.vector_store %arg6[%c16, %c0_8], %13 {strides = array<i32>} : memref<32x256xf32, #tpu.memory_space<vmem>>, vector<8x240xf32>,
    %cst_9 = arith.constant 0.000000e+00 : f32
    %15 = vector.broadcast %cst_9 : f32 to vector<8x16xf32>
    %c16_10 = arith.constant 16 : index
    %c240 = arith.constant 240 : index
    %16 = vector.load %arg6[%c16_10, %c240] : memref<32x256xf32, #tpu.memory_space<vmem>>, vector<8x16xf32>
    tpu.vector_store %arg6[%c16_10, %c240], %15 {strides = array<i32>} : memref<32x256xf32, #tpu.memory_space<vmem>>, vector<8x16xf32>,
    %17 = vector.extract_strided_slice %1 {offsets = [0, 17], sizes = [8, 239], strides = [1, 1]} : vector<8x256xf32> to vector<8x239xf32>
    %c3 = arith.constant 3 : index
    %c0_11 = arith.constant 0 : index
    %18 = vector.load %arg2[%c3, %c0_11] : memref<4x256xf32, #tpu.memory_space<vmem>>, vector<1x239xf32>
    %19 = vector.broadcast %18 : vector<1x239xf32> to vector<8x239xf32>
    %20 = arith.mulf %17, %19 : vector<8x239xf32>
    %c24 = arith.constant 24 : index
    %c0_12 = arith.constant 0 : index
    %21 = vector.load %arg6[%c24, %c0_12] : memref<32x256xf32, #tpu.memory_space<vmem>>, vector<8x239xf32>
    tpu.vector_store %arg6[%c24, %c0_12], %20 {strides = array<i32>} : memref<32x256xf32, #tpu.memory_space<vmem>>, vector<8x239xf32>,
    %cst_13 = arith.constant 0.000000e+00 : f32
    %22 = vector.broadcast %cst_13 : f32 to vector<8x17xf32>
    %c24_14 = arith.constant 24 : index
    %c239 = arith.constant 239 : index
    %23 = vector.load %arg6[%c24_14, %c239] : memref<32x256xf32, #tpu.memory_space<vmem>>, vector<8x17xf32>
    tpu.vector_store %arg6[%c24_14, %c239], %22 {strides = array<i32>} : memref<32x256xf32, #tpu.memory_space<vmem>>, vector<8x17xf32>,
    %c0_15 = arith.constant 0 : index
    %c0_16 = arith.constant 0 : index
    %24 = vector.load %arg3[%c0_15, %c0_16] : memref<16x32xbf16, #tpu.memory_space<vmem>>, vector<16x32xbf16>
    %c0_17 = arith.constant 0 : index
    %c0_18 = arith.constant 0 : index
    %25 = vector.load %arg6[%c0_17, %c0_18] : memref<32x256xf32, #tpu.memory_space<vmem>>, vector<32x256xf32>
    %26 = arith.truncf %25 : vector<32x256xf32> to vector<32x256xbf16>
    %cst_19 = arith.constant dense<0.000000e+00> : vector<16x256xf32>
    %27 = tpu.matmul %24, %26, %cst_19 {dimension_numbers = #tpu.dot_dimension_numbers<[1], [0], [0], [1], [0, 0, 1, 1], [], []>} : vector<16x32xbf16>, vector<32x256xbf16>, vector<16x256xf32> -> vector<16x256xf32>
    %c0_20 = arith.constant 0 : index
    %c0_21 = arith.constant 0 : index
    %28 = vector.load %arg4[%c0_20, %c0_21] : memref<16x1xf32, #tpu.memory_space<vmem>>, vector<16x1xf32>
    %29 = vector.broadcast %28 : vector<16x1xf32> to vector<16x256xf32>
    %30 = arith.addf %27, %29 : vector<16x256xf32>
    %c0_22 = arith.constant 0 : index
    %c0_23 = arith.constant 0 : index
    %c0_24 = arith.constant 0 : index
    %31 = vector.load %arg5[%c0_22, %c0_23, %c0_24] : memref<1x16x256xf32, #tpu.memory_space<vmem>>, vector<1x16x256xf32>
    %32 = vector.shape_cast %31 : vector<1x16x256xf32> to vector<16x256xf32>
    %33 = vector.shape_cast %30 : vector<16x256xf32> to vector<1x16x256xf32>
    tpu.vector_store %arg5[%c0_22, %c0_23, %c0_24], %33 {strides = array<i32>} : memref<1x16x256xf32, #tpu.memory_space<vmem>>, vector<1x16x256xf32>,
    return
  }
  func.func @transform_0(%arg0: i32) -> (i32, i32, i32) {
    %c0_i32 = arith.constant 0 : i32
    %c0_i32_0 = arith.constant 0 : i32
    %c0_i32_1 = arith.constant 0 : i32
    return %arg0, %c0_i32, %c0_i32_0 : i32, i32, i32
  }
  func.func @transform_1(%arg0: i32) -> (i32, i32) {
    %c0_i32 = arith.constant 0 : i32
    %c0_i32_0 = arith.constant 0 : i32
    %c0_i32_1 = arith.constant 0 : i32
    return %c0_i32, %c0_i32_0 : i32, i32
  }
  func.func @transform_2(%arg0: i32) -> (i32, i32) {
    %c0_i32 = arith.constant 0 : i32
    %c0_i32_0 = arith.constant 0 : i32
    %c0_i32_1 = arith.constant 0 : i32
    return %c0_i32, %c0_i32_0 : i32, i32
  }
  func.func @transform_3(%arg0: i32) -> (i32, i32) {
    %c0_i32 = arith.constant 0 : i32
    %c0_i32_0 = arith.constant 0 : i32
    %c0_i32_1 = arith.constant 0 : i32
    return %c0_i32, %c0_i32_0 : i32, i32
  }
  func.func @transform_4(%arg0: i32) -> (i32, i32, i32) {
    %c0_i32 = arith.constant 0 : i32
    %c0_i32_0 = arith.constant 0 : i32
    %c0_i32_1 = arith.constant 0 : i32
    return %arg0, %c0_i32, %c0_i32_0 : i32, i32, i32
  }
}

module attributes {stable_mosaic.version = 11 : i64} {
  func.func @kernel(%arg0: i32, %arg1: memref<1x4x1024xf32, #tpu.memory_space<vmem>>, %arg2: memref<1x4x1024xf32, #tpu.memory_space<vmem>>, %arg3: memref<9x1024xf32, #tpu.memory_space<vmem>>, %arg4: memref<4x72xbf16, #tpu.memory_space<vmem>>, %arg5: memref<4x1xf32, #tpu.memory_space<vmem>>, %arg6: memref<1x4x1024xf32, #tpu.memory_space<vmem>>, %arg7: memref<4x2xf32, #tpu.memory_space<vmem>>, %arg8: memref<72x1024xf32, #tpu.memory_space<vmem>>) attributes {dimension_semantics = [#tpu.dimension_semantics<arbitrary>], iteration_bounds = array<i64: 2>, scalar_prefetch = 0 : i64, scratch_operands = 1 : i64, tpu.core_type = #tpu.core_type<tc>, window_params = [{transform_indices = @transform_0, window_bounds = array<i64: 1, 4, 1024>}, {transform_indices = @transform_1, window_bounds = array<i64: 1, 4, 1024>}, {pipeline_mode = #tpu.pipeline_mode<synchronous>, transform_indices = @transform_2, window_bounds = array<i64: 9, 1024>}, {pipeline_mode = #tpu.pipeline_mode<synchronous>, transform_indices = @transform_3, window_bounds = array<i64: 4, 72>}, {pipeline_mode = #tpu.pipeline_mode<synchronous>, transform_indices = @transform_4, window_bounds = array<i64: 4, 1>}, {transform_indices = @transform_5, window_bounds = array<i64: 1, 4, 1024>}, {pipeline_mode = #tpu.pipeline_mode<synchronous>, transform_indices = @transform_6, window_bounds = array<i64: 4, 2>}]} {
    %c0 = arith.constant 0 : index
    %c0_0 = arith.constant 0 : index
    %c0_1 = arith.constant 0 : index
    %0 = vector.load %arg1[%c0, %c0_0, %c0_1] : memref<1x4x1024xf32, #tpu.memory_space<vmem>>, vector<1x4x1024xf32>
    %1 = vector.shape_cast %0 : vector<1x4x1024xf32> to vector<4x1024xf32>
    %2 = vector.extract_strided_slice %1 {offsets = [0, 0], sizes = [4, 991], strides = [1, 1]} : vector<4x1024xf32> to vector<4x991xf32>
    %c0_2 = arith.constant 0 : index
    %c33 = arith.constant 33 : index
    %3 = vector.load %arg3[%c0_2, %c33] : memref<9x1024xf32, #tpu.memory_space<vmem>>, vector<1x991xf32>
    %4 = vector.broadcast %3 : vector<1x991xf32> to vector<4x991xf32>
    %5 = arith.mulf %2, %4 : vector<4x991xf32>
    %c0_3 = arith.constant 0 : index
    %c33_4 = arith.constant 33 : index
    %6 = vector.load %arg8[%c0_3, %c33_4] : memref<72x1024xf32, #tpu.memory_space<vmem>>, vector<4x991xf32>
    tpu.vector_store %arg8[%c0_3, %c33_4], %5 {strides = array<i32>} : memref<72x1024xf32, #tpu.memory_space<vmem>>, vector<4x991xf32>,
    %cst = arith.constant 0.000000e+00 : f32
    %7 = vector.broadcast %cst : f32 to vector<4x33xf32>
    %c0_5 = arith.constant 0 : index
    %c0_6 = arith.constant 0 : index
    %8 = vector.load %arg8[%c0_5, %c0_6] : memref<72x1024xf32, #tpu.memory_space<vmem>>, vector<4x33xf32>
    tpu.vector_store %arg8[%c0_5, %c0_6], %7 {strides = array<i32>} : memref<72x1024xf32, #tpu.memory_space<vmem>>, vector<4x33xf32>,
    %9 = vector.extract_strided_slice %1 {offsets = [0, 0], sizes = [4, 992], strides = [1, 1]} : vector<4x1024xf32> to vector<4x992xf32>
    %c1 = arith.constant 1 : index
    %c32 = arith.constant 32 : index
    %10 = vector.load %arg3[%c1, %c32] : memref<9x1024xf32, #tpu.memory_space<vmem>>, vector<1x992xf32>
    %11 = vector.broadcast %10 : vector<1x992xf32> to vector<4x992xf32>
    %12 = arith.mulf %9, %11 : vector<4x992xf32>
    %c4 = arith.constant 4 : index
    %c32_7 = arith.constant 32 : index
    %13 = vector.load %arg8[%c4, %c32_7] : memref<72x1024xf32, #tpu.memory_space<vmem>>, vector<4x992xf32>
    tpu.vector_store %arg8[%c4, %c32_7], %12 {strides = array<i32>} : memref<72x1024xf32, #tpu.memory_space<vmem>>, vector<4x992xf32>,
    %cst_8 = arith.constant 0.000000e+00 : f32
    %14 = vector.broadcast %cst_8 : f32 to vector<4x32xf32>
    %c4_9 = arith.constant 4 : index
    %c0_10 = arith.constant 0 : index
    %15 = vector.load %arg8[%c4_9, %c0_10] : memref<72x1024xf32, #tpu.memory_space<vmem>>, vector<4x32xf32>
    tpu.vector_store %arg8[%c4_9, %c0_10], %14 {strides = array<i32>} : memref<72x1024xf32, #tpu.memory_space<vmem>>, vector<4x32xf32>,
    %16 = vector.extract_strided_slice %1 {offsets = [0, 0], sizes = [4, 993], strides = [1, 1]} : vector<4x1024xf32> to vector<4x993xf32>
    %c2 = arith.constant 2 : index
    %c31 = arith.constant 31 : index
    %17 = vector.load %arg3[%c2, %c31] : memref<9x1024xf32, #tpu.memory_space<vmem>>, vector<1x993xf32>
    %18 = vector.broadcast %17 : vector<1x993xf32> to vector<4x993xf32>
    %19 = arith.mulf %16, %18 : vector<4x993xf32>
    %c8 = arith.constant 8 : index
    %c31_11 = arith.constant 31 : index
    %20 = vector.load %arg8[%c8, %c31_11] : memref<72x1024xf32, #tpu.memory_space<vmem>>, vector<4x993xf32>
    tpu.vector_store %arg8[%c8, %c31_11], %19 {strides = array<i32>} : memref<72x1024xf32, #tpu.memory_space<vmem>>, vector<4x993xf32>,
    %cst_12 = arith.constant 0.000000e+00 : f32
    %21 = vector.broadcast %cst_12 : f32 to vector<4x31xf32>
    %c8_13 = arith.constant 8 : index
    %c0_14 = arith.constant 0 : index
    %22 = vector.load %arg8[%c8_13, %c0_14] : memref<72x1024xf32, #tpu.memory_space<vmem>>, vector<4x31xf32>
    tpu.vector_store %arg8[%c8_13, %c0_14], %21 {strides = array<i32>} : memref<72x1024xf32, #tpu.memory_space<vmem>>, vector<4x31xf32>,
    %23 = vector.extract_strided_slice %1 {offsets = [0, 0], sizes = [4, 1023], strides = [1, 1]} : vector<4x1024xf32> to vector<4x1023xf32>
    %c3 = arith.constant 3 : index
    %c1_15 = arith.constant 1 : index
    %24 = vector.load %arg3[%c3, %c1_15] : memref<9x1024xf32, #tpu.memory_space<vmem>>, vector<1x1023xf32>
    %25 = vector.broadcast %24 : vector<1x1023xf32> to vector<4x1023xf32>
    %26 = arith.mulf %23, %25 : vector<4x1023xf32>
    %c12 = arith.constant 12 : index
    %c1_16 = arith.constant 1 : index
    %27 = vector.load %arg8[%c12, %c1_16] : memref<72x1024xf32, #tpu.memory_space<vmem>>, vector<4x1023xf32>
    tpu.vector_store %arg8[%c12, %c1_16], %26 {strides = array<i32>} : memref<72x1024xf32, #tpu.memory_space<vmem>>, vector<4x1023xf32>,
    %cst_17 = arith.constant 0.000000e+00 : f32
    %28 = vector.broadcast %cst_17 : f32 to vector<4x1xf32>
    %c12_18 = arith.constant 12 : index
    %c0_19 = arith.constant 0 : index
    %29 = vector.load %arg8[%c12_18, %c0_19] : memref<72x1024xf32, #tpu.memory_space<vmem>>, vector<4x1xf32>
    tpu.vector_store %arg8[%c12_18, %c0_19], %28 {strides = array<i32>} : memref<72x1024xf32, #tpu.memory_space<vmem>>, vector<4x1xf32>,
    %c16 = arith.constant 16 : index
    %c0_20 = arith.constant 0 : index
    %30 = vector.load %arg8[%c16, %c0_20] : memref<72x1024xf32, #tpu.memory_space<vmem>>, vector<4x1024xf32>
    tpu.vector_store %arg8[%c16, %c0_20], %1 {strides = array<i32>} : memref<72x1024xf32, #tpu.memory_space<vmem>>, vector<4x1024xf32>,
    %31 = vector.extract_strided_slice %1 {offsets = [0, 1], sizes = [4, 1023], strides = [1, 1]} : vector<4x1024xf32> to vector<4x1023xf32>
    %c5 = arith.constant 5 : index
    %c0_21 = arith.constant 0 : index
    %32 = vector.load %arg3[%c5, %c0_21] : memref<9x1024xf32, #tpu.memory_space<vmem>>, vector<1x1023xf32>
    %33 = vector.broadcast %32 : vector<1x1023xf32> to vector<4x1023xf32>
    %34 = arith.mulf %31, %33 : vector<4x1023xf32>
    %c20 = arith.constant 20 : index
    %c0_22 = arith.constant 0 : index
    %35 = vector.load %arg8[%c20, %c0_22] : memref<72x1024xf32, #tpu.memory_space<vmem>>, vector<4x1023xf32>
    tpu.vector_store %arg8[%c20, %c0_22], %34 {strides = array<i32>} : memref<72x1024xf32, #tpu.memory_space<vmem>>, vector<4x1023xf32>,
    %cst_23 = arith.constant 0.000000e+00 : f32
    %36 = vector.broadcast %cst_23 : f32 to vector<4x1xf32>
    %c20_24 = arith.constant 20 : index
    %c1023 = arith.constant 1023 : index
    %37 = vector.load %arg8[%c20_24, %c1023] : memref<72x1024xf32, #tpu.memory_space<vmem>>, vector<4x1xf32>
    tpu.vector_store %arg8[%c20_24, %c1023], %36 {strides = array<i32>} : memref<72x1024xf32, #tpu.memory_space<vmem>>, vector<4x1xf32>,
    %38 = vector.extract_strided_slice %1 {offsets = [0, 31], sizes = [4, 993], strides = [1, 1]} : vector<4x1024xf32> to vector<4x993xf32>
    %c6 = arith.constant 6 : index
    %c0_25 = arith.constant 0 : index
    %39 = vector.load %arg3[%c6, %c0_25] : memref<9x1024xf32, #tpu.memory_space<vmem>>, vector<1x993xf32>
    %40 = vector.broadcast %39 : vector<1x993xf32> to vector<4x993xf32>
    %41 = arith.mulf %38, %40 : vector<4x993xf32>
    %c24 = arith.constant 24 : index
    %c0_26 = arith.constant 0 : index
    %42 = vector.load %arg8[%c24, %c0_26] : memref<72x1024xf32, #tpu.memory_space<vmem>>, vector<4x993xf32>
    tpu.vector_store %arg8[%c24, %c0_26], %41 {strides = array<i32>} : memref<72x1024xf32, #tpu.memory_space<vmem>>, vector<4x993xf32>,
    %cst_27 = arith.constant 0.000000e+00 : f32
    %43 = vector.broadcast %cst_27 : f32 to vector<4x31xf32>
    %c24_28 = arith.constant 24 : index
    %c993 = arith.constant 993 : index
    %44 = vector.load %arg8[%c24_28, %c993] : memref<72x1024xf32, #tpu.memory_space<vmem>>, vector<4x31xf32>
    tpu.vector_store %arg8[%c24_28, %c993], %43 {strides = array<i32>} : memref<72x1024xf32, #tpu.memory_space<vmem>>, vector<4x31xf32>,
    %45 = vector.extract_strided_slice %1 {offsets = [0, 32], sizes = [4, 992], strides = [1, 1]} : vector<4x1024xf32> to vector<4x992xf32>
    %c7 = arith.constant 7 : index
    %c0_29 = arith.constant 0 : index
    %46 = vector.load %arg3[%c7, %c0_29] : memref<9x1024xf32, #tpu.memory_space<vmem>>, vector<1x992xf32>
    %47 = vector.broadcast %46 : vector<1x992xf32> to vector<4x992xf32>
    %48 = arith.mulf %45, %47 : vector<4x992xf32>
    %c28 = arith.constant 28 : index
    %c0_30 = arith.constant 0 : index
    %49 = vector.load %arg8[%c28, %c0_30] : memref<72x1024xf32, #tpu.memory_space<vmem>>, vector<4x992xf32>
    tpu.vector_store %arg8[%c28, %c0_30], %48 {strides = array<i32>} : memref<72x1024xf32, #tpu.memory_space<vmem>>, vector<4x992xf32>,
    %cst_31 = arith.constant 0.000000e+00 : f32
    %50 = vector.broadcast %cst_31 : f32 to vector<4x32xf32>
    %c28_32 = arith.constant 28 : index
    %c992 = arith.constant 992 : index
    %51 = vector.load %arg8[%c28_32, %c992] : memref<72x1024xf32, #tpu.memory_space<vmem>>, vector<4x32xf32>
    tpu.vector_store %arg8[%c28_32, %c992], %50 {strides = array<i32>} : memref<72x1024xf32, #tpu.memory_space<vmem>>, vector<4x32xf32>,
    %52 = vector.extract_strided_slice %1 {offsets = [0, 33], sizes = [4, 991], strides = [1, 1]} : vector<4x1024xf32> to vector<4x991xf32>
    %c8_33 = arith.constant 8 : index
    %c0_34 = arith.constant 0 : index
    %53 = vector.load %arg3[%c8_33, %c0_34] : memref<9x1024xf32, #tpu.memory_space<vmem>>, vector<1x991xf32>
    %54 = vector.broadcast %53 : vector<1x991xf32> to vector<4x991xf32>
    %55 = arith.mulf %52, %54 : vector<4x991xf32>
    %c32_35 = arith.constant 32 : index
    %c0_36 = arith.constant 0 : index
    %56 = vector.load %arg8[%c32_35, %c0_36] : memref<72x1024xf32, #tpu.memory_space<vmem>>, vector<4x991xf32>
    tpu.vector_store %arg8[%c32_35, %c0_36], %55 {strides = array<i32>} : memref<72x1024xf32, #tpu.memory_space<vmem>>, vector<4x991xf32>,
    %cst_37 = arith.constant 0.000000e+00 : f32
    %57 = vector.broadcast %cst_37 : f32 to vector<4x33xf32>
    %c32_38 = arith.constant 32 : index
    %c991 = arith.constant 991 : index
    %58 = vector.load %arg8[%c32_38, %c991] : memref<72x1024xf32, #tpu.memory_space<vmem>>, vector<4x33xf32>
    tpu.vector_store %arg8[%c32_38, %c991], %57 {strides = array<i32>} : memref<72x1024xf32, #tpu.memory_space<vmem>>, vector<4x33xf32>,
    %c0_39 = arith.constant 0 : index
    %c0_40 = arith.constant 0 : index
    %c0_41 = arith.constant 0 : index
    %59 = vector.load %arg2[%c0_39, %c0_40, %c0_41] : memref<1x4x1024xf32, #tpu.memory_space<vmem>>, vector<1x4x1024xf32>
    %60 = vector.shape_cast %59 : vector<1x4x1024xf32> to vector<4x1024xf32>
    %61 = vector.extract_strided_slice %60 {offsets = [0, 0], sizes = [4, 991], strides = [1, 1]} : vector<4x1024xf32> to vector<4x991xf32>
    %c0_42 = arith.constant 0 : index
    %c33_43 = arith.constant 33 : index
    %62 = vector.load %arg3[%c0_42, %c33_43] : memref<9x1024xf32, #tpu.memory_space<vmem>>, vector<1x991xf32>
    %63 = vector.broadcast %62 : vector<1x991xf32> to vector<4x991xf32>
    %64 = arith.mulf %61, %63 : vector<4x991xf32>
    %c36 = arith.constant 36 : index
    %c33_44 = arith.constant 33 : index
    %65 = vector.load %arg8[%c36, %c33_44] : memref<72x1024xf32, #tpu.memory_space<vmem>>, vector<4x991xf32>
    tpu.vector_store %arg8[%c36, %c33_44], %64 {strides = array<i32>} : memref<72x1024xf32, #tpu.memory_space<vmem>>, vector<4x991xf32>,
    %cst_45 = arith.constant 0.000000e+00 : f32
    %66 = vector.broadcast %cst_45 : f32 to vector<4x33xf32>
    %c36_46 = arith.constant 36 : index
    %c0_47 = arith.constant 0 : index
    %67 = vector.load %arg8[%c36_46, %c0_47] : memref<72x1024xf32, #tpu.memory_space<vmem>>, vector<4x33xf32>
    tpu.vector_store %arg8[%c36_46, %c0_47], %66 {strides = array<i32>} : memref<72x1024xf32, #tpu.memory_space<vmem>>, vector<4x33xf32>,
    %68 = vector.extract_strided_slice %60 {offsets = [0, 0], sizes = [4, 992], strides = [1, 1]} : vector<4x1024xf32> to vector<4x992xf32>
    %c1_48 = arith.constant 1 : index
    %c32_49 = arith.constant 32 : index
    %69 = vector.load %arg3[%c1_48, %c32_49] : memref<9x1024xf32, #tpu.memory_space<vmem>>, vector<1x992xf32>
    %70 = vector.broadcast %69 : vector<1x992xf32> to vector<4x992xf32>
    %71 = arith.mulf %68, %70 : vector<4x992xf32>
    %c40 = arith.constant 40 : index
    %c32_50 = arith.constant 32 : index
    %72 = vector.load %arg8[%c40, %c32_50] : memref<72x1024xf32, #tpu.memory_space<vmem>>, vector<4x992xf32>
    tpu.vector_store %arg8[%c40, %c32_50], %71 {strides = array<i32>} : memref<72x1024xf32, #tpu.memory_space<vmem>>, vector<4x992xf32>,
    %cst_51 = arith.constant 0.000000e+00 : f32
    %73 = vector.broadcast %cst_51 : f32 to vector<4x32xf32>
    %c40_52 = arith.constant 40 : index
    %c0_53 = arith.constant 0 : index
    %74 = vector.load %arg8[%c40_52, %c0_53] : memref<72x1024xf32, #tpu.memory_space<vmem>>, vector<4x32xf32>
    tpu.vector_store %arg8[%c40_52, %c0_53], %73 {strides = array<i32>} : memref<72x1024xf32, #tpu.memory_space<vmem>>, vector<4x32xf32>,
    %75 = vector.extract_strided_slice %60 {offsets = [0, 0], sizes = [4, 993], strides = [1, 1]} : vector<4x1024xf32> to vector<4x993xf32>
    %c2_54 = arith.constant 2 : index
    %c31_55 = arith.constant 31 : index
    %76 = vector.load %arg3[%c2_54, %c31_55] : memref<9x1024xf32, #tpu.memory_space<vmem>>, vector<1x993xf32>
    %77 = vector.broadcast %76 : vector<1x993xf32> to vector<4x993xf32>
    %78 = arith.mulf %75, %77 : vector<4x993xf32>
    %c44 = arith.constant 44 : index
    %c31_56 = arith.constant 31 : index
    %79 = vector.load %arg8[%c44, %c31_56] : memref<72x1024xf32, #tpu.memory_space<vmem>>, vector<4x993xf32>
    tpu.vector_store %arg8[%c44, %c31_56], %78 {strides = array<i32>} : memref<72x1024xf32, #tpu.memory_space<vmem>>, vector<4x993xf32>,
    %cst_57 = arith.constant 0.000000e+00 : f32
    %80 = vector.broadcast %cst_57 : f32 to vector<4x31xf32>
    %c44_58 = arith.constant 44 : index
    %c0_59 = arith.constant 0 : index
    %81 = vector.load %arg8[%c44_58, %c0_59] : memref<72x1024xf32, #tpu.memory_space<vmem>>, vector<4x31xf32>
    tpu.vector_store %arg8[%c44_58, %c0_59], %80 {strides = array<i32>} : memref<72x1024xf32, #tpu.memory_space<vmem>>, vector<4x31xf32>,
    %82 = vector.extract_strided_slice %60 {offsets = [0, 0], sizes = [4, 1023], strides = [1, 1]} : vector<4x1024xf32> to vector<4x1023xf32>
    %c3_60 = arith.constant 3 : index
    %c1_61 = arith.constant 1 : index
    %83 = vector.load %arg3[%c3_60, %c1_61] : memref<9x1024xf32, #tpu.memory_space<vmem>>, vector<1x1023xf32>
    %84 = vector.broadcast %83 : vector<1x1023xf32> to vector<4x1023xf32>
    %85 = arith.mulf %82, %84 : vector<4x1023xf32>
    %c48 = arith.constant 48 : index
    %c1_62 = arith.constant 1 : index
    %86 = vector.load %arg8[%c48, %c1_62] : memref<72x1024xf32, #tpu.memory_space<vmem>>, vector<4x1023xf32>
    tpu.vector_store %arg8[%c48, %c1_62], %85 {strides = array<i32>} : memref<72x1024xf32, #tpu.memory_space<vmem>>, vector<4x1023xf32>,
    %cst_63 = arith.constant 0.000000e+00 : f32
    %87 = vector.broadcast %cst_63 : f32 to vector<4x1xf32>
    %c48_64 = arith.constant 48 : index
    %c0_65 = arith.constant 0 : index
    %88 = vector.load %arg8[%c48_64, %c0_65] : memref<72x1024xf32, #tpu.memory_space<vmem>>, vector<4x1xf32>
    tpu.vector_store %arg8[%c48_64, %c0_65], %87 {strides = array<i32>} : memref<72x1024xf32, #tpu.memory_space<vmem>>, vector<4x1xf32>,
    %c52 = arith.constant 52 : index
    %c0_66 = arith.constant 0 : index
    %89 = vector.load %arg8[%c52, %c0_66] : memref<72x1024xf32, #tpu.memory_space<vmem>>, vector<4x1024xf32>
    tpu.vector_store %arg8[%c52, %c0_66], %60 {strides = array<i32>} : memref<72x1024xf32, #tpu.memory_space<vmem>>, vector<4x1024xf32>,
    %90 = vector.extract_strided_slice %60 {offsets = [0, 1], sizes = [4, 1023], strides = [1, 1]} : vector<4x1024xf32> to vector<4x1023xf32>
    %c5_67 = arith.constant 5 : index
    %c0_68 = arith.constant 0 : index
    %91 = vector.load %arg3[%c5_67, %c0_68] : memref<9x1024xf32, #tpu.memory_space<vmem>>, vector<1x1023xf32>
    %92 = vector.broadcast %91 : vector<1x1023xf32> to vector<4x1023xf32>
    %93 = arith.mulf %90, %92 : vector<4x1023xf32>
    %c56 = arith.constant 56 : index
    %c0_69 = arith.constant 0 : index
    %94 = vector.load %arg8[%c56, %c0_69] : memref<72x1024xf32, #tpu.memory_space<vmem>>, vector<4x1023xf32>
    tpu.vector_store %arg8[%c56, %c0_69], %93 {strides = array<i32>} : memref<72x1024xf32, #tpu.memory_space<vmem>>, vector<4x1023xf32>,
    %cst_70 = arith.constant 0.000000e+00 : f32
    %95 = vector.broadcast %cst_70 : f32 to vector<4x1xf32>
    %c56_71 = arith.constant 56 : index
    %c1023_72 = arith.constant 1023 : index
    %96 = vector.load %arg8[%c56_71, %c1023_72] : memref<72x1024xf32, #tpu.memory_space<vmem>>, vector<4x1xf32>
    tpu.vector_store %arg8[%c56_71, %c1023_72], %95 {strides = array<i32>} : memref<72x1024xf32, #tpu.memory_space<vmem>>, vector<4x1xf32>,
    %97 = vector.extract_strided_slice %60 {offsets = [0, 31], sizes = [4, 993], strides = [1, 1]} : vector<4x1024xf32> to vector<4x993xf32>
    %c6_73 = arith.constant 6 : index
    %c0_74 = arith.constant 0 : index
    %98 = vector.load %arg3[%c6_73, %c0_74] : memref<9x1024xf32, #tpu.memory_space<vmem>>, vector<1x993xf32>
    %99 = vector.broadcast %98 : vector<1x993xf32> to vector<4x993xf32>
    %100 = arith.mulf %97, %99 : vector<4x993xf32>
    %c60 = arith.constant 60 : index
    %c0_75 = arith.constant 0 : index
    %101 = vector.load %arg8[%c60, %c0_75] : memref<72x1024xf32, #tpu.memory_space<vmem>>, vector<4x993xf32>
    tpu.vector_store %arg8[%c60, %c0_75], %100 {strides = array<i32>} : memref<72x1024xf32, #tpu.memory_space<vmem>>, vector<4x993xf32>,
    %cst_76 = arith.constant 0.000000e+00 : f32
    %102 = vector.broadcast %cst_76 : f32 to vector<4x31xf32>
    %c60_77 = arith.constant 60 : index
    %c993_78 = arith.constant 993 : index
    %103 = vector.load %arg8[%c60_77, %c993_78] : memref<72x1024xf32, #tpu.memory_space<vmem>>, vector<4x31xf32>
    tpu.vector_store %arg8[%c60_77, %c993_78], %102 {strides = array<i32>} : memref<72x1024xf32, #tpu.memory_space<vmem>>, vector<4x31xf32>,
    %104 = vector.extract_strided_slice %60 {offsets = [0, 32], sizes = [4, 992], strides = [1, 1]} : vector<4x1024xf32> to vector<4x992xf32>
    %c7_79 = arith.constant 7 : index
    %c0_80 = arith.constant 0 : index
    %105 = vector.load %arg3[%c7_79, %c0_80] : memref<9x1024xf32, #tpu.memory_space<vmem>>, vector<1x992xf32>
    %106 = vector.broadcast %105 : vector<1x992xf32> to vector<4x992xf32>
    %107 = arith.mulf %104, %106 : vector<4x992xf32>
    %c64 = arith.constant 64 : index
    %c0_81 = arith.constant 0 : index
    %108 = vector.load %arg8[%c64, %c0_81] : memref<72x1024xf32, #tpu.memory_space<vmem>>, vector<4x992xf32>
    tpu.vector_store %arg8[%c64, %c0_81], %107 {strides = array<i32>} : memref<72x1024xf32, #tpu.memory_space<vmem>>, vector<4x992xf32>,
    %cst_82 = arith.constant 0.000000e+00 : f32
    %109 = vector.broadcast %cst_82 : f32 to vector<4x32xf32>
    %c64_83 = arith.constant 64 : index
    %c992_84 = arith.constant 992 : index
    %110 = vector.load %arg8[%c64_83, %c992_84] : memref<72x1024xf32, #tpu.memory_space<vmem>>, vector<4x32xf32>
    tpu.vector_store %arg8[%c64_83, %c992_84], %109 {strides = array<i32>} : memref<72x1024xf32, #tpu.memory_space<vmem>>, vector<4x32xf32>,
    %111 = vector.extract_strided_slice %60 {offsets = [0, 33], sizes = [4, 991], strides = [1, 1]} : vector<4x1024xf32> to vector<4x991xf32>
    %c8_85 = arith.constant 8 : index
    %c0_86 = arith.constant 0 : index
    %112 = vector.load %arg3[%c8_85, %c0_86] : memref<9x1024xf32, #tpu.memory_space<vmem>>, vector<1x991xf32>
    %113 = vector.broadcast %112 : vector<1x991xf32> to vector<4x991xf32>
    %114 = arith.mulf %111, %113 : vector<4x991xf32>
    %c68 = arith.constant 68 : index
    %c0_87 = arith.constant 0 : index
    %115 = vector.load %arg8[%c68, %c0_87] : memref<72x1024xf32, #tpu.memory_space<vmem>>, vector<4x991xf32>
    tpu.vector_store %arg8[%c68, %c0_87], %114 {strides = array<i32>} : memref<72x1024xf32, #tpu.memory_space<vmem>>, vector<4x991xf32>,
    %cst_88 = arith.constant 0.000000e+00 : f32
    %116 = vector.broadcast %cst_88 : f32 to vector<4x33xf32>
    %c68_89 = arith.constant 68 : index
    %c991_90 = arith.constant 991 : index
    %117 = vector.load %arg8[%c68_89, %c991_90] : memref<72x1024xf32, #tpu.memory_space<vmem>>, vector<4x33xf32>
    tpu.vector_store %arg8[%c68_89, %c991_90], %116 {strides = array<i32>} : memref<72x1024xf32, #tpu.memory_space<vmem>>, vector<4x33xf32>,
    %c0_91 = arith.constant 0 : index
    %c0_92 = arith.constant 0 : index
    %118 = vector.load %arg4[%c0_91, %c0_92] : memref<4x72xbf16, #tpu.memory_space<vmem>>, vector<4x72xbf16>
    %c0_93 = arith.constant 0 : index
    %c0_94 = arith.constant 0 : index
    %119 = vector.load %arg8[%c0_93, %c0_94] : memref<72x1024xf32, #tpu.memory_space<vmem>>, vector<72x1024xf32>
    %120 = arith.truncf %119 : vector<72x1024xf32> to vector<72x1024xbf16>
    %cst_95 = arith.constant dense<0.000000e+00> : vector<4x1024xf32>
    %121 = tpu.matmul %118, %120, %cst_95 {dimension_numbers = #tpu.dot_dimension_numbers<[1], [0], [0], [1], [0, 0, 1, 1], [], []>} : vector<4x72xbf16>, vector<72x1024xbf16>, vector<4x1024xf32> -> vector<4x1024xf32>
    %c0_96 = arith.constant 0 : index
    %c0_97 = arith.constant 0 : index
    %122 = vector.load %arg5[%c0_96, %c0_97] : memref<4x1xf32, #tpu.memory_space<vmem>>, vector<4x1xf32>
    %123 = vector.broadcast %122 : vector<4x1xf32> to vector<4x1024xf32>
    %124 = arith.addf %121, %123 : vector<4x1024xf32>
    %c0_98 = arith.constant 0 : index
    %c0_99 = arith.constant 0 : index
    %c0_100 = arith.constant 0 : index
    %125 = vector.load %arg6[%c0_98, %c0_99, %c0_100] : memref<1x4x1024xf32, #tpu.memory_space<vmem>>, vector<1x4x1024xf32>
    %126 = vector.shape_cast %125 : vector<1x4x1024xf32> to vector<4x1024xf32>
    %127 = vector.shape_cast %124 : vector<4x1024xf32> to vector<1x4x1024xf32>
    tpu.vector_store %arg6[%c0_98, %c0_99, %c0_100], %127 {strides = array<i32>} : memref<1x4x1024xf32, #tpu.memory_space<vmem>>, vector<1x4x1024xf32>,
    %c0_i32 = arith.constant 0 : i32
    %128 = arith.cmpi eq, %arg0, %c0_i32 : i32
    %129 = arith.extui %128 : i1 to i32
    %c0_i32_101 = arith.constant 0 : i32
    %130 = arith.cmpi ne, %129, %c0_i32_101 : i32
    scf.if %130 {
      %cst_112 = arith.constant 0.000000e+00 : f32
      %142 = vector.broadcast %cst_112 : f32 to vector<4x2xf32>
      %c0_113 = arith.constant 0 : index
      %c0_114 = arith.constant 0 : index
      %143 = vector.load %arg7[%c0_113, %c0_114] : memref<4x2xf32, #tpu.memory_space<vmem>>, vector<4x2xf32>
      tpu.vector_store %arg7[%c0_113, %c0_114], %142 {strides = array<i32>} : memref<4x2xf32, #tpu.memory_space<vmem>>, vector<4x2xf32>,
    } else {
    }
    %c0_102 = arith.constant 0 : index
    %c0_103 = arith.constant 0 : index
    %131 = vector.load %arg7[%c0_102, %c0_103] : memref<4x2xf32, #tpu.memory_space<vmem>>, vector<4x1xf32>
    %cst_104 = arith.constant dense<0.000000e+00> : vector<4xf32>
    %132 = vector.multi_reduction <add>, %124, %cst_104 [1] : vector<4x1024xf32> to vector<4xf32>
    %133 = vector.shape_cast %132 : vector<4xf32> to vector<4x1xf32>
    %134 = arith.addf %131, %133 : vector<4x1xf32>
    %c0_105 = arith.constant 0 : index
    %c0_106 = arith.constant 0 : index
    %135 = vector.load %arg7[%c0_105, %c0_106] : memref<4x2xf32, #tpu.memory_space<vmem>>, vector<4x1xf32>
    tpu.vector_store %arg7[%c0_105, %c0_106], %134 {strides = array<i32>} : memref<4x2xf32, #tpu.memory_space<vmem>>, vector<4x1xf32>,
    %c0_107 = arith.constant 0 : index
    %c1_108 = arith.constant 1 : index
    %136 = vector.load %arg7[%c0_107, %c1_108] : memref<4x2xf32, #tpu.memory_space<vmem>>, vector<4x1xf32>
    %137 = arith.mulf %124, %124 : vector<4x1024xf32>
    %cst_109 = arith.constant dense<0.000000e+00> : vector<4xf32>
    %138 = vector.multi_reduction <add>, %137, %cst_109 [1] : vector<4x1024xf32> to vector<4xf32>
    %139 = vector.shape_cast %138 : vector<4xf32> to vector<4x1xf32>
    %140 = arith.addf %136, %139 : vector<4x1xf32>
    %c0_110 = arith.constant 0 : index
    %c1_111 = arith.constant 1 : index
    %141 = vector.load %arg7[%c0_110, %c1_111] : memref<4x2xf32, #tpu.memory_space<vmem>>, vector<4x1xf32>
    tpu.vector_store %arg7[%c0_110, %c1_111], %140 {strides = array<i32>} : memref<4x2xf32, #tpu.memory_space<vmem>>, vector<4x1xf32>,
    return
  }
  func.func @transform_0(%arg0: i32) -> (i32, i32, i32) {
    %c0_i32 = arith.constant 0 : i32
    %c0_i32_0 = arith.constant 0 : i32
    %c0_i32_1 = arith.constant 0 : i32
    return %arg0, %c0_i32, %c0_i32_0 : i32, i32, i32
  }
  func.func @transform_1(%arg0: i32) -> (i32, i32, i32) {
    %c0_i32 = arith.constant 0 : i32
    %c0_i32_0 = arith.constant 0 : i32
    %c0_i32_1 = arith.constant 0 : i32
    return %arg0, %c0_i32, %c0_i32_0 : i32, i32, i32
  }
  func.func @transform_2(%arg0: i32) -> (i32, i32) {
    %c0_i32 = arith.constant 0 : i32
    %c0_i32_0 = arith.constant 0 : i32
    %c0_i32_1 = arith.constant 0 : i32
    return %c0_i32, %c0_i32_0 : i32, i32
  }
  func.func @transform_3(%arg0: i32) -> (i32, i32) {
    %c0_i32 = arith.constant 0 : i32
    %c0_i32_0 = arith.constant 0 : i32
    %c0_i32_1 = arith.constant 0 : i32
    return %c0_i32, %c0_i32_0 : i32, i32
  }
  func.func @transform_4(%arg0: i32) -> (i32, i32) {
    %c0_i32 = arith.constant 0 : i32
    %c0_i32_0 = arith.constant 0 : i32
    %c0_i32_1 = arith.constant 0 : i32
    return %c0_i32, %c0_i32_0 : i32, i32
  }
  func.func @transform_5(%arg0: i32) -> (i32, i32, i32) {
    %c0_i32 = arith.constant 0 : i32
    %c0_i32_0 = arith.constant 0 : i32
    %c0_i32_1 = arith.constant 0 : i32
    return %arg0, %c0_i32, %c0_i32_0 : i32, i32, i32
  }
  func.func @transform_6(%arg0: i32) -> (i32, i32) {
    %c0_i32 = arith.constant 0 : i32
    %c0_i32_0 = arith.constant 0 : i32
    %c0_i32_1 = arith.constant 0 : i32
    return %c0_i32, %c0_i32_0 : i32, i32
  }
}

module attributes {stable_mosaic.version = 11 : i64} {
  func.func @_bn_relu_kernel(%arg0: i32, %arg1: memref<1x4x1024xf32, #tpu.memory_space<vmem>>, %arg2: memref<4x1xf32, #tpu.memory_space<vmem>>, %arg3: memref<4x1xf32, #tpu.memory_space<vmem>>, %arg4: memref<1x4x1024xf32, #tpu.memory_space<vmem>>) attributes {dimension_semantics = [#tpu.dimension_semantics<parallel>], iteration_bounds = array<i64: 2>, scalar_prefetch = 0 : i64, scratch_operands = 0 : i64, tpu.core_type = #tpu.core_type<tc>, window_params = [{transform_indices = @transform_0, window_bounds = array<i64: 1, 4, 1024>}, {pipeline_mode = #tpu.pipeline_mode<synchronous>, transform_indices = @transform_1, window_bounds = array<i64: 4, 1>}, {pipeline_mode = #tpu.pipeline_mode<synchronous>, transform_indices = @transform_2, window_bounds = array<i64: 4, 1>}, {transform_indices = @transform_3, window_bounds = array<i64: 1, 4, 1024>}]} {
    %c0 = arith.constant 0 : index
    %c0_0 = arith.constant 0 : index
    %c0_1 = arith.constant 0 : index
    %0 = vector.load %arg1[%c0, %c0_0, %c0_1] : memref<1x4x1024xf32, #tpu.memory_space<vmem>>, vector<1x4x1024xf32>
    %1 = vector.shape_cast %0 : vector<1x4x1024xf32> to vector<4x1024xf32>
    %c0_2 = arith.constant 0 : index
    %c0_3 = arith.constant 0 : index
    %2 = vector.load %arg2[%c0_2, %c0_3] : memref<4x1xf32, #tpu.memory_space<vmem>>, vector<4x1xf32>
    %3 = vector.broadcast %2 : vector<4x1xf32> to vector<4x1024xf32>
    %4 = arith.mulf %1, %3 : vector<4x1024xf32>
    %c0_4 = arith.constant 0 : index
    %c0_5 = arith.constant 0 : index
    %5 = vector.load %arg3[%c0_4, %c0_5] : memref<4x1xf32, #tpu.memory_space<vmem>>, vector<4x1xf32>
    %6 = vector.broadcast %5 : vector<4x1xf32> to vector<4x1024xf32>
    %7 = arith.addf %4, %6 : vector<4x1024xf32>
    %cst = arith.constant 0.000000e+00 : f32
    %8 = vector.broadcast %cst : f32 to vector<4x1024xf32>
    %9 = arith.maximumf %7, %8 : vector<4x1024xf32>
    %c0_6 = arith.constant 0 : index
    %c0_7 = arith.constant 0 : index
    %c0_8 = arith.constant 0 : index
    %10 = vector.load %arg4[%c0_6, %c0_7, %c0_8] : memref<1x4x1024xf32, #tpu.memory_space<vmem>>, vector<1x4x1024xf32>
    %11 = vector.shape_cast %10 : vector<1x4x1024xf32> to vector<4x1024xf32>
    %12 = vector.shape_cast %9 : vector<4x1024xf32> to vector<1x4x1024xf32>
    tpu.vector_store %arg4[%c0_6, %c0_7, %c0_8], %12 {strides = array<i32>} : memref<1x4x1024xf32, #tpu.memory_space<vmem>>, vector<1x4x1024xf32>,
    return
  }
  func.func @transform_0(%arg0: i32) -> (i32, i32, i32) {
    %c0_i32 = arith.constant 0 : i32
    %c0_i32_0 = arith.constant 0 : i32
    %c0_i32_1 = arith.constant 0 : i32
    return %arg0, %c0_i32, %c0_i32_0 : i32, i32, i32
  }
  func.func @transform_1(%arg0: i32) -> (i32, i32) {
    %c0_i32 = arith.constant 0 : i32
    %c0_i32_0 = arith.constant 0 : i32
    %c0_i32_1 = arith.constant 0 : i32
    return %c0_i32, %c0_i32_0 : i32, i32
  }
  func.func @transform_2(%arg0: i32) -> (i32, i32) {
    %c0_i32 = arith.constant 0 : i32
    %c0_i32_0 = arith.constant 0 : i32
    %c0_i32_1 = arith.constant 0 : i32
    return %c0_i32, %c0_i32_0 : i32, i32
  }
  func.func @transform_3(%arg0: i32) -> (i32, i32, i32) {
    %c0_i32 = arith.constant 0 : i32
    %c0_i32_0 = arith.constant 0 : i32
    %c0_i32_1 = arith.constant 0 : i32
    return %arg0, %c0_i32, %c0_i32_0 : i32, i32, i32
  }
}

module attributes {stable_mosaic.version = 11 : i64} {
  func.func @kernel(%arg0: i32, %arg1: memref<1x4x1024xf32, #tpu.memory_space<vmem>>, %arg2: memref<4x1xf32, #tpu.memory_space<vmem>>, %arg3: memref<4x1xf32, #tpu.memory_space<vmem>>, %arg4: memref<9x1024xf32, #tpu.memory_space<vmem>>, %arg5: memref<4x36xbf16, #tpu.memory_space<vmem>>, %arg6: memref<4x1xf32, #tpu.memory_space<vmem>>, %arg7: memref<1x4x1024xf32, #tpu.memory_space<vmem>>, %arg8: memref<4x2xf32, #tpu.memory_space<vmem>>, %arg9: memref<36x1024xf32, #tpu.memory_space<vmem>>) attributes {dimension_semantics = [#tpu.dimension_semantics<arbitrary>], iteration_bounds = array<i64: 2>, scalar_prefetch = 0 : i64, scratch_operands = 1 : i64, tpu.core_type = #tpu.core_type<tc>, window_params = [{transform_indices = @transform_0, window_bounds = array<i64: 1, 4, 1024>}, {pipeline_mode = #tpu.pipeline_mode<synchronous>, transform_indices = @transform_1, window_bounds = array<i64: 4, 1>}, {pipeline_mode = #tpu.pipeline_mode<synchronous>, transform_indices = @transform_2, window_bounds = array<i64: 4, 1>}, {pipeline_mode = #tpu.pipeline_mode<synchronous>, transform_indices = @transform_3, window_bounds = array<i64: 9, 1024>}, {pipeline_mode = #tpu.pipeline_mode<synchronous>, transform_indices = @transform_4, window_bounds = array<i64: 4, 36>}, {pipeline_mode = #tpu.pipeline_mode<synchronous>, transform_indices = @transform_5, window_bounds = array<i64: 4, 1>}, {transform_indices = @transform_6, window_bounds = array<i64: 1, 4, 1024>}, {pipeline_mode = #tpu.pipeline_mode<synchronous>, transform_indices = @transform_7, window_bounds = array<i64: 4, 2>}]} {
    %c0 = arith.constant 0 : index
    %c0_0 = arith.constant 0 : index
    %c0_1 = arith.constant 0 : index
    %0 = vector.load %arg1[%c0, %c0_0, %c0_1] : memref<1x4x1024xf32, #tpu.memory_space<vmem>>, vector<1x4x1024xf32>
    %1 = vector.shape_cast %0 : vector<1x4x1024xf32> to vector<4x1024xf32>
    %c0_2 = arith.constant 0 : index
    %c0_3 = arith.constant 0 : index
    %2 = vector.load %arg2[%c0_2, %c0_3] : memref<4x1xf32, #tpu.memory_space<vmem>>, vector<4x1xf32>
    %3 = vector.broadcast %2 : vector<4x1xf32> to vector<4x1024xf32>
    %4 = arith.mulf %1, %3 : vector<4x1024xf32>
    %c0_4 = arith.constant 0 : index
    %c0_5 = arith.constant 0 : index
    %5 = vector.load %arg3[%c0_4, %c0_5] : memref<4x1xf32, #tpu.memory_space<vmem>>, vector<4x1xf32>
    %6 = vector.broadcast %5 : vector<4x1xf32> to vector<4x1024xf32>
    %7 = arith.addf %4, %6 : vector<4x1024xf32>
    %cst = arith.constant 0.000000e+00 : f32
    %8 = vector.broadcast %cst : f32 to vector<4x1024xf32>
    %9 = arith.maximumf %7, %8 : vector<4x1024xf32>
    %10 = vector.extract_strided_slice %9 {offsets = [0, 0], sizes = [4, 991], strides = [1, 1]} : vector<4x1024xf32> to vector<4x991xf32>
    %c0_6 = arith.constant 0 : index
    %c33 = arith.constant 33 : index
    %11 = vector.load %arg4[%c0_6, %c33] : memref<9x1024xf32, #tpu.memory_space<vmem>>, vector<1x991xf32>
    %12 = vector.broadcast %11 : vector<1x991xf32> to vector<4x991xf32>
    %13 = arith.mulf %10, %12 : vector<4x991xf32>
    %c0_7 = arith.constant 0 : index
    %c33_8 = arith.constant 33 : index
    %14 = vector.load %arg9[%c0_7, %c33_8] : memref<36x1024xf32, #tpu.memory_space<vmem>>, vector<4x991xf32>
    tpu.vector_store %arg9[%c0_7, %c33_8], %13 {strides = array<i32>} : memref<36x1024xf32, #tpu.memory_space<vmem>>, vector<4x991xf32>,
    %cst_9 = arith.constant 0.000000e+00 : f32
    %15 = vector.broadcast %cst_9 : f32 to vector<4x33xf32>
    %c0_10 = arith.constant 0 : index
    %c0_11 = arith.constant 0 : index
    %16 = vector.load %arg9[%c0_10, %c0_11] : memref<36x1024xf32, #tpu.memory_space<vmem>>, vector<4x33xf32>
    tpu.vector_store %arg9[%c0_10, %c0_11], %15 {strides = array<i32>} : memref<36x1024xf32, #tpu.memory_space<vmem>>, vector<4x33xf32>,
    %17 = vector.extract_strided_slice %9 {offsets = [0, 0], sizes = [4, 992], strides = [1, 1]} : vector<4x1024xf32> to vector<4x992xf32>
    %c1 = arith.constant 1 : index
    %c32 = arith.constant 32 : index
    %18 = vector.load %arg4[%c1, %c32] : memref<9x1024xf32, #tpu.memory_space<vmem>>, vector<1x992xf32>
    %19 = vector.broadcast %18 : vector<1x992xf32> to vector<4x992xf32>
    %20 = arith.mulf %17, %19 : vector<4x992xf32>
    %c4 = arith.constant 4 : index
    %c32_12 = arith.constant 32 : index
    %21 = vector.load %arg9[%c4, %c32_12] : memref<36x1024xf32, #tpu.memory_space<vmem>>, vector<4x992xf32>
    tpu.vector_store %arg9[%c4, %c32_12], %20 {strides = array<i32>} : memref<36x1024xf32, #tpu.memory_space<vmem>>, vector<4x992xf32>,
    %cst_13 = arith.constant 0.000000e+00 : f32
    %22 = vector.broadcast %cst_13 : f32 to vector<4x32xf32>
    %c4_14 = arith.constant 4 : index
    %c0_15 = arith.constant 0 : index
    %23 = vector.load %arg9[%c4_14, %c0_15] : memref<36x1024xf32, #tpu.memory_space<vmem>>, vector<4x32xf32>
    tpu.vector_store %arg9[%c4_14, %c0_15], %22 {strides = array<i32>} : memref<36x1024xf32, #tpu.memory_space<vmem>>, vector<4x32xf32>,
    %24 = vector.extract_strided_slice %9 {offsets = [0, 0], sizes = [4, 993], strides = [1, 1]} : vector<4x1024xf32> to vector<4x993xf32>
    %c2 = arith.constant 2 : index
    %c31 = arith.constant 31 : index
    %25 = vector.load %arg4[%c2, %c31] : memref<9x1024xf32, #tpu.memory_space<vmem>>, vector<1x993xf32>
    %26 = vector.broadcast %25 : vector<1x993xf32> to vector<4x993xf32>
    %27 = arith.mulf %24, %26 : vector<4x993xf32>
    %c8 = arith.constant 8 : index
    %c31_16 = arith.constant 31 : index
    %28 = vector.load %arg9[%c8, %c31_16] : memref<36x1024xf32, #tpu.memory_space<vmem>>, vector<4x993xf32>
    tpu.vector_store %arg9[%c8, %c31_16], %27 {strides = array<i32>} : memref<36x1024xf32, #tpu.memory_space<vmem>>, vector<4x993xf32>,
    %cst_17 = arith.constant 0.000000e+00 : f32
    %29 = vector.broadcast %cst_17 : f32 to vector<4x31xf32>
    %c8_18 = arith.constant 8 : index
    %c0_19 = arith.constant 0 : index
    %30 = vector.load %arg9[%c8_18, %c0_19] : memref<36x1024xf32, #tpu.memory_space<vmem>>, vector<4x31xf32>
    tpu.vector_store %arg9[%c8_18, %c0_19], %29 {strides = array<i32>} : memref<36x1024xf32, #tpu.memory_space<vmem>>, vector<4x31xf32>,
    %31 = vector.extract_strided_slice %9 {offsets = [0, 0], sizes = [4, 1023], strides = [1, 1]} : vector<4x1024xf32> to vector<4x1023xf32>
    %c3 = arith.constant 3 : index
    %c1_20 = arith.constant 1 : index
    %32 = vector.load %arg4[%c3, %c1_20] : memref<9x1024xf32, #tpu.memory_space<vmem>>, vector<1x1023xf32>
    %33 = vector.broadcast %32 : vector<1x1023xf32> to vector<4x1023xf32>
    %34 = arith.mulf %31, %33 : vector<4x1023xf32>
    %c12 = arith.constant 12 : index
    %c1_21 = arith.constant 1 : index
    %35 = vector.load %arg9[%c12, %c1_21] : memref<36x1024xf32, #tpu.memory_space<vmem>>, vector<4x1023xf32>
    tpu.vector_store %arg9[%c12, %c1_21], %34 {strides = array<i32>} : memref<36x1024xf32, #tpu.memory_space<vmem>>, vector<4x1023xf32>,
    %cst_22 = arith.constant 0.000000e+00 : f32
    %36 = vector.broadcast %cst_22 : f32 to vector<4x1xf32>
    %c12_23 = arith.constant 12 : index
    %c0_24 = arith.constant 0 : index
    %37 = vector.load %arg9[%c12_23, %c0_24] : memref<36x1024xf32, #tpu.memory_space<vmem>>, vector<4x1xf32>
    tpu.vector_store %arg9[%c12_23, %c0_24], %36 {strides = array<i32>} : memref<36x1024xf32, #tpu.memory_space<vmem>>, vector<4x1xf32>,
    %c16 = arith.constant 16 : index
    %c0_25 = arith.constant 0 : index
    %38 = vector.load %arg9[%c16, %c0_25] : memref<36x1024xf32, #tpu.memory_space<vmem>>, vector<4x1024xf32>
    tpu.vector_store %arg9[%c16, %c0_25], %9 {strides = array<i32>} : memref<36x1024xf32, #tpu.memory_space<vmem>>, vector<4x1024xf32>,
    %39 = vector.extract_strided_slice %9 {offsets = [0, 1], sizes = [4, 1023], strides = [1, 1]} : vector<4x1024xf32> to vector<4x1023xf32>
    %c5 = arith.constant 5 : index
    %c0_26 = arith.constant 0 : index
    %40 = vector.load %arg4[%c5, %c0_26] : memref<9x1024xf32, #tpu.memory_space<vmem>>, vector<1x1023xf32>
    %41 = vector.broadcast %40 : vector<1x1023xf32> to vector<4x1023xf32>
    %42 = arith.mulf %39, %41 : vector<4x1023xf32>
    %c20 = arith.constant 20 : index
    %c0_27 = arith.constant 0 : index
    %43 = vector.load %arg9[%c20, %c0_27] : memref<36x1024xf32, #tpu.memory_space<vmem>>, vector<4x1023xf32>
    tpu.vector_store %arg9[%c20, %c0_27], %42 {strides = array<i32>} : memref<36x1024xf32, #tpu.memory_space<vmem>>, vector<4x1023xf32>,
    %cst_28 = arith.constant 0.000000e+00 : f32
    %44 = vector.broadcast %cst_28 : f32 to vector<4x1xf32>
    %c20_29 = arith.constant 20 : index
    %c1023 = arith.constant 1023 : index
    %45 = vector.load %arg9[%c20_29, %c1023] : memref<36x1024xf32, #tpu.memory_space<vmem>>, vector<4x1xf32>
    tpu.vector_store %arg9[%c20_29, %c1023], %44 {strides = array<i32>} : memref<36x1024xf32, #tpu.memory_space<vmem>>, vector<4x1xf32>,
    %46 = vector.extract_strided_slice %9 {offsets = [0, 31], sizes = [4, 993], strides = [1, 1]} : vector<4x1024xf32> to vector<4x993xf32>
    %c6 = arith.constant 6 : index
    %c0_30 = arith.constant 0 : index
    %47 = vector.load %arg4[%c6, %c0_30] : memref<9x1024xf32, #tpu.memory_space<vmem>>, vector<1x993xf32>
    %48 = vector.broadcast %47 : vector<1x993xf32> to vector<4x993xf32>
    %49 = arith.mulf %46, %48 : vector<4x993xf32>
    %c24 = arith.constant 24 : index
    %c0_31 = arith.constant 0 : index
    %50 = vector.load %arg9[%c24, %c0_31] : memref<36x1024xf32, #tpu.memory_space<vmem>>, vector<4x993xf32>
    tpu.vector_store %arg9[%c24, %c0_31], %49 {strides = array<i32>} : memref<36x1024xf32, #tpu.memory_space<vmem>>, vector<4x993xf32>,
    %cst_32 = arith.constant 0.000000e+00 : f32
    %51 = vector.broadcast %cst_32 : f32 to vector<4x31xf32>
    %c24_33 = arith.constant 24 : index
    %c993 = arith.constant 993 : index
    %52 = vector.load %arg9[%c24_33, %c993] : memref<36x1024xf32, #tpu.memory_space<vmem>>, vector<4x31xf32>
    tpu.vector_store %arg9[%c24_33, %c993], %51 {strides = array<i32>} : memref<36x1024xf32, #tpu.memory_space<vmem>>, vector<4x31xf32>,
    %53 = vector.extract_strided_slice %9 {offsets = [0, 32], sizes = [4, 992], strides = [1, 1]} : vector<4x1024xf32> to vector<4x992xf32>
    %c7 = arith.constant 7 : index
    %c0_34 = arith.constant 0 : index
    %54 = vector.load %arg4[%c7, %c0_34] : memref<9x1024xf32, #tpu.memory_space<vmem>>, vector<1x992xf32>
    %55 = vector.broadcast %54 : vector<1x992xf32> to vector<4x992xf32>
    %56 = arith.mulf %53, %55 : vector<4x992xf32>
    %c28 = arith.constant 28 : index
    %c0_35 = arith.constant 0 : index
    %57 = vector.load %arg9[%c28, %c0_35] : memref<36x1024xf32, #tpu.memory_space<vmem>>, vector<4x992xf32>
    tpu.vector_store %arg9[%c28, %c0_35], %56 {strides = array<i32>} : memref<36x1024xf32, #tpu.memory_space<vmem>>, vector<4x992xf32>,
    %cst_36 = arith.constant 0.000000e+00 : f32
    %58 = vector.broadcast %cst_36 : f32 to vector<4x32xf32>
    %c28_37 = arith.constant 28 : index
    %c992 = arith.constant 992 : index
    %59 = vector.load %arg9[%c28_37, %c992] : memref<36x1024xf32, #tpu.memory_space<vmem>>, vector<4x32xf32>
    tpu.vector_store %arg9[%c28_37, %c992], %58 {strides = array<i32>} : memref<36x1024xf32, #tpu.memory_space<vmem>>, vector<4x32xf32>,
    %60 = vector.extract_strided_slice %9 {offsets = [0, 33], sizes = [4, 991], strides = [1, 1]} : vector<4x1024xf32> to vector<4x991xf32>
    %c8_38 = arith.constant 8 : index
    %c0_39 = arith.constant 0 : index
    %61 = vector.load %arg4[%c8_38, %c0_39] : memref<9x1024xf32, #tpu.memory_space<vmem>>, vector<1x991xf32>
    %62 = vector.broadcast %61 : vector<1x991xf32> to vector<4x991xf32>
    %63 = arith.mulf %60, %62 : vector<4x991xf32>
    %c32_40 = arith.constant 32 : index
    %c0_41 = arith.constant 0 : index
    %64 = vector.load %arg9[%c32_40, %c0_41] : memref<36x1024xf32, #tpu.memory_space<vmem>>, vector<4x991xf32>
    tpu.vector_store %arg9[%c32_40, %c0_41], %63 {strides = array<i32>} : memref<36x1024xf32, #tpu.memory_space<vmem>>, vector<4x991xf32>,
    %cst_42 = arith.constant 0.000000e+00 : f32
    %65 = vector.broadcast %cst_42 : f32 to vector<4x33xf32>
    %c32_43 = arith.constant 32 : index
    %c991 = arith.constant 991 : index
    %66 = vector.load %arg9[%c32_43, %c991] : memref<36x1024xf32, #tpu.memory_space<vmem>>, vector<4x33xf32>
    tpu.vector_store %arg9[%c32_43, %c991], %65 {strides = array<i32>} : memref<36x1024xf32, #tpu.memory_space<vmem>>, vector<4x33xf32>,
    %c0_44 = arith.constant 0 : index
    %c0_45 = arith.constant 0 : index
    %67 = vector.load %arg5[%c0_44, %c0_45] : memref<4x36xbf16, #tpu.memory_space<vmem>>, vector<4x36xbf16>
    %c0_46 = arith.constant 0 : index
    %c0_47 = arith.constant 0 : index
    %68 = vector.load %arg9[%c0_46, %c0_47] : memref<36x1024xf32, #tpu.memory_space<vmem>>, vector<36x1024xf32>
    %69 = arith.truncf %68 : vector<36x1024xf32> to vector<36x1024xbf16>
    %cst_48 = arith.constant dense<0.000000e+00> : vector<4x1024xf32>
    %70 = tpu.matmul %67, %69, %cst_48 {dimension_numbers = #tpu.dot_dimension_numbers<[1], [0], [0], [1], [0, 0, 1, 1], [], []>} : vector<4x36xbf16>, vector<36x1024xbf16>, vector<4x1024xf32> -> vector<4x1024xf32>
    %c0_49 = arith.constant 0 : index
    %c0_50 = arith.constant 0 : index
    %71 = vector.load %arg6[%c0_49, %c0_50] : memref<4x1xf32, #tpu.memory_space<vmem>>, vector<4x1xf32>
    %72 = vector.broadcast %71 : vector<4x1xf32> to vector<4x1024xf32>
    %73 = arith.addf %70, %72 : vector<4x1024xf32>
    %c0_51 = arith.constant 0 : index
    %c0_52 = arith.constant 0 : index
    %c0_53 = arith.constant 0 : index
    %74 = vector.load %arg7[%c0_51, %c0_52, %c0_53] : memref<1x4x1024xf32, #tpu.memory_space<vmem>>, vector<1x4x1024xf32>
    %75 = vector.shape_cast %74 : vector<1x4x1024xf32> to vector<4x1024xf32>
    %76 = vector.shape_cast %73 : vector<4x1024xf32> to vector<1x4x1024xf32>
    tpu.vector_store %arg7[%c0_51, %c0_52, %c0_53], %76 {strides = array<i32>} : memref<1x4x1024xf32, #tpu.memory_space<vmem>>, vector<1x4x1024xf32>,
    %c0_i32 = arith.constant 0 : i32
    %77 = arith.cmpi eq, %arg0, %c0_i32 : i32
    %78 = arith.extui %77 : i1 to i32
    %c0_i32_54 = arith.constant 0 : i32
    %79 = arith.cmpi ne, %78, %c0_i32_54 : i32
    scf.if %79 {
      %cst_65 = arith.constant 0.000000e+00 : f32
      %91 = vector.broadcast %cst_65 : f32 to vector<4x2xf32>
      %c0_66 = arith.constant 0 : index
      %c0_67 = arith.constant 0 : index
      %92 = vector.load %arg8[%c0_66, %c0_67] : memref<4x2xf32, #tpu.memory_space<vmem>>, vector<4x2xf32>
      tpu.vector_store %arg8[%c0_66, %c0_67], %91 {strides = array<i32>} : memref<4x2xf32, #tpu.memory_space<vmem>>, vector<4x2xf32>,
    } else {
    }
    %c0_55 = arith.constant 0 : index
    %c0_56 = arith.constant 0 : index
    %80 = vector.load %arg8[%c0_55, %c0_56] : memref<4x2xf32, #tpu.memory_space<vmem>>, vector<4x1xf32>
    %cst_57 = arith.constant dense<0.000000e+00> : vector<4xf32>
    %81 = vector.multi_reduction <add>, %73, %cst_57 [1] : vector<4x1024xf32> to vector<4xf32>
    %82 = vector.shape_cast %81 : vector<4xf32> to vector<4x1xf32>
    %83 = arith.addf %80, %82 : vector<4x1xf32>
    %c0_58 = arith.constant 0 : index
    %c0_59 = arith.constant 0 : index
    %84 = vector.load %arg8[%c0_58, %c0_59] : memref<4x2xf32, #tpu.memory_space<vmem>>, vector<4x1xf32>
    tpu.vector_store %arg8[%c0_58, %c0_59], %83 {strides = array<i32>} : memref<4x2xf32, #tpu.memory_space<vmem>>, vector<4x1xf32>,
    %c0_60 = arith.constant 0 : index
    %c1_61 = arith.constant 1 : index
    %85 = vector.load %arg8[%c0_60, %c1_61] : memref<4x2xf32, #tpu.memory_space<vmem>>, vector<4x1xf32>
    %86 = arith.mulf %73, %73 : vector<4x1024xf32>
    %cst_62 = arith.constant dense<0.000000e+00> : vector<4xf32>
    %87 = vector.multi_reduction <add>, %86, %cst_62 [1] : vector<4x1024xf32> to vector<4xf32>
    %88 = vector.shape_cast %87 : vector<4xf32> to vector<4x1xf32>
    %89 = arith.addf %85, %88 : vector<4x1xf32>
    %c0_63 = arith.constant 0 : index
    %c1_64 = arith.constant 1 : index
    %90 = vector.load %arg8[%c0_63, %c1_64] : memref<4x2xf32, #tpu.memory_space<vmem>>, vector<4x1xf32>
    tpu.vector_store %arg8[%c0_63, %c1_64], %89 {strides = array<i32>} : memref<4x2xf32, #tpu.memory_space<vmem>>, vector<4x1xf32>,
    return
  }
  func.func @transform_0(%arg0: i32) -> (i32, i32, i32) {
    %c0_i32 = arith.constant 0 : i32
    %c0_i32_0 = arith.constant 0 : i32
    %c0_i32_1 = arith.constant 0 : i32
    return %arg0, %c0_i32, %c0_i32_0 : i32, i32, i32
  }
  func.func @transform_1(%arg0: i32) -> (i32, i32) {
    %c0_i32 = arith.constant 0 : i32
    %c0_i32_0 = arith.constant 0 : i32
    %c0_i32_1 = arith.constant 0 : i32
    return %c0_i32, %c0_i32_0 : i32, i32
  }
  func.func @transform_2(%arg0: i32) -> (i32, i32) {
    %c0_i32 = arith.constant 0 : i32
    %c0_i32_0 = arith.constant 0 : i32
    %c0_i32_1 = arith.constant 0 : i32
    return %c0_i32, %c0_i32_0 : i32, i32
  }
  func.func @transform_3(%arg0: i32) -> (i32, i32) {
    %c0_i32 = arith.constant 0 : i32
    %c0_i32_0 = arith.constant 0 : i32
    %c0_i32_1 = arith.constant 0 : i32
    return %c0_i32, %c0_i32_0 : i32, i32
  }
  func.func @transform_4(%arg0: i32) -> (i32, i32) {
    %c0_i32 = arith.constant 0 : i32
    %c0_i32_0 = arith.constant 0 : i32
    %c0_i32_1 = arith.constant 0 : i32
    return %c0_i32, %c0_i32_0 : i32, i32
  }
  func.func @transform_5(%arg0: i32) -> (i32, i32) {
    %c0_i32 = arith.constant 0 : i32
    %c0_i32_0 = arith.constant 0 : i32
    %c0_i32_1 = arith.constant 0 : i32
    return %c0_i32, %c0_i32_0 : i32, i32
  }
  func.func @transform_6(%arg0: i32) -> (i32, i32, i32) {
    %c0_i32 = arith.constant 0 : i32
    %c0_i32_0 = arith.constant 0 : i32
    %c0_i32_1 = arith.constant 0 : i32
    return %arg0, %c0_i32, %c0_i32_0 : i32, i32, i32
  }
  func.func @transform_7(%arg0: i32) -> (i32, i32) {
    %c0_i32 = arith.constant 0 : i32
    %c0_i32_0 = arith.constant 0 : i32
    %c0_i32_1 = arith.constant 0 : i32
    return %c0_i32, %c0_i32_0 : i32, i32
  }
}

</mosaic_0001>

<bundles_post_ra>
// kernel: tile.8
= control target key start
LH: loop header
LB: loop body
LE: loop exit
PB: predicated region body
PF: predicated region fallthrough
CT: control target
= control target key end

     0   :  { %s22_s0 = inlined_call_operand.vmem [shape: f32[4], index: 0, kind: input, shape index: {}]   ;;  %s23_s1 = inlined_call_operand.vmem [shape: f32[4,4], index: 1, kind: output, shape index: {}]  }
   0x1   :  { %v4_v0 = vld [vmem:[%s22_s0] ss:$0 sm:$0xff] }
   0x2   :  { %5 = vst [vmem:[%s23_s1] sm:$0xf] %v4_v0 }

// kernel: tile.0
= control target key start
LH: loop header
LB: loop body
LE: loop exit
PB: predicated region body
PF: predicated region fallthrough
CT: control target
= control target key end

     0   :  { %s34_s8 = smov 125   ;;  %vm7_vm0 = vcmask 7168   ;;  %s35_s11 = smov 126   ;;  %s61_s0 = inlined_call_operand.vmem [shape: f32[4,4], index: 0, kind: input, shape index: {}]   ;;  %s62_s1 = inlined_call_operand.vmem [shape: f32[16,1], index: 1, kind: output, shape index: {}]  }
   0x1   :  { %v4_v0 = vld [vmem:[%s61_s0] sm:$0xf]  ;;  %s33_s0 = smov 127  }
   0x2   :  { %5 = vst [vmem:[#allocation0] sm:$0xf] %v4_v0 }
   0x9   :  { %v9_v1 = vld [vmem:[#allocation0] sm:$0xf]  }
   0xa   :  { %v21_v2 = vld [vmem:[#allocation0] sm:$0xf]   ;;  %10 = vrot.lane.b32.xlu0 %v9_v1, %s33_s0 }
   0xb   :  { %22 = vrot.lane.b32.xlu1 %v21_v2, %s34_s8  ;;  %v6_v3 = vld [vmem:[#allocation0] sm:$0xf]  }
   0xc   :  { %v15_v4 = vld [vmem:[#allocation0] sm:$0xf]   ;;  %8 = vst.msk [vmem:[%s62_s1] ss:$4 sm:$0xf] %vm7_vm0, %v6_v3  }
   0xe   :  { %16 = vrot.lane.b32.xlu0 %v15_v4, %s35_s11 }
  0x7c   :  { %v11_v5 = vpop.permute.xlu0 %10  }
  0x7d   :  { %v23_v6 = vpop.permute.xlu1 %22   ;;  %27 = vst.msk [vmem:[%s62_s1 + $0x1] ss:$4 sm:$0xf] %vm7_vm0, %v11_v5  }
  0x7e   :  { %29 = vst.msk [vmem:[%s62_s1 + $0x3] ss:$4 sm:$0xf] %vm7_vm0, %v23_v6  }
  0x80   :  { %v17_v7 = vpop.permute.xlu0 %16  }
  0x81   :  { %28 = vst.msk [vmem:[%s62_s1 + $0x2] ss:$4 sm:$0xf] %vm7_vm0, %v17_v7  }

// kernel: stack_decoder_forward.4
= control target key start
LH: loop header
LB: loop body
LE: loop exit
PB: predicated region body
PF: predicated region fallthrough
CT: control target
= control target key end

     0   :  { %s523_s15 = smov 0   ;;  %s574_s0 = inlined_call_operand.vmem [shape: f32[2,8,256], index: 0, kind: input, shape index: {}]   ;;  %s575_s1 = inlined_call_operand.vmem [shape: f32[4,256], index: 1, kind: input, shape index: {}]   ;;  %s576_s2 = inlined_call_operand.vmem [shape: bf16[16,32], index: 2, kind: input, shape index: {}]   ;;  %s577_s3 = inlined_call_operand.vmem [shape: f32[16,1], index: 3, kind: input, shape index: {}]   ;;  %s578_s4 = inlined_call_operand.vmem [shape: f32[2,16,256], index: 4, kind: output, shape index: {}]  }
   0x1 LB: > { %s445_s16 = sadd.s32 4294967295, %s488_s15   ;;  %p449_p0 = scmp.ge.s32.totalorder %s488_s15, 1  ;;  %s488_s15 = sphi %s523_s15, %s14_s15  }
   0x2   : > { %p162_p1 = scmp.lt.s32.totalorder %s488_s15, 3 }
   0x4   : > { %p163_p2 = pnand %p449_p0, %p162_p1 }
   0x5   : > { %v206_v0 = vlaneseq (!%p163_p2)  ;;  %v455_v1 = vld [vmem:[%s575_s1 + $0x2] ss:$4 sm:$0x3] (!%p163_p2)  ;;  %v454_v3 = vld [vmem:[%s575_s1 + $0x1] ss:$4 sm:$0x3] (!%p163_p2) }
   0x6   : > { %166 = sbr.rel (%p163_p2) target bundleno = 489 (0x1e9), region = 36  ;;  %p188_p3 = scmp.lt.s32.totalorder (!%p163_p2), %s445_s16, 1  ;;  %v456_v12 = vld [vmem:[%s575_s1 + $0x3] ss:$4 sm:$0x3] (!%p163_p2)  ;;  %vm218_vm0 = vcmask (!%p163_p2), 7168  }
   0x7   : > { %v207_v2 = vshrl.u32 (!%p163_p2), %v206_v0, 7  ;;  %s490_s25 = smov (!%p163_p2), 16   ;;  %s491_s26 = smov (!%p163_p2), 1   ;;  %vm253_vm1 = vcmask (!%p163_p2), 130048   ;;  %vm288_vm2 = vcmask (!%p163_p2), 138240   ;;  %v496_v28 = vmov (!%p163_p2), 0  }
   0x8   : > { %s492_s29 = smov (!%p163_p2), 17   ;;  %s493_s30 = smov (!%p163_p2), 127   ;;  %375 = vmatprep.mubr.bf16.mxu0 (!%p163_p2), %v496_v28  ;;  %479 = vset.pattern.permute.xlu0 (!%p163_p2), %v496_v28  ;;  %v322_v31 = vld [vmem:[%s577_s3] sm:$0xff] (!%p163_p2)  ;;  %v323_v32 = vld [vmem:[%s577_s3 + $0x8] sm:$0xff] (!%p163_p2)  ;;  %vm230_vm3 = vcmask (!%p163_p2), 1039360   ;;  %vm236_vm4 = vcmask (!%p163_p2), 1048568  }
   0x9   : > { %v208_v4 = vsub.s32 (!%p163_p2), 0, %v207_v2  ;;  %v212_v5 = vsub.s32 (!%p163_p2), 1, %v207_v2  ;;  %s494_s5 = smov (!%p163_p2), 112   ;;  %s495_s6 = smov (!%p163_p2), 111   ;;  %480 = vset.pattern.permute.xlu1 (!%p163_p2), %v496_v28  ;;  %v497_v36 = vmov (!%p163_p2), 0.0   ;;  %vm265_vm5 = vcmask (!%p163_p2), 916480  }
   0xa   : > { %vm300_vm6 = vcmask (!%p163_p2), 908288   ;;  %vm271_vm7 = vcmask (!%p163_p2), 1048448   ;;  %vm306_vm8 = vcmask (!%p163_p2), 1048440   ;;  %v481_v50 = vld [vmem:[%s576_s2] sm:$0xff] (!%p163_p2)   ;;  %vm339_vm9 = vcmask (!%p163_p2), 261120  }
   0xb   : > { %v244_v6 = vrot.slane (!%p163_p2), %v455_v1, %v208_v4  ;;  %v209_v7 = vrot.slane (!%p163_p2), %v454_v3, %v208_v4  ;;  %v248_v8 = vrot.slane (!%p163_p2), %v455_v1, %v212_v5  ;;  %v213_v9 = vrot.slane (!%p163_p2), %v454_v3, %v212_v5 }
   0xc   : > { %v283_v13 = vrot.slane (!%p163_p2), %v456_v12, %v212_v5  ;;  %v279_v14 = vrot.slane (!%p163_p2), %v456_v12, %v208_v4 }
   0xd   : > { %s580_s16 = smov (!%p188_p3, %s445_s16), 1  ;;  %249 = vrot.lane.b32.xlu1 %v244_v6, %s490_s25  ;;  %214 = vrot.lane.b32.xlu0 %v209_v7, %s491_s26 }
   0xe   : > { %s461_s21 = sshll.u32 %s580_s16, 4  ;;  %s462_s13 = sshll.u32 %s580_s16, 5 }
   0xf   : > { %s192_s24 = scalar_lea.vmem %s574_s0, %s461_s21  ;;  %s197_s18 = scalar_lea.vmem %s578_s4, %s462_s13 }
  0x10   : > { %v543_v10 = vld [vmem:[%s192_s24] sm:$0xff]  ;;  %v545_v11 = vld [vmem:[%s192_s24 + $0x8] sm:$0xff] }
  0x11   : > { %251 = vrot.lane.b32.xlu1 %v248_v8, %s490_s25  ;;  %216 = vrot.lane.b32.xlu0 %v213_v9, %s491_s26 }
  0x15   : > { %286 = vrot.lane.b32.xlu1 %v283_v13, %s492_s29  ;;  %284 = vrot.lane.b32.xlu0 %v279_v14, %s492_s29 }
  0x7f   : > { %v250_v15 = vpop.permute.xlu1 %249  ;;  %v215_v16 = vpop.permute.xlu0 %214 }
  0x80   : > { %v222_v17 = vmul.f32 %v215_v16, %v543_v10  ;;  %v257_v29 = vmul.f32 %v250_v15, %v543_v10 }
  0x82   : > { %226 = vrot.lane.b32.xlu1 %v222_v17, %s493_s30 }
  0x83   : > { %v252_v18 = vpop.permute.xlu1 %251  ;;  %v217_v19 = vpop.permute.xlu0 %216 }
  0x84   : > { %v219_v20 = vsel %vm218_vm0, %v215_v16, %v217_v19  ;;  %v254_v22 = vsel %vm253_vm1, %v250_v15, %v252_v18 }
  0x85   : > { %v223_v21 = vmul.f32 %v219_v20, %v545_v11  ;;  %v258_v26 = vmul.f32 %v254_v22, %v545_v11 }
  0x87   : > { %v287_v23 = vpop.permute.xlu1 %286  ;;  %v285_v24 = vpop.permute.xlu0 %284  ;;  %228 = vrot.lane.b32.xlu0 %v223_v21, %s493_s30 }
  0x88   : > { %v289_v25 = vsel %vm288_vm2, %v285_v24, %v287_v23  ;;  %v292_v30 = vmul.f32 %v285_v24, %v543_v10 }
  0x89   : > { %v293_v27 = vmul.f32 %v289_v25, %v545_v11 }
  0x8b   : > { %263 = vrot.lane.b32.xlu0 %v258_v26, %s494_s5  ;;  %298 = vrot.lane.b32.xlu1 %v293_v27, %s495_s6 }
  0x8f   : > { %261 = vrot.lane.b32.xlu0 %v257_v29, %s494_s5  ;;  %296 = vrot.lane.b32.xlu1 %v292_v30, %s495_s6 }
  0x93   : > { %326 = vperm.xlu0 %479, %v322_v31   ;;  %331 = vperm.xlu1 %480, %v323_v32  }
  0xf4   : > { %v227_v33 = vpop.permute.xlu1 %226 }
  0xf9   : > { %v229_v34 = vpop.permute.xlu0 %228 }
  0xfa   : > { %v231_v35 = vsel %vm230_vm3, %v227_v33, %v229_v34  ;;  %235 = vst.msk [vmem:[#allocation2 + $0x18] sm:$0xff] %vm230_vm3, %v229_v34 }
  0xfb   : > { %237 = vst.msk [vmem:[#allocation2 + $0x18] sm:$0xff] %vm236_vm4, %v497_v36  ;;  %v318_v45 = vpack.c.bf16 %v231_v35, %v543_v10 }
  0xfd   : > { %v264_v37 = vpop.permute.xlu0 %263  ;;  %v299_v38 = vpop.permute.xlu1 %298 }
  0xfe   : > { %270 = vst.msk [vmem:[#allocation2 + $0x28] sm:$0xff] %vm265_vm5, %v264_v37 }
  0xff   : > { %305 = vst.msk [vmem:[#allocation2 + $0x38] sm:$0xff] %vm300_vm6, %v299_v38 }
 0x100   : > { %272 = vst.msk [vmem:[#allocation2 + $0x28] sm:$0xff] %vm271_vm7, %v497_v36 }
 0x101   : > { %307 = vst.msk [vmem:[#allocation2 + $0x38] sm:$0xff] %vm306_vm8, %v497_v36  ;;  %v262_v39 = vpop.permute.xlu0 %261  ;;  %v297_v40 = vpop.permute.xlu1 %296 }
 0x102   : > { %v266_v41 = vsel %vm265_vm5, %v262_v39, %v264_v37  ;;  %v301_v42 = vsel %vm300_vm6, %v297_v40, %v299_v38  ;;  %v313_v43 = vld [vmem:[#allocation2 + $0x18] sm:$0xff] }
 0x103   : > { %v319_v44 = vpack.c.bf16 %v313_v43, %v545_v11  ;;  %v320_v49 = vpack.c.bf16 %v301_v42, %v266_v41 }
 0x105   : > { %343 = vmatprep.subr.bf16.mxu0 %v319_v44 }
 0x106   : > { %344 = vmatpush1.bf16.msra.mxu0 %v318_v45 }
 0x107   : > { %v315_v46 = vld [vmem:[#allocation2 + $0x28] sm:$0xff] }
 0x108   : > { %v317_v47 = vld [vmem:[#allocation2 + $0x38] sm:$0xff] }
 0x109   : > { %v321_v48 = vpack.c.bf16 %v317_v47, %v315_v46 }
 0x10b   : > { %345 = vmatprep.subr.bf16.mxu0 %v321_v48 }
 0x10c   : > { %346 = vmatpush1.bf16.msra.mxu0 %v320_v49 }
 0x10f   : > { %458 = vmatmul.mubr.msk.bf16.vlgmr.msra.gmra.mrb[0].mxu0 %vm339_vm9, %v481_v50 }
 0x112   : > { %v327_v51 = vpop.permute.xlu0 %326  ;;  %v332_v53 = vpop.permute.xlu1 %331 }
 0x1e2   : > { %v377_v52 = vpop.f32.mrb[0].mxu0 }
 0x1e3   : > { %v378_v54 = vadd.f32 %v377_v52, %v327_v51  ;;  %v379_v55 = vpop.f32.mrb[1].mxu0 }
 0x1e4   : > { %v380_v56 = vadd.f32 %v379_v55, %v327_v51  ;;  %v381_v57 = vpop.f32.mrb[2].mxu0 }
 0x1e5   : > { %386 = vst [vmem:[%s197_s18] sm:$0xff] %v378_v54  ;;  %v382_v58 = vadd.f32 %v381_v57, %v332_v53  ;;  %v383_v59 = vpop.f32.mrb[3].mxu0 }
 0x1e6   : > { %387 = vst [vmem:[%s197_s18 + $0x8] sm:$0xff] %v380_v56  ;;  %v384_v60 = vadd.f32 %v383_v59, %v332_v53 }
 0x1e7   : > { %388 = vst [vmem:[%s197_s18 + $0x10] sm:$0xff] %v382_v58 }
 0x1e8   : > { %389 = vst [vmem:[%s197_s18 + $0x18] sm:$0xff] %v384_v60 }
 0x1e9 PF: > { %s14_s15 = sadd.s32 1, %s488_s15  }
 0x1ea   : > { %p11_p4 = scmp.ge.s32.totalorder %s14_s15, 4  }
 0x1ec   :  { %13 = sbr.rel (!%p11_p4) target bundleno = 1 (0x1), region = 69 }

// kernel: stack_decoder_forward.7
= control target key start
LH: loop header
LB: loop body
LE: loop exit
PB: predicated region body
PF: predicated region fallthrough
CT: control target
= control target key end

     0   :  { %s326_s12 = smov 0   ;;  %s349_s0 = inlined_call_operand.vmem [shape: f32[2,4,1024], index: 0, kind: input, shape index: {}]   ;;  %s350_s1 = inlined_call_operand.vmem [shape: f32[4,1], index: 1, kind: input, shape index: {}]   ;;  %s351_s2 = inlined_call_operand.vmem [shape: f32[4,1], index: 2, kind: input, shape index: {}]   ;;  %s352_s3 = inlined_call_operand.vmem [shape: f32[2,4,1024], index: 3, kind: output, shape index: {}]  }
   0x1 LB: > { %s272_s13 = sadd.s32 4294967295, %s302_s12   ;;  %p276_p0 = scmp.ge.s32.totalorder %s302_s12, 1  ;;  %s302_s12 = sphi %s326_s12, %s13_s12  }
   0x2   : > { %p137_p1 = scmp.lt.s32.totalorder %s302_s12, 3 }
   0x4   : > { %p138_p2 = pnand %p276_p0, %p137_p1 }
   0x5   : > { %v175_v0 = vld [vmem:[%s350_s1] sm:$0xf] (!%p138_p2)  ;;  %v304_v1 = vmov (!%p138_p2), 0   ;;  %p161_p3 = scmp.lt.s32.totalorder (!%p138_p2), %s272_s13, 1  ;;  %v305_v3 = vmov (!%p138_p2), 839922192   ;;  %v183_v5 = vlaneseq (!%p138_p2) }
   0x6   : > { %141 = sbr.rel (%p138_p2) target bundleno = 147 (0x93), region = 32  ;;  %295 = vset.pattern.permute.xlu0 (!%p138_p2), %v304_v1  ;;  %v192_v2 = vld [vmem:[%s351_s2] sm:$0xf] (!%p138_p2)  ;;  %v181_v4 = vunpack.c.l.s4 (!%p138_p2), %v305_v3 }
   0x7   : > { %178 = vperm.xlu0 (!%p138_p2), %295, %v175_v0   ;;  %v184_v7 = vshrl.u32 (!%p138_p2), %v183_v5, 7 }
   0x8   : > { %v182_v6 = vunpack.c.0.s8 (!%p138_p2), %v181_v4 }
   0xa   : > { %v185_v8 = vsub.s32 (!%p138_p2), %v182_v6, %v184_v7 }
   0xb   : > { %195 = vperm.xlu0 (!%p138_p2), %295, %v192_v2  }
   0xd   : > { %s354_s13 = smov (!%p161_p3, %s272_s13), 1 }
   0xe   : > { %s283_s18 = sshll.u32 %s354_s13, 5 }
   0xf   : > { %s165_s21 = scalar_lea.vmem %s349_s0, %s283_s18  ;;  %s170_s24 = scalar_lea.vmem %s352_s3, %s283_s18 }
  0x10   : > { %v171_v10 = vld [vmem:[%s165_s21] sm:$0xff]  ;;  %v172_v12 = vld [vmem:[%s165_s21 + $0x8] sm:$0xff]  ;;  %v173_v13 = vld [vmem:[%s165_s21 + $0x10] sm:$0xff] }
  0x11   : > { %v174_v14 = vld [vmem:[%s165_s21 + $0x18] sm:$0xff] }
  0x86   : > { %v179_v9 = vpop.permute.xlu0 %178 }
  0x87   : > { %v186_v11 = vrot.slane %v179_v9, %v185_v8 }
  0x89   : > { %v188_v15 = vmul.f32 %v186_v11, %v171_v10  ;;  %v189_v17 = vmul.f32 %v186_v11, %v172_v12  ;;  %v190_v18 = vmul.f32 %v186_v11, %v173_v13  ;;  %v191_v19 = vmul.f32 %v186_v11, %v174_v14 }
  0x8a   : > { %v196_v16 = vpop.permute.xlu0 %195 }
  0x8b   : > { %v203_v20 = vrot.slane %v196_v16, %v185_v8 }
  0x8d   : > { %v205_v21 = vadd.f32 %v203_v20, %v188_v15  ;;  %v206_v22 = vadd.f32 %v203_v20, %v189_v17  ;;  %v207_v23 = vadd.f32 %v203_v20, %v190_v18  ;;  %v208_v24 = vadd.f32 %v203_v20, %v191_v19 }
  0x8f   : > { %v209_v25 = vmax.f32 %v205_v21, 0.0  ;;  %v210_v26 = vmax.f32 %v206_v22, 0.0  ;;  %v211_v27 = vmax.f32 %v207_v23, 0.0  ;;  %v212_v28 = vmax.f32 %v208_v24, 0.0 }
  0x91   : > { %213 = vst [vmem:[%s170_s24] sm:$0xff] %v209_v25  ;;  %214 = vst [vmem:[%s170_s24 + $0x8] sm:$0xff] %v210_v26 }
  0x92   : > { %215 = vst [vmem:[%s170_s24 + $0x10] sm:$0xff] %v211_v27  ;;  %216 = vst [vmem:[%s170_s24 + $0x18] sm:$0xff] %v212_v28 }
  0x93 PF: > { %s13_s12 = sadd.s32 1, %s302_s12  }
  0x94   : > { %p10_p4 = scmp.ge.s32.totalorder %s13_s12, 4  }
  0x96   :  { %12 = sbr.rel (!%p10_p4) target bundleno = 1 (0x1), region = 62 }

// kernel: stack_decoder_forward.6
= control target key start
LH: loop header
LB: loop body
LE: loop exit
PB: predicated region body
PF: predicated region fallthrough
CT: control target
= control target key end

     0   :  { %s1810_s24 = smov 0   ;;  %s2635_s0 = inlined_call_operand.vmem [shape: f32[2,4,1024], index: 0, kind: input, shape index: {}]   ;;  %s2636_s1 = inlined_call_operand.vmem [shape: f32[4,1], index: 1, kind: input, shape index: {}]   ;;  %s2637_s2 = inlined_call_operand.vmem [shape: f32[4,1], index: 2, kind: input, shape index: {}]   ;;  %s2638_s3 = inlined_call_operand.vmem [shape: f32[9,1024], index: 3, kind: input, shape index: {}]   ;;  %s2639_s4 = inlined_call_operand.vmem [shape: bf16[4,36], index: 4, kind: input, shape index: {}]   ;;  %s2640_s5 = inlined_call_operand.vmem [shape: f32[4,1], index: 5, kind: input, shape index: {}]   ;;  %s2641_s6 = inlined_call_operand.vmem [shape: f32[2,4,1024], index: 6, kind: output, shape index: {0}]   ;;  %s2642_s7 = inlined_call_operand.vmem [shape: f32[4,2], index: 7, kind: output, shape index: {1}]  }
   0x1 LB: > { %s1816_s25 = sadd.s32 4294967295, %s1756_s24   ;;  %p1697_p0 = scmp.ge.s32.totalorder %s1756_s24, 1  ;;  %s1756_s24 = sphi %s1810_s24, %s18_s24  }
   0x2   : > { %p235_p1 = scmp.lt.s32.totalorder %s1756_s24, 3 }
   0x4   : > { %p236_p2 = pnand %p1697_p0, %p235_p1 }
   0x5   : > { %v282_v0 = vld [vmem:[%s2636_s1] sm:$0xf] (!%p236_p2)  ;;  %v290_v1 = vlaneseq (!%p236_p2)  ;;  %v1758_v2 = vmov (!%p236_p2), 0   ;;  %s1759_s19 = smov (!%p236_p2), 95   ;;  %s1760_s26 = smov (!%p236_p2), 96   ;;  %vm372_vm0 = vcmask (!%p236_p2), 1043456  }
   0x6   : > { %239 = sbr.rel (%p236_p2) target bundleno = 807 (0x327), region = 44  ;;  %1749 = vset.pattern.permute.xlu0 (!%p236_p2), %v1758_v2  ;;  %v320_v3 = vld [vmem:[%s2638_s3] ss:$8 sm:$0xf] (!%p236_p2)  ;;  %1424 = vmatprep.mubr.bf16.mxu0 (!%p236_p2), %v1758_v2  ;;  %s1761_s8 = smov (!%p236_p2), 97   ;;  %vm374_vm1 = vcmask (!%p236_p2), 777216  }
   0x7   : > { %v321_v4 = vld [vmem:[%s2638_s3] ss:$8 sm:$0xf0] (!%p236_p2)  ;;  %285 = vperm.xlu0 (!%p236_p2), %1749, %v282_v0   ;;  %v1831_v5 = vshrl.u32 (!%p236_p2), %v290_v1, 7  ;;  %1465 = vmatprep.mubr.bf16.mxu1 (!%p236_p2), %v1758_v2  ;;  %s1762_s13 = smov (!%p236_p2), 127   ;;  %s1763_s18 = smov (!%p236_p2), 1  }
   0x8   : > { %v1833_v6 = vor.u32 (!%p236_p2), %v321_v4, %v320_v3  ;;  %v1702_v7 = vld [vmem:[%s2638_s3 + $0x1] ss:$8 sm:$0xf] (!%p236_p2)  ;;  %v1704_v21 = vld [vmem:[%s2638_s3 + $0x2] ss:$8 sm:$0xf] (!%p236_p2) }
   0x9   : > { %v299_v8 = vld [vmem:[%s2637_s2] sm:$0xf] (!%p236_p2)  ;;  %v1846_v10 = vsub.s32 (!%p236_p2), 0, %v1831_v5  ;;  %v1849_v11 = vsub.s32 (!%p236_p2), 1, %v1831_v5  ;;  %v1852_v12 = vsub.s32 (!%p236_p2), 2, %v1831_v5  ;;  %v1855_v13 = vsub.s32 (!%p236_p2), 3, %v1831_v5 }
   0xa   : > { %v1703_v9 = vld [vmem:[%s2638_s3 + $0x1] ss:$8 sm:$0xf0] (!%p236_p2)  ;;  %v1860_v15 = vsub.s32 (!%p236_p2), 4, %v1831_v5  ;;  %v1863_v16 = vsub.s32 (!%p236_p2), 5, %v1831_v5  ;;  %s1764_s27 = smov (!%p236_p2), 31  }
   0xb   : > { %v1857_v14 = vor.u32 (!%p236_p2), %v1703_v9, %v1702_v7  ;;  %302 = vperm.xlu0 (!%p236_p2), %1749, %v299_v8   ;;  %v327_v17 = vrot.slane (!%p236_p2), %v1833_v6, %v1846_v10  ;;  %v331_v18 = vrot.slane (!%p236_p2), %v1833_v6, %v1849_v11  ;;  %v335_v19 = vrot.slane (!%p236_p2), %v1833_v6, %v1852_v12  ;;  %v1705_v22 = vld [vmem:[%s2638_s3 + $0x2] ss:$8 sm:$0xf0] (!%p236_p2)  ;;  %v1706_v39 = vld [vmem:[%s2638_s3 + $0x3] ss:$8 sm:$0xf] (!%p236_p2) }
   0xc   : > { %v339_v20 = vrot.slane (!%p236_p2), %v1833_v6, %v1855_v13  ;;  %v343_v24 = vrot.slane (!%p236_p2), %v1833_v6, %v1860_v15  ;;  %v347_v25 = vrot.slane (!%p236_p2), %v1833_v6, %v1863_v16  ;;  %v1890_v31 = vor.u32 (!%p236_p2), %v1705_v22, %v1704_v21  ;;  %v1707_v40 = vld [vmem:[%s2638_s3 + $0x3] ss:$8 sm:$0xf0] (!%p236_p2)  ;;  %v1708_v48 = vld [vmem:[%s2638_s3 + $0x5] ss:$8 sm:$0xf] (!%p236_p2) }
   0xd   : > { %v356_v23 = vcombine.low %v327_v17, %v331_v18  ;;  %v448_v26 = vrot.slane %v1857_v14, %v1846_v10  ;;  %v452_v27 = vrot.slane %v1857_v14, %v1849_v11  ;;  %v456_v28 = vrot.slane %v1857_v14, %v1852_v12  ;;  %v1709_v49 = vld [vmem:[%s2638_s3 + $0x5] ss:$8 sm:$0xf0]  ;;  %v1710_v63 = vld [vmem:[%s2638_s3 + $0x6] ss:$8 sm:$0xf] }
   0xe   : > { %v357_v29 = vcombine.low %v335_v19, %v339_v20  ;;  %v358_v30 = vcombine.low %v343_v24, %v347_v25  ;;  %v460_v32 = vrot.slane %v1857_v14, %v1855_v13  ;;  %v568_v34 = vrot.slane %v1890_v31, %v1846_v10  ;;  %v1711_v0 = vld [vmem:[%s2638_s3 + $0x6] ss:$8 sm:$0xf0]  ;;  %v1712_v18 = vld [vmem:[%s2638_s3 + $0x7] ss:$8 sm:$0xf] }
   0xf   : > { %360 = vrot.lane.b32.xlu1 %v356_v23, %s1759_s19  ;;  %v572_v35 = vrot.slane %v1890_v31, %v1849_v11  ;;  %v477_v36 = vcombine.low %v448_v26, %v452_v27  ;;  %v464_v37 = vrot.slane %v1857_v14, %v1860_v15  ;;  %v468_v38 = vrot.slane %v1857_v14, %v1863_v16  ;;  %v1713_v19 = vld [vmem:[%s2638_s3 + $0x7] ss:$8 sm:$0xf0]  ;;  %s1765_s28 = smov 32   ;;  %s1766_s29 = smov 33  }
  0x10   : > { %364 = vrot.lane.b32.xlu0 %v358_v30, %s1759_s19  ;;  %v478_v33 = vcombine.low %v456_v28, %v460_v32  ;;  %v584_v42 = vrot.slane %v1890_v31, %v1860_v15  ;;  %v588_v43 = vrot.slane %v1890_v31, %v1863_v16  ;;  %v576_v45 = vrot.slane %v1890_v31, %v1852_v12  ;;  %p267_p3 = scmp.lt.s32.totalorder %s1816_s25, 1  ;;  %p1724_p4 = scmp.ne.s32.totalorder %s1816_s25, 0 }
  0x11   : > { %v597_v41 = vcombine.low %v568_v34, %v572_v35  ;;  %v479_v44 = vcombine.low %v464_v37, %v468_v38  ;;  %v580_v46 = vrot.slane %v1890_v31, %v1855_v13  ;;  %v1920_v47 = vor.u32 %v1707_v40, %v1706_v39  ;;  %v1714_v34 = vld [vmem:[%s2638_s3 + $0x40] ss:$8 sm:$0xf] }
  0x12   : > { %v599_v50 = vcombine.low %v584_v42, %v588_v43  ;;  %v1938_v56 = vor.u32 %v1709_v49, %v1708_v48  ;;  %v1966_v17 = vor.u32 %v1711_v0, %v1710_v63  ;;  %v1984_v26 = vor.u32 %v1713_v19, %v1712_v18  ;;  %v1715_v35 = vld [vmem:[%s2638_s3 + $0x40] ss:$8 sm:$0xf0]  ;;  %s2051_s30 = scalar_select %p267_p3, %s1816_s25, 1 }
  0x13   : > { %362 = vrot.lane.b32.xlu1 %v357_v29, %s1759_s19  ;;  %v696_v51 = vrot.slane %v1920_v47, %v1852_v12  ;;  %v700_v52 = vrot.slane %v1920_v47, %v1855_v13  ;;  %v598_v53 = vcombine.low %v576_v45, %v580_v46  ;;  %v688_v54 = vrot.slane %v1920_v47, %v1846_v10 }
  0x14   : > { %483 = vrot.lane.b32.xlu0 %v478_v33, %s1760_s26  ;;  %v692_v55 = vrot.slane %v1920_v47, %v1849_v11  ;;  %v828_v58 = vrot.slane %v1938_v56, %v1846_v10  ;;  %v832_v59 = vrot.slane %v1938_v56, %v1849_v11  ;;  %v704_v61 = vrot.slane %v1920_v47, %v1860_v15  ;;  %s1727_s9 = sshll.u32 %s2051_s30, 5 }
  0x15   : > { %v718_v57 = vcombine.low %v696_v51, %v700_v52  ;;  %v708_v62 = vrot.slane %v1920_v47, %v1863_v16  ;;  %v844_v3 = vrot.slane %v1938_v56, %v1860_v15  ;;  %v848_v4 = vrot.slane %v1938_v56, %v1863_v16  ;;  %s271_s12 = scalar_lea.vmem %s2635_s0, %s1727_s9  ;;  %s276_s16 = scalar_lea.vmem %s2641_s6, %s1727_s9 }
  0x16   : > { %v717_v60 = vcombine.low %v688_v54, %v692_v55  ;;  %v857_v1 = vcombine.low %v828_v58, %v832_v59  ;;  %v836_v8 = vrot.slane %v1938_v56, %v1852_v12  ;;  %v840_v9 = vrot.slane %v1938_v56, %v1855_v13 }
  0x17   : > { %481 = vrot.lane.b32.xlu1 %v477_v36, %s1760_s26  ;;  %v719_v7 = vcombine.low %v704_v61, %v708_v62  ;;  %v859_v20 = vcombine.low %v844_v3, %v848_v4  ;;  %v954_v21 = vrot.slane %v1966_v17, %v1852_v12  ;;  %v958_v22 = vrot.slane %v1966_v17, %v1855_v13 }
  0x18   : > { %601 = vrot.lane.b32.xlu0 %v597_v41, %s1761_s8  ;;  %v858_v23 = vcombine.low %v836_v8, %v840_v9  ;;  %v946_v24 = vrot.slane %v1966_v17, %v1846_v10  ;;  %v950_v25 = vrot.slane %v1966_v17, %v1849_v11  ;;  %v1072_v28 = vrot.slane %v1984_v26, %v1852_v12 }
  0x19   : > { %v976_v27 = vcombine.low %v954_v21, %v958_v22  ;;  %v1076_v29 = vrot.slane %v1984_v26, %v1855_v13  ;;  %v1064_v32 = vrot.slane %v1984_v26, %v1846_v10  ;;  %v1068_v33 = vrot.slane %v1984_v26, %v1849_v11 }
  0x1a   : > { %v975_v30 = vcombine.low %v946_v24, %v950_v25  ;;  %v962_v37 = vrot.slane %v1966_v17, %v1860_v15  ;;  %v966_v38 = vrot.slane %v1966_v17, %v1863_v16  ;;  %v1080_v39 = vrot.slane %v1984_v26, %v1860_v15 }
  0x1b   : > { %485 = vrot.lane.b32.xlu1 %v479_v44, %s1760_s26  ;;  %v1094_v36 = vcombine.low %v1072_v28, %v1076_v29  ;;  %v1084_v40 = vrot.slane %v1984_v26, %v1863_v16  ;;  %v1093_v41 = vcombine.low %v1064_v32, %v1068_v33  ;;  %v1177_v42 = vor.u32 %v1715_v35, %v1714_v34  ;;  %v279_v28 = vld [vmem:[%s271_s12 + $0x8] sm:$0xff]  ;;  %v280_v29 = vld [vmem:[%s271_s12 + $0x10] sm:$0xff] }
  0x1c   : > { %605 = vrot.lane.b32.xlu0 %v599_v50, %s1761_s8  ;;  %v977_v43 = vcombine.low %v962_v37, %v966_v38  ;;  %v350_v50 = vsub.s32 6, %v1831_v5  ;;  %v354_v51 = vsub.s32 7, %v1831_v5  ;;  %v1767_v18 = vmov 839922192  }
  0x1d   : > { %v1190_v44 = vrot.slane %v1177_v42, %v1852_v12  ;;  %v1194_v45 = vrot.slane %v1177_v42, %v1855_v13  ;;  %v1095_v46 = vcombine.low %v1080_v39, %v1084_v40  ;;  %v1182_v48 = vrot.slane %v1177_v42, %v1846_v10 }
  0x1e   : > { %v1186_v49 = vrot.slane %v1177_v42, %v1849_v11  ;;  %v355_v12 = vrot.slane %v1833_v6, %v354_v51  ;;  %v1198_v54 = vrot.slane %v1177_v42, %v1860_v15  ;;  %v1202_v10 = vrot.slane %v1177_v42, %v1863_v16 }
  0x1f   : > { %603 = vrot.lane.b32.xlu1 %v598_v53, %s1761_s8  ;;  %v1212_v52 = vcombine.low %v1190_v44, %v1194_v45  ;;  %v351_v53 = vrot.slane %v1833_v6, %v350_v50  ;;  %v592_v55 = vrot.slane %v1890_v31, %v350_v50  ;;  %v472_v6 = vrot.slane %v1857_v14, %v350_v50 }
  0x20   : > { %723 = vrot.lane.b32.xlu0 %v718_v57, %s1762_s13  ;;  %v1211_v13 = vcombine.low %v1182_v48, %v1186_v49  ;;  %v596_v57 = vrot.slane %v1890_v31, %v354_v51  ;;  %v1213_v58 = vcombine.low %v1198_v54, %v1202_v10  ;;  %v476_v59 = vrot.slane %v1857_v14, %v354_v51 }
  0x21   : > { %v359_v11 = vcombine.low %v351_v53, %v355_v12  ;;  %v852_v16 = vrot.slane %v1938_v56, %v350_v50  ;;  %v712_v62 = vrot.slane %v1920_v47, %v350_v50  ;;  %v716_v31 = vrot.slane %v1920_v47, %v354_v51 }
  0x22   : > { %v600_v15 = vcombine.low %v592_v55, %v596_v57  ;;  %v480_v61 = vcombine.low %v472_v6, %v476_v59  ;;  %v1088_v0 = vrot.slane %v1984_v26, %v350_v50  ;;  %v1092_v14 = vrot.slane %v1984_v26, %v354_v51  ;;  %v278_v26 = vld [vmem:[%s271_s12] sm:$0xff] }
  0x23   : > { %721 = vrot.lane.b32.xlu1 %v717_v60, %s1762_s13  ;;  %v856_v60 = vrot.slane %v1938_v56, %v354_v51  ;;  %v970_v56 = vrot.slane %v1966_v17, %v350_v50  ;;  %v974_v3 = vrot.slane %v1966_v17, %v354_v51  ;;  %v1210_v8 = vrot.slane %v1177_v42, %v354_v51 }
  0x24   : > { %861 = vrot.lane.b32.xlu0 %v857_v1, %s1763_s18  ;;  %v720_v1 = vcombine.low %v712_v62, %v716_v31  ;;  %v1096_v4 = vcombine.low %v1088_v0, %v1092_v14  ;;  %v288_v19 = vunpack.c.l.s4 %v1767_v18  ;;  %vm494_vm2 = vcmask 785408  }
  0x25   : > { %v860_v63 = vcombine.low %v852_v16, %v856_v60  ;;  %v978_v47 = vcombine.low %v970_v56, %v974_v3  ;;  %vm614_vm3 = vcmask 793600   ;;  %vm734_vm4 = vcmask 1039360  }
  0x26   : > { %v289_v17 = vunpack.c.0.s8 %v288_v19  ;;  %vm773_vm5 = vcmask 7168   ;;  %vm533_vm6 = vcmask 261120   ;;  %vm653_vm7 = vcmask 252928  }
  0x27   : > { %725 = vrot.lane.b32.xlu1 %v719_v7, %s1762_s13  ;;  %v1206_v7 = vrot.slane %v1177_v42, %v350_v50  ;;  %vm413_vm8 = vcmask 269312   ;;  %vm429_vm9 = vcmask 1043720   ;;  %vm438_vm10 = vcmask 265216  }
  0x28   : > { %865 = vrot.lane.b32.xlu0 %v859_v20, %s1763_s18  ;;  %v292_v21 = vsub.s32 %v289_v17, %v1831_v5  ;;  %vm669_vm11 = vcmask 1043704   ;;  %vm678_vm12 = vcmask 248832   ;;  %vm549_vm13 = vcmask 1047812  }
  0x29   : > { %v1214_v9 = vcombine.low %v1206_v7, %v1210_v8  ;;  %vm558_vm14 = vcmask 261124   ;;  %vm789_vm15 = vcmask 1047564  }
  0x2b   : > { %863 = vrot.lane.b32.xlu1 %v858_v23, %s1763_s18 }
  0x2c   : > { %981 = vrot.lane.b32.xlu0 %v976_v27, %s1764_s27 }
  0x2f   : > { %979 = vrot.lane.b32.xlu1 %v975_v30, %s1764_s27  ;;  %v281_v30 = vld [vmem:[%s271_s12 + $0x18] sm:$0xff] }
  0x30   : > { %1099 = vrot.lane.b32.xlu0 %v1094_v36, %s1765_s28 }
  0x33   : > { %1097 = vrot.lane.b32.xlu1 %v1093_v41, %s1765_s28 }
  0x34   : > { %983 = vrot.lane.b32.xlu0 %v977_v43, %s1764_s27 }
  0x37   : > { %1101 = vrot.lane.b32.xlu1 %v1095_v46, %s1765_s28 }
  0x38   : > { %1217 = vrot.lane.b32.xlu0 %v1212_v52, %s1766_s29 }
  0x3b   : > { %1215 = vrot.lane.b32.xlu1 %v1211_v13, %s1766_s29 }
  0x3c   : > { %366 = vrot.lane.b32.xlu0 %v359_v11, %s1759_s19 }
  0x3f   : > { %1219 = vrot.lane.b32.xlu1 %v1213_v58, %s1766_s29 }
  0x40   : > { %607 = vrot.lane.b32.xlu0 %v600_v15, %s1761_s8 }
  0x43   : > { %487 = vrot.lane.b32.xlu1 %v480_v61, %s1760_s26 }
  0x44   : > { %867 = vrot.lane.b32.xlu0 %v860_v63, %s1763_s18 }
  0x47   : > { %727 = vrot.lane.b32.xlu1 %v720_v1, %s1762_s13 }
  0x48   : > { %1103 = vrot.lane.b32.xlu0 %v1096_v4, %s1765_s28 }
  0x4b   : > { %985 = vrot.lane.b32.xlu1 %v978_v47, %s1764_s27 }
  0x4f   : > { %1221 = vrot.lane.b32.xlu1 %v1214_v9, %s1766_s29 }
  0x81   : > { %v361_v20 = vpop.permute.xlu1 %360 }
  0x82   : > { %v368_v23 = vrot.slane %v361_v20, 4 }
  0x85   : > { %v363_v22 = vpop.permute.xlu1 %362 }
  0x86   : > { %v369_v24 = vrot.slane %v363_v22, 4  ;;  %v286_v25 = vpop.permute.xlu0 %285 }
  0x87   : > { %v293_v27 = vrot.slane %v286_v25, %v292_v21 }
  0x88   : > { %v373_v33 = vsel %vm372_vm0, %v368_v23, %v369_v24 }
  0x89   : > { %v482_v32 = vpop.permute.xlu1 %481  ;;  %v295_v34 = vmul.f32 %v293_v27, %v278_v26  ;;  %v296_v35 = vmul.f32 %v293_v27, %v279_v28  ;;  %v297_v36 = vmul.f32 %v293_v27, %v280_v29  ;;  %v298_v37 = vmul.f32 %v293_v27, %v281_v30 }
  0x8a   : > { %v303_v5 = vpop.permute.xlu0 %302  ;;  %v375_v45 = vsel %vm374_vm1, %v361_v20, %v373_v33  ;;  %v489_v51 = vrot.slane %v482_v32, 4 }
  0x8b   : > { %v310_v38 = vrot.slane %v303_v5, %v292_v21 }
  0x8d   : > { %v312_v39 = vadd.f32 %v310_v38, %v295_v34  ;;  %v313_v40 = vadd.f32 %v310_v38, %v296_v35  ;;  %v314_v41 = vadd.f32 %v310_v38, %v297_v36  ;;  %v315_v42 = vadd.f32 %v310_v38, %v298_v37  ;;  %v2061_v43 = vpop.permute.xlu1 %485 }
  0x8e   : > { %v2063_v44 = vpop.permute.xlu0 %364  ;;  %v491_v52 = vrot.slane %v2061_v43, 4 }
  0x8f   : > { %v2066_v46 = vmax.f32 %v312_v39, 0.0  ;;  %v2068_v48 = vmax.f32 %v313_v40, 0.0  ;;  %v2070_v49 = vmax.f32 %v314_v41, 0.0  ;;  %v2072_v50 = vmax.f32 %v315_v42, 0.0 }
  0x90   : > { %v370_v53 = vrot.slane %v2063_v44, 4 }
  0x91   : > { %812 = vst [vmem:[#allocation2 + $0x80] sm:$0xf] %v2066_v46  ;;  %814 = vst [vmem:[#allocation2 + $0x90] sm:$0xf] %v2068_v48  ;;  %v604_v12 = vpop.permute.xlu1 %603  ;;  %v2081_v13 = vmul.f32 %v375_v45, %v2066_v46  ;;  %v804_v54 = vcombine.high %v2066_v46, %v2066_v46  ;;  %v805_v10 = vcombine.high %v2068_v48, %v2068_v48 }
  0x92   : > { %816 = vst [vmem:[#allocation2 + $0xa0] sm:$0xf] %v2070_v49  ;;  %818 = vst [vmem:[#allocation2 + $0xb0] sm:$0xf] %v2072_v50  ;;  %v806_v11 = vcombine.high %v2070_v49, %v2070_v49  ;;  %v376_v55 = vsel %vm372_vm0, %v369_v24, %v370_v53  ;;  %v484_v57 = vpop.permute.xlu0 %483  ;;  %v807_v58 = vcombine.high %v2072_v50, %v2072_v50  ;;  %v610_v15 = vrot.slane %v604_v12, 4 }
  0x93   : > { %v490_v6 = vrot.slane %v484_v57, 4  ;;  %397 = vrot.lane.b32.xlu0 %v2081_v13, %s1766_s29  ;;  %v377_v59 = vsel %vm374_vm1, %v363_v22, %v376_v55  ;;  %813 = vst [vmem:[#allocation2 + $0x88] sm:$0xf] %v804_v54  ;;  %815 = vst [vmem:[#allocation2 + $0x98] sm:$0xf] %v805_v10 }
  0x94   : > { %817 = vst [vmem:[#allocation2 + $0xa8] sm:$0xf] %v806_v11  ;;  %819 = vst [vmem:[#allocation2 + $0xb8] sm:$0xf] %v807_v58  ;;  %v2102_v62 = vmul.f32 %v377_v59, %v2068_v48 }
  0x95   : > { %v493_v16 = vsel %vm372_vm0, %v489_v51, %v490_v6  ;;  %v496_v60 = vsel %vm372_vm0, %v490_v6, %v491_v52  ;;  %v722_v61 = vpop.permute.xlu1 %721 }
  0x96   : > { %v602_v31 = vpop.permute.xlu0 %601  ;;  %v495_v63 = vsel %vm494_vm2, %v482_v32, %v493_v16  ;;  %v497_v1 = vsel %vm494_vm2, %v484_v57, %v496_v60  ;;  %v729_v18 = vrot.slane %v722_v61, 4 }
  0x97   : > { %v609_v0 = vrot.slane %v602_v31, 4  ;;  %401 = vrot.lane.b32.xlu0 %v2102_v62, %s1766_s29  ;;  %v2108_v14 = vmul.f32 %v495_v63, %v2066_v46  ;;  %v2120_v7 = vmul.f32 %v497_v1, %v2068_v48 }
  0x99   : > { %v613_v56 = vsel %vm372_vm0, %v609_v0, %v610_v15  ;;  %v2112_v3 = vpop.permute.xlu1 %725  ;;  %519 = vrot.lane.b32.xlu1 %v2108_v14, %s1765_s28 }
  0x9a   : > { %v615_v4 = vsel %vm614_vm3, %v602_v31, %v613_v56  ;;  %v2117_v47 = vpop.permute.xlu0 %605  ;;  %v731_v19 = vrot.slane %v2112_v3, 4 }
  0x9b   : > { %v2123_v8 = vmul.f32 %v615_v4, %v2066_v46  ;;  %v611_v9 = vrot.slane %v2117_v47, 4 }
  0x9d   : > { %v616_v17 = vsel %vm372_vm0, %v610_v15, %v611_v9  ;;  %v2130_v20 = vpop.permute.xlu1 %863  ;;  %523 = vrot.lane.b32.xlu1 %v2120_v7, %s1765_s28  ;;  %637 = vrot.lane.b32.xlu0 %v2123_v8, %s1764_s27 }
  0x9e   : > { %v724_v21 = vpop.permute.xlu0 %723  ;;  %v617_v22 = vsel %vm614_vm3, %v604_v12, %v616_v17  ;;  %v870_v25 = vrot.slane %v2130_v20, 4 }
  0x9f   : > { %v730_v23 = vrot.slane %v724_v21, 4  ;;  %v2138_v24 = vmul.f32 %v617_v22, %v2068_v48 }
  0xa1   : > { %v733_v26 = vsel %vm372_vm0, %v729_v18, %v730_v23  ;;  %v736_v27 = vsel %vm372_vm0, %v730_v23, %v731_v19  ;;  %v980_v28 = vpop.permute.xlu1 %979  ;;  %641 = vrot.lane.b32.xlu0 %v2138_v24, %s1764_s27 }
  0xa2   : > { %v862_v29 = vpop.permute.xlu0 %861  ;;  %v735_v30 = vsel %vm734_vm4, %v722_v61, %v733_v26  ;;  %v737_v34 = vsel %vm734_vm4, %v724_v21, %v736_v27  ;;  %v987_v12 = vrot.slane %v980_v28, 4 }
  0xa3   : > { %v869_v32 = vrot.slane %v862_v29, 4  ;;  %v2149_v33 = vmul.f32 %v735_v30, %v2066_v46  ;;  %v2164_v39 = vmul.f32 %v737_v34, %v2068_v48 }
  0xa4   : > { %v991_v22 = vsel %vm653_vm7, %v987_v12, %v980_v28 }
  0xa5   : > { %v873_v5 = vsel %vm773_vm5, %v869_v32, %v862_v29  ;;  %v874_v35 = vsel %vm372_vm0, %v869_v32, %v870_v25  ;;  %v1098_v36 = vpop.permute.xlu1 %1097  ;;  %759 = vrot.lane.b32.xlu1 %v2149_v33, %s1763_s18 }
  0xa6   : > { %v2159_v37 = vmul.f32 %v873_v5, %v2066_v46  ;;  %v2161_v38 = vpop.permute.xlu0 %865  ;;  %v1105_v40 = vrot.slane %v1098_v36, 4  ;;  %v875_v41 = vsel %vm773_vm5, %v874_v35, %v2130_v20  ;;  %v1002_v5 = vmul.f32 %v991_v22, %v2066_v46 }
  0xa7   : > { %v2175_v51 = vmul.f32 %v875_v41, %v2068_v48 }
  0xa8   : > { %898 = vrot.lane.b32.xlu0 %v2159_v37, %s1762_s13  ;;  %v1109_v54 = vsel %vm533_vm6, %v1105_v40, %v1098_v36  ;;  %v892_v20 = vcombine.low %v2159_v37, %v2159_v37 }
  0xa9   : > { %v2170_v42 = vpop.permute.xlu1 %1101  ;;  %763 = vrot.lane.b32.xlu1 %v2164_v39, %s1763_s18  ;;  %v2182_v57 = vmul.f32 %v1109_v54, %v2066_v46 }
  0xaa   : > { %v982_v45 = vpop.permute.xlu0 %981 }
  0xab   : > { %v988_v10 = vrot.slane %v982_v45, 4 }
  0xac   : > { %902 = vrot.lane.b32.xlu0 %v2175_v51, %s1762_s13 }
  0xad   : > { %v992_v11 = vsel %vm372_vm0, %v987_v12, %v988_v10  ;;  %v1216_v55 = vpop.permute.xlu1 %1215 }
  0xae   : > { %v993_v58 = vsel %vm653_vm7, %v992_v11, %v982_v45  ;;  %v2185_v6 = vpop.permute.xlu0 %1099  ;;  %v1223_v23 = vrot.slane %v1216_v55, 4 }
  0xaf   : > { %v2188_v59 = vmul.f32 %v993_v58, %v2068_v48  ;;  %v1106_v15 = vrot.slane %v2185_v6, 4 }
  0xb0   : > { %1134 = vrot.lane.b32.xlu0 %v2182_v57, %s1760_s26  ;;  %v1227_v35 = vsel %vm413_vm8, %v1223_v23, %v1216_v55 }
  0xb1   : > { %v1110_v16 = vsel %vm372_vm0, %v1105_v40, %v1106_v15  ;;  %v1220_v60 = vpop.permute.xlu1 %1219  ;;  %1018 = vrot.lane.b32.xlu1 %v2188_v59, %s1761_s8  ;;  %v1238_v11 = vmul.f32 %v1227_v35, %v2066_v46  ;;  %v754_v35 = vcombine.low %v2164_v39, %v2164_v39  ;;  %v634_v39 = vcombine.high %v2138_v24, %v2138_v24 }
  0xb2   : > { %v1111_v61 = vsel %vm533_vm6, %v1110_v16, %v2185_v6  ;;  %v984_v31 = vpop.permute.xlu0 %983 }
  0xb3   : > { %v2201_v63 = vmul.f32 %v1111_v61, %v2068_v48  ;;  %v989_v0 = vrot.slane %v984_v31, 4 }
  0xb5   : > { %v994_v1 = vsel %vm372_vm0, %v988_v10, %v989_v0  ;;  %v2204_v56 = vpop.permute.xlu1 %487  ;;  %1138 = vrot.lane.b32.xlu0 %v2201_v63, %s1760_s26  ;;  %v1129_v6 = vcombine.low %v2201_v63, %v2201_v63 }
  0xb6   : > { %v995_v4 = vsel %vm653_vm7, %v994_v1, %v984_v31  ;;  %v492_v18 = vrot.slane %v2204_v56, 4  ;;  %v1218_v17 = vpop.permute.xlu0 %1217 }
  0xb7   : > { %v2211_v21 = vmul.f32 %v995_v4, %v2070_v49  ;;  %v1224_v27 = vrot.slane %v1218_v17, 4 }
  0xb8   : > { %v498_v26 = vsel %vm372_vm0, %v491_v52, %v492_v18 }
  0xb9   : > { %v2219_v29 = vpop.permute.xlu1 %727  ;;  %1022 = vrot.lane.b32.xlu1 %v2211_v21, %s1761_s8  ;;  %v499_v30 = vsel %vm494_vm2, %v2061_v43, %v498_v26  ;;  %v1225_v43 = vrot.slane %v1220_v60, 4  ;;  %v1228_v40 = vsel %vm372_vm0, %v1223_v23, %v1224_v27 }
  0xba   : > { %v732_v32 = vrot.slane %v2219_v29, 4  ;;  %v2226_v28 = vpop.permute.xlu0 %366  ;;  %v2229_v34 = vmul.f32 %v499_v30, %v2070_v49  ;;  %v1229_v16 = vsel %vm413_vm8, %v1228_v40, %v1218_v17  ;;  %v513_v17 = vcombine.low %v2108_v14, %v2108_v14 }
  0xbb   : > { %v371_v52 = vrot.slane %v2226_v28, 4  ;;  %v1230_v31 = vsel %vm372_vm0, %v1224_v27, %v1225_v43  ;;  %v1239_v4 = vmul.f32 %v1229_v16, %v2068_v48  ;;  %v393_v30 = vcombine.high %v2081_v13, %v2081_v13 }
  0xbc   : > { %v738_v36 = vsel %vm372_vm0, %v731_v19, %v732_v32  ;;  %v1231_v23 = vsel %vm413_vm8, %v1230_v31, %v1220_v60  ;;  %v753_v60 = vcombine.low %v2149_v33, %v2149_v33  ;;  %v1010_v33 = vcombine.high %v1002_v5, %v1002_v5 }
  0xbd   : > { %v378_v41 = vsel %vm372_vm0, %v370_v53, %v371_v52  ;;  %v986_v45 = vpop.permute.xlu1 %985  ;;  %1014 = vrot.lane.b32.xlu1 %v1002_v5, %s1761_s8  ;;  %v739_v19 = vsel %vm734_vm4, %v2112_v3, %v738_v36  ;;  %v2292_v14 = vmul.f32 %v1231_v23, %v2070_v49  ;;  %v871_v36 = vrot.slane %v2161_v38, 4 }
  0xbe   : > { %v990_v12 = vrot.slane %v986_v45, 4  ;;  %v2246_v54 = vpop.permute.xlu0 %607  ;;  %v379_v10 = vsel %vm374_vm1, %v2063_v44, %v378_v41  ;;  %v2258_v53 = vmul.f32 %v739_v19, %v2070_v49  ;;  %v633_v13 = vcombine.high %v2123_v8, %v2123_v8 }
  0xbf   : > { %v612_v55 = vrot.slane %v2246_v54, 4  ;;  %v2255_v58 = vmul.f32 %v379_v10, %v2070_v49  ;;  %v1107_v40 = vrot.slane %v2170_v42, 4  ;;  %v1012_v23 = vcombine.high %v2211_v21, %v2211_v21 }
  0xc0   : > { %v996_v61 = vsel %vm372_vm0, %v989_v0, %v990_v12  ;;  %v500_v12 = vsel %vm494_vm2, %v2204_v56, %v492_v18 }
  0xc1   : > { %v997_v44 = vsel %vm653_vm7, %v996_v61, %v986_v45  ;;  %v618_v46 = vsel %vm372_vm0, %v611_v9, %v612_v55  ;;  %v1222_v3 = vpop.permute.xlu1 %1221  ;;  %1250 = vrot.lane.b32.xlu1 %v1238_v11, %s1759_s19  ;;  %405 = vrot.lane.b32.xlu0 %v2255_v58, %s1766_s29  ;;  %v1112_v24 = vsel %vm372_vm0, %v1106_v15, %v1107_v40 }
  0xc2   : > { %v2273_v1 = vmul.f32 %v997_v44, %v2072_v50  ;;  %v1226_v0 = vrot.slane %v1222_v3, 4  ;;  %v619_v22 = vsel %vm614_vm3, %v2117_v47, %v618_v46  ;;  %v514_v47 = vcombine.low %v2120_v7, %v2120_v7  ;;  %v868_v18 = vpop.permute.xlu0 %867 }
  0xc3   : > { %v2283_v26 = vmul.f32 %v619_v22, %v2070_v49  ;;  %v394_v7 = vcombine.high %v2102_v62, %v2102_v62  ;;  %v1011_v62 = vcombine.high %v2188_v59, %v2188_v59  ;;  %v1113_v37 = vsel %vm533_vm6, %v1112_v24, %v2170_v42 }
  0xc4   : > { %v1232_v9 = vsel %vm372_vm0, %v1225_v43, %v1226_v0  ;;  %v876_v43 = vsel %vm372_vm0, %v870_v25, %v871_v36  ;;  %v893_v25 = vcombine.low %v2175_v51, %v2175_v51  ;;  %v1246_v51 = vcombine.high %v1238_v11, %v1238_v11 }
  0xc5   : > { %v1233_v27 = vsel %vm413_vm8, %v1232_v9, %v1222_v3  ;;  %1254 = vrot.lane.b32.xlu1 %v1239_v4, %s1759_s19  ;;  %517 = vrot.lane.b32.xlu0 %v513_v17, %s1765_s28  ;;  %v877_v5 = vsel %vm773_vm5, %v876_v43, %v2161_v38  ;;  %v1128_v38 = vcombine.low %v2182_v57, %v2182_v57  ;;  %v872_v16 = vrot.slane %v868_v18, 4 }
  0xc6   : > { %v2289_v48 = vmul.f32 %v1233_v27, %v2072_v50  ;;  %v886_v8 = vmul.f32 %v877_v5, %v2070_v49  ;;  %v2349_v15 = vmul.f32 %v1113_v37, %v2070_v49  ;;  %v1247_v57 = vcombine.high %v1239_v4, %v1239_v4  ;;  %v1104_v44 = vpop.permute.xlu0 %1103 }
  0xc7   : > { %v380_v45 = vsel %vm374_vm1, %v2226_v28, %v371_v52  ;;  %v395_v63 = vcombine.high %v2255_v58, %v2255_v58  ;;  %v508_v28 = vmul.f32 %v500_v12, %v2072_v50  ;;  %v515_v52 = vcombine.low %v2229_v34, %v2229_v34 }
  0xc8   : > { %v894_v59 = vcombine.low %v886_v8, %v886_v8  ;;  %v1130_v41 = vcombine.low %v2349_v15, %v2349_v15  ;;  %v388_v49 = vmul.f32 %v380_v45, %v2072_v50  ;;  %v620_v56 = vsel %vm614_vm3, %v2246_v54, %v612_v55 }
  0xc9   : > { %1258 = vrot.lane.b32.xlu1 %v2292_v14, %s1759_s19  ;;  %521 = vrot.lane.b32.xlu0 %v514_v47, %s1765_s28  ;;  %v516_v19 = vcombine.low %v508_v28, %v508_v28  ;;  %v628_v11 = vmul.f32 %v620_v56, %v2072_v50  ;;  %v635_v58 = vcombine.high %v2283_v26, %v2283_v26  ;;  %v1768_v0 = vmov 0.0  }
  0xca   : > { %v396_v10 = vcombine.high %v388_v49, %v388_v49  ;;  %v755_v55 = vcombine.low %v2258_v53, %v2258_v53  ;;  %v878_v31 = vsel %vm372_vm0, %v871_v36, %v872_v16  ;;  %v1108_v4 = vrot.slane %v1104_v44, 4 }
  0xcb   : > { %v636_v61 = vcombine.high %v628_v11, %v628_v11  ;;  %v1013_v47 = vcombine.high %v2273_v1, %v2273_v1  ;;  %v1249_v36 = vcombine.high %v2289_v48, %v2289_v48 }
  0xcc   : > { %v1114_v9 = vsel %vm372_vm0, %v1107_v40, %v1108_v4 }
  0xcd   : > { %757 = vrot.lane.b32.xlu0 %v753_v60, %s1763_s18  ;;  %399 = vrot.lane.b32.xlu1 %v393_v30, %s1766_s29 }
  0xd1   : > { %761 = vrot.lane.b32.xlu0 %v754_v35, %s1763_s18  ;;  %403 = vrot.lane.b32.xlu1 %v394_v7, %s1766_s29 }
  0xd5   : > { %1016 = vrot.lane.b32.xlu0 %v1010_v33, %s1761_s8  ;;  %639 = vrot.lane.b32.xlu1 %v633_v13, %s1764_s27 }
  0xd9   : > { %1020 = vrot.lane.b32.xlu0 %v1011_v62, %s1761_s8  ;;  %643 = vrot.lane.b32.xlu1 %v634_v39, %s1764_s27 }
  0xdd   : > { %896 = vrot.lane.b32.xlu0 %v892_v20, %s1762_s13  ;;  %900 = vrot.lane.b32.xlu1 %v893_v25, %s1762_s13 }
  0xe1   : > { %1132 = vrot.lane.b32.xlu0 %v1128_v38, %s1760_s26  ;;  %904 = vrot.lane.b32.xlu1 %v894_v59, %s1762_s13 }
  0xe5   : > { %1252 = vrot.lane.b32.xlu0 %v1246_v51, %s1759_s19  ;;  %1136 = vrot.lane.b32.xlu1 %v1129_v6, %s1760_s26 }
  0xe9   : > { %1256 = vrot.lane.b32.xlu0 %v1247_v57, %s1759_s19  ;;  %1140 = vrot.lane.b32.xlu1 %v1130_v41, %s1760_s26 }
  0xed   : > { %409 = vrot.lane.b32.xlu0 %v388_v49, %s1766_s29  ;;  %407 = vrot.lane.b32.xlu1 %v395_v63, %s1766_s29 }
  0xf1   : > { %525 = vrot.lane.b32.xlu0 %v515_v52, %s1765_s28  ;;  %411 = vrot.lane.b32.xlu1 %v396_v10, %s1766_s29 }
  0xf5   : > { %529 = vrot.lane.b32.xlu0 %v516_v19, %s1765_s28  ;;  %527 = vrot.lane.b32.xlu1 %v2229_v34, %s1765_s28  ;;  %v740_v34 = vsel %vm734_vm4, %v2219_v29, %v732_v32  ;;  %v879_v29 = vsel %vm773_vm5, %v878_v31, %v868_v18 }
  0xf6   : > { %v748_v54 = vmul.f32 %v740_v34, %v2072_v50  ;;  %v887_v3 = vmul.f32 %v879_v29, %v2072_v50 }
  0xf8   : > { %v756_v46 = vcombine.low %v748_v54, %v748_v54  ;;  %v895_v22 = vcombine.low %v887_v3, %v887_v3 }
  0xf9   : > { %645 = vrot.lane.b32.xlu0 %v2283_v26, %s1764_s27  ;;  %531 = vrot.lane.b32.xlu1 %v508_v28, %s1765_s28  ;;  %v1115_v26 = vsel %vm533_vm6, %v1114_v9, %v1104_v44 }
  0xfa   : > { %v1123_v42 = vmul.f32 %v1115_v26, %v2072_v50  ;;  %v1248_v50 = vcombine.high %v2292_v14, %v2292_v14 }
  0xfc   : > { %v1131_v21 = vcombine.low %v1123_v42, %v1123_v42 }
  0xfd   : > { %649 = vrot.lane.b32.xlu0 %v628_v11, %s1764_s27  ;;  %647 = vrot.lane.b32.xlu1 %v635_v58, %s1764_s27 }
 0x101   : > { %765 = vrot.lane.b32.xlu0 %v755_v55, %s1763_s18  ;;  %651 = vrot.lane.b32.xlu1 %v636_v61, %s1764_s27 }
 0x105   : > { %769 = vrot.lane.b32.xlu0 %v756_v46, %s1763_s18  ;;  %v2402_v32 = vpop.permute.xlu0 %397  ;;  %767 = vrot.lane.b32.xlu1 %v2258_v53, %s1763_s18 }
 0x106   : > { %430 = vst.msk [vmem:[#allocation2] sm:$0xf] %vm429_vm9, %v2402_v32  ;;  %vm798_vm9 = vcmask 7172  }
 0x107   : > { %439 = vst.msk [vmem:[#allocation2] sm:$0xf] %vm438_vm10, %v1768_v0  ;;  %vm1367_vm10 = vcmask 1041408  }
 0x109   : > { %906 = vrot.lane.b32.xlu0 %v886_v8, %s1762_s13  ;;  %771 = vrot.lane.b32.xlu1 %v748_v54, %s1763_s18  ;;  %v2411_v17 = vpop.permute.xlu0 %401 }
 0x10b   : > { %v520_v27 = vpop.permute.xlu1 %519 }
 0x10d   : > { %910 = vrot.lane.b32.xlu0 %v887_v3, %s1762_s13  ;;  %908 = vrot.lane.b32.xlu1 %v895_v22, %s1762_s13 }
 0x10f   : > { %v2418_v53 = vpop.permute.xlu0 %637  ;;  %v2434_v60 = vpop.permute.xlu1 %523 }
 0x110   : > { %670 = vst.msk [vmem:[#allocation2 + $0x40] sm:$0xf] %vm669_vm11, %v2418_v53  ;;  %vm1170_vm11 = vcmask 785412  }
 0x111   : > { %679 = vst.msk [vmem:[#allocation2 + $0x40] sm:$0xf] %vm678_vm12, %v1768_v0  ;;  %1026 = vrot.lane.b32.xlu0 %v2273_v1, %s1761_s8  ;;  %1024 = vrot.lane.b32.xlu1 %v1012_v23, %s1761_s8  ;;  %v1357_v1 = vld [vmem:[%s2640_s5] sm:$0xf]  ;;  %vm1172_vm12 = vcmask 1048324  }
 0x113   : > { %v2436_v30 = vpop.permute.xlu0 %641 }
 0x115   : > { %1142 = vrot.lane.b32.xlu0 %v2349_v15, %s1760_s26  ;;  %1028 = vrot.lane.b32.xlu1 %v1013_v47, %s1761_s8 }
 0x117   : > { %v760_v35 = vpop.permute.xlu1 %759 }
 0x119   : > { %1146 = vrot.lane.b32.xlu0 %v1123_v42, %s1760_s26  ;;  %1144 = vrot.lane.b32.xlu1 %v1131_v21, %s1760_s26 }
 0x11a   : > { %v2442_v7 = vpop.permute.xlu0 %898 }
 0x11b   : > { %v2453_v33 = vpop.permute.xlu1 %763 }
 0x11d   : > { %1262 = vrot.lane.b32.xlu0 %v2289_v48, %s1759_s19  ;;  %1260 = vrot.lane.b32.xlu1 %v1248_v50, %s1759_s19 }
 0x11e   : > { %v2455_v14 = vpop.permute.xlu0 %902 }
 0x121   : > { %1360 = vperm.xlu0 %1749, %v1357_v1   ;;  %1264 = vrot.lane.b32.xlu1 %v1249_v36, %s1759_s19 }
 0x122   : > { %v2457_v43 = vpop.permute.xlu0 %1134 }
 0x123   : > { %v1019_v13 = vpop.permute.xlu1 %1018 }
 0x127   : > { %v2461_v39 = vpop.permute.xlu0 %1138 }
 0x12b   : > { %v2459_v62 = vpop.permute.xlu1 %1022 }
 0x12f   : > { %v1015_v5 = vpop.permute.xlu1 %1014 }
 0x133   : > { %v2463_v40 = vpop.permute.xlu1 %1250  ;;  %v2465_v8 = vpop.permute.xlu0 %405 }
 0x137   : > { %v2467_v48 = vpop.permute.xlu1 %1254  ;;  %v518_v20 = vpop.permute.xlu0 %517 }
 0x138   : > { %v534_v25 = vsel %vm533_vm6, %v518_v20, %v520_v27  ;;  %550 = vst.msk [vmem:[#allocation2] sm:$0xf0] %vm549_vm13, %v518_v20  ;;  %vm1290_vm13 = vcmask 1044216  }
 0x139   : > { %551 = vst [vmem:[#allocation2 + $0x8] sm:$0xf0] %v534_v25  ;;  %559 = vst.msk [vmem:[#allocation2] sm:$0xf0] %vm558_vm14, %v1768_v0 }
 0x13b   : > { %v2471_v24 = vpop.permute.xlu1 %1258  ;;  %v522_v38 = vpop.permute.xlu0 %521 }
 0x13c   : > { %v535_v59 = vsel %vm533_vm6, %v520_v27, %v522_v38  ;;  %v536_v37 = vsel %vm533_vm6, %v522_v38, %v2434_v60 }
 0x13d   : > { %552 = vst [vmem:[#allocation2 + $0x10] sm:$0xf0] %v535_v59  ;;  %553 = vst [vmem:[#allocation2 + $0x18] sm:$0xf0] %v536_v37 }
 0x13f   : > { %v758_v51 = vpop.permute.xlu0 %757  ;;  %v400_v6 = vpop.permute.xlu1 %399 }
 0x140   : > { %v774_v15 = vsel %vm773_vm5, %v758_v51, %v760_v35  ;;  %790 = vst.msk [vmem:[#allocation2 + $0x40] sm:$0xf0] %vm789_vm15, %v758_v51  ;;  %v414_v57 = vsel %vm413_vm8, %v2402_v32, %v400_v6  ;;  %v415_v41 = vsel %vm413_vm8, %v400_v6, %v2411_v17  ;;  %v1293_v31 = vld [vmem:[#allocation2] sm:$0xff] }
 0x141   : > { %791 = vst [vmem:[#allocation2 + $0x48] sm:$0xf0] %v774_v15  ;;  %799 = vst.msk [vmem:[#allocation2 + $0x40] sm:$0xf0] %vm798_vm9, %v1768_v0 }
 0x142   : > { %431 = vst [vmem:[#allocation2 + $0x8] sm:$0xf] %v414_v57  ;;  %432 = vst [vmem:[#allocation2 + $0x10] sm:$0xf] %v415_v41 }
 0x143   : > { %v762_v45 = vpop.permute.xlu0 %761  ;;  %v404_v49 = vpop.permute.xlu1 %403 }
 0x144   : > { %v775_v63 = vsel %vm773_vm5, %v760_v35, %v762_v45  ;;  %v776_v12 = vsel %vm773_vm5, %v762_v45, %v2453_v33  ;;  %v416_v28 = vsel %vm413_vm8, %v2411_v17, %v404_v49  ;;  %v417_v52 = vsel %vm413_vm8, %v404_v49, %v2465_v8 }
 0x145   : > { %792 = vst [vmem:[#allocation2 + $0x50] sm:$0xf0] %v775_v63  ;;  %793 = vst [vmem:[#allocation2 + $0x58] sm:$0xf0] %v776_v12 }
 0x146   : > { %433 = vst [vmem:[#allocation2 + $0x18] sm:$0xf] %v416_v28  ;;  %434 = vst [vmem:[#allocation2 + $0x20] sm:$0xf] %v417_v52 }
 0x147   : > { %v1017_v10 = vpop.permute.xlu0 %1016  ;;  %v640_v19 = vpop.permute.xlu1 %639 }
 0x148   : > { %v1030_v56 = vsel %vm614_vm3, %v1015_v5, %v1017_v10  ;;  %v1031_v18 = vsel %vm614_vm3, %v1017_v10, %v1019_v13  ;;  %v654_v11 = vsel %vm653_vm7, %v2418_v53, %v640_v19  ;;  %v655_v58 = vsel %vm653_vm7, %v640_v19, %v2436_v30  ;;  %v1301_v44 = vld [vmem:[#allocation2 + $0x40] sm:$0xff] }
 0x149   : > { %1045 = vst [vmem:[#allocation2 + $0xc0] sm:$0xf] %v1030_v56  ;;  %1046 = vst [vmem:[#allocation2 + $0xc8] sm:$0xf] %v1031_v18  ;;  %v1294_v17 = vld [vmem:[#allocation2 + $0x8] sm:$0xff]  ;;  %v1333_v9 = vpack.c.bf16 %v1301_v44, %v1293_v31  ;;  %v1295_v35 = vld [vmem:[#allocation2 + $0x10] sm:$0xff] }
 0x14a   : > { %671 = vst [vmem:[#allocation2 + $0x48] sm:$0xf] %v654_v11  ;;  %672 = vst [vmem:[#allocation2 + $0x50] sm:$0xf] %v655_v58 }
 0x14b   : > { %v1021_v34 = vpop.permute.xlu0 %1020  ;;  %v2495_v16 = vpop.permute.xlu1 %643 }
 0x14c   : > { %v1032_v54 = vsel %vm614_vm3, %v1019_v13, %v1021_v34  ;;  %v1033_v55 = vsel %vm614_vm3, %v1021_v34, %v2459_v62  ;;  %v656_v61 = vsel %vm653_vm7, %v2436_v30, %v2495_v16 }
 0x14d   : > { %1047 = vst [vmem:[#allocation2 + $0xd0] sm:$0xf] %v1032_v54  ;;  %1048 = vst [vmem:[#allocation2 + $0xd8] sm:$0xf] %v1033_v55  ;;  %v1296_v21 = vld [vmem:[#allocation2 + $0x18] sm:$0xff] }
 0x14e   : > { %673 = vst [vmem:[#allocation2 + $0x58] sm:$0xf] %v656_v61 }
 0x14f   : > { %v897_v46 = vpop.permute.xlu0 %896  ;;  %v901_v29 = vpop.permute.xlu1 %900 }
 0x150   : > { %v912_v32 = vsel %vm734_vm4, %v897_v46, %v2442_v7  ;;  %v913_v3 = vsel %vm734_vm4, %v2442_v7, %v901_v29  ;;  %v914_v4 = vsel %vm734_vm4, %v901_v29, %v2455_v14 }
 0x151   : > { %v1302_v22 = vld [vmem:[#allocation2 + $0x48] sm:$0xff]  ;;  %927 = vst [vmem:[#allocation2 + $0x80] sm:$0xf0] %v912_v32  ;;  %928 = vst [vmem:[#allocation2 + $0x88] sm:$0xf0] %v913_v3  ;;  %v1303_v42 = vld [vmem:[#allocation2 + $0x50] sm:$0xff] }
 0x152   : > { %929 = vst [vmem:[#allocation2 + $0x90] sm:$0xf0] %v914_v4  ;;  %v1334_v53 = vpack.c.bf16 %v1302_v22, %v1294_v17  ;;  %v1335_v7 = vpack.c.bf16 %v1303_v42, %v1295_v35  ;;  %v2546_v17 = vld [vmem:[%s2639_s4] sm:$0x3] }
 0x153   : > { %v1133_v23 = vpop.permute.xlu0 %1132  ;;  %v2509_v26 = vpop.permute.xlu1 %904 }
 0x154   : > { %1392 = vmatprep.subr.bf16.mxu0 %v1334_v53  ;;  %v1148_v27 = vsel %vm494_vm2, %v1133_v23, %v2457_v43  ;;  %v915_v47 = vsel %vm734_vm4, %v2455_v14, %v2509_v26 }
 0x155   : > { %v1304_v30 = vld [vmem:[#allocation2 + $0x58] sm:$0xff]  ;;  %1393 = vmatpush1.bf16.msra.mxu0 %v1333_v9  ;;  %1163 = vst [vmem:[#allocation2 + $0xc0] sm:$0xf0] %v1148_v27  ;;  %930 = vst [vmem:[#allocation2 + $0x98] sm:$0xf0] %v915_v47 }
 0x156   : > { %v1336_v50 = vpack.c.bf16 %v1304_v30, %v1296_v21 }
 0x157   : > { %v1253_v1 = vpop.permute.xlu0 %1252  ;;  %v1137_v36 = vpop.permute.xlu1 %1136 }
 0x158   : > { %1433 = vmatprep.subr.bf16.mxu1 %v1336_v50  ;;  %v1266_v13 = vsel %vm374_vm1, %v2463_v40, %v1253_v1  ;;  %v1267_v5 = vsel %vm374_vm1, %v1253_v1, %v2467_v48  ;;  %v1149_v14 = vsel %vm494_vm2, %v2457_v43, %v1137_v36  ;;  %v1150_v20 = vsel %vm494_vm2, %v1137_v36, %v2461_v39  ;;  %v1310_v6 = vld [vmem:[#allocation2 + $0x88] sm:$0xff]  ;;  %v1309_v12 = vld [vmem:[#allocation2 + $0x80] sm:$0xff] }
 0x159   : > { %1434 = vmatpush1.bf16.msra.mxu1 %v1335_v7  ;;  %1281 = vst [vmem:[#allocation2 + $0x100] sm:$0xf] %v1266_v13  ;;  %1282 = vst [vmem:[#allocation2 + $0x108] sm:$0xf] %v1267_v5  ;;  %v1311_v61 = vld [vmem:[#allocation2 + $0x90] sm:$0xff] }
 0x15a   : > { %1164 = vst [vmem:[#allocation2 + $0xc8] sm:$0xf0] %v1149_v14  ;;  %1165 = vst [vmem:[#allocation2 + $0xd0] sm:$0xf0] %v1150_v20 }
 0x15b   : > { %v1257_v25 = vpop.permute.xlu0 %1256  ;;  %v2524_v38 = vpop.permute.xlu1 %1140 }
 0x15c   : > { %v1268_v40 = vsel %vm374_vm1, %v2467_v48, %v1257_v25  ;;  %v1269_v59 = vsel %vm374_vm1, %v1257_v25, %v2471_v24  ;;  %v1151_v43 = vsel %vm494_vm2, %v2461_v39, %v2524_v38  ;;  %v1317_v15 = vld [vmem:[#allocation2 + $0xc0] sm:$0xff]  ;;  %v1312_v19 = vld [vmem:[#allocation2 + $0x98] sm:$0xff] }
 0x15d   : > { %1283 = vst [vmem:[#allocation2 + $0x110] sm:$0xf] %v1268_v40  ;;  %1284 = vst [vmem:[#allocation2 + $0x118] sm:$0xf] %v1269_v59  ;;  %v1341_v39 = vpack.c.bf16 %v1317_v15, %v1309_v12 }
 0x15e   : > { %1166 = vst [vmem:[#allocation2 + $0xd8] sm:$0xf0] %v1151_v43 }
 0x15f   : > { %v410_v37 = vpop.permute.xlu0 %409  ;;  %v408_v51 = vpop.permute.xlu1 %407 }
 0x160   : > { %v418_v57 = vsel %vm413_vm8, %v2465_v8, %v408_v51  ;;  %v419_v41 = vsel %vm413_vm8, %v408_v51, %v410_v37  ;;  %v1326_v45 = vld [vmem:[#allocation2 + $0x108] sm:$0xf]  ;;  %v1325_v49 = vld [vmem:[#allocation2 + $0x100] sm:$0xf] }
 0x161   : > { %v1318_v48 = vld [vmem:[#allocation2 + $0xc8] sm:$0xff]  ;;  %435 = vst [vmem:[#allocation2 + $0x28] sm:$0xf] %v418_v57  ;;  %436 = vst [vmem:[#allocation2 + $0x30] sm:$0xf] %v419_v41  ;;  %v1350_v10 = vpack.c.bf16 %v1326_v45, %v1326_v45  ;;  %v1349_v56 = vpack.c.bf16 %v1325_v49, %v1325_v49  ;;  %v1319_v18 = vld [vmem:[#allocation2 + $0xd0] sm:$0xff] }
 0x162   : > { %v1342_v63 = vpack.c.bf16 %v1318_v48, %v1310_v6  ;;  %v1343_v31 = vpack.c.bf16 %v1319_v18, %v1311_v61 }
 0x163   : > { %v526_v28 = vpop.permute.xlu0 %525  ;;  %v412_v52 = vpop.permute.xlu1 %411  ;;  %v1369_v29 = vsel %vm1367_vm10, %v1349_v56, 0 }
 0x164   : > { %1394 = vmatprep.subr.bf16.mxu0 %v1342_v63  ;;  %v537_v8 = vsel %vm533_vm6, %v2434_v60, %v526_v28  ;;  %v420_v11 = vsel %vm413_vm8, %v410_v37, %v412_v52  ;;  %v1328_v34 = vld [vmem:[#allocation2 + $0x118] sm:$0xf]  ;;  %v1327_v54 = vld [vmem:[#allocation2 + $0x110] sm:$0xf]  ;;  %vm1363_vm8 = vcmask 293888  }
 0x165   : > { %1395 = vmatpush1.bf16.msra.mxu0 %v1341_v39  ;;  %v1320_v58 = vld [vmem:[#allocation2 + $0xd8] sm:$0xff]  ;;  %554 = vst [vmem:[#allocation2 + $0x20] sm:$0xf0] %v537_v8  ;;  %437 = vst [vmem:[#allocation2 + $0x38] sm:$0xf] %v420_v11  ;;  %v1352_v60 = vpack.c.bf16 %v1328_v34, %v1328_v34  ;;  %v1351_v32 = vpack.c.bf16 %v1327_v54, %v1327_v54 }
 0x166   : > { %1716 = vmatprep.subr.msk.bf16.mxu0 %vm1367_vm10, %v1350_v10  ;;  %v1344_v55 = vpack.c.bf16 %v1320_v58, %v1312_v19 }
 0x167   : > { %v530_v44 = vpop.permute.xlu0 %529  ;;  %v528_v46 = vpop.permute.xlu1 %527  ;;  %v1375_v53 = vsel %vm1367_vm10, %v1351_v32, 0 }
 0x168   : > { %1435 = vmatprep.subr.bf16.mxu1 %v1344_v55  ;;  %v538_v3 = vsel %vm533_vm6, %v526_v28, %v528_v46  ;;  %v539_v4 = vsel %vm533_vm6, %v528_v46, %v530_v44 }
 0x169   : > { %1397 = vmatpush1.bf16.msra.mxu0 %v1369_v29  ;;  %1436 = vmatpush1.bf16.msra.mxu1 %v1343_v31  ;;  %555 = vst [vmem:[#allocation2 + $0x28] sm:$0xf0] %v538_v3  ;;  %556 = vst [vmem:[#allocation2 + $0x30] sm:$0xf0] %v539_v4 }
 0x16a   : > { %1718 = vmatprep.subr.msk.bf16.mxu1 %vm1367_vm10, %v1352_v60 }
 0x16b   : > { %v646_v22 = vpop.permute.xlu0 %645  ;;  %v532_v9 = vpop.permute.xlu1 %531 }
 0x16c   : > { %1717 = vmatmul.mubr.msk.bf16.vlgmr.msra.gmra.mrb[0].mxu0 %vm1363_vm8, %v2546_v17  ;;  %v657_v23 = vsel %vm653_vm7, %v2495_v16, %v646_v22  ;;  %v540_v42 = vsel %vm533_vm6, %v530_v44, %v532_v9  ;;  %vm934_vm6 = vcmask 1039364   ;;  %v1297_v15 = vld [vmem:[#allocation2 + $0x20] sm:$0xff] }
 0x16d   : > { %1438 = vmatpush1.bf16.msra.mxu1 %v1375_v53  ;;  %1506 = vmatprep.mubr.bf16.mxu0 %v1758_v2  ;;  %674 = vst [vmem:[#allocation2 + $0x60] sm:$0xf] %v657_v23  ;;  %557 = vst [vmem:[#allocation2 + $0x38] sm:$0xf0] %v540_v42 }
 0x16f   : > { %v650_v27 = vpop.permute.xlu0 %649  ;;  %v648_v47 = vpop.permute.xlu1 %647 }
 0x170   : > { %1719 = vmatmul.mubr.msk.bf16.vlgmr.msra.gmra.mrb[0].mxu1 %vm1363_vm8, %v2546_v17  ;;  %v658_v21 = vsel %vm653_vm7, %v646_v22, %v648_v47  ;;  %v659_v30 = vsel %vm653_vm7, %v648_v47, %v650_v27  ;;  %v1298_v51 = vld [vmem:[#allocation2 + $0x28] sm:$0xff]  ;;  %v1299_v52 = vld [vmem:[#allocation2 + $0x30] sm:$0xff] }
 0x171   : > { %1547 = vmatprep.mubr.bf16.mxu1 %v1758_v2  ;;  %675 = vst [vmem:[#allocation2 + $0x68] sm:$0xf] %v658_v21  ;;  %676 = vst [vmem:[#allocation2 + $0x70] sm:$0xf] %v659_v30 }
 0x173   : > { %v766_v16 = vpop.permute.xlu0 %765  ;;  %v652_v50 = vpop.permute.xlu1 %651 }
 0x174   : > { %v777_v35 = vsel %vm773_vm5, %v2453_v33, %v766_v16  ;;  %v660_v7 = vsel %vm653_vm7, %v650_v27, %v652_v50  ;;  %vm936_vm7 = vcmask 1048572   ;;  %v1300_v12 = vld [vmem:[#allocation2 + $0x38] sm:$0xff] }
 0x175   : > { %794 = vst [vmem:[#allocation2 + $0x60] sm:$0xf0] %v777_v35  ;;  %677 = vst [vmem:[#allocation2 + $0x78] sm:$0xf] %v660_v7 }
 0x177   : > { %v770_v1 = vpop.permute.xlu0 %769  ;;  %v768_v36 = vpop.permute.xlu1 %767 }
 0x178   : > { %v778_v13 = vsel %vm773_vm5, %v766_v16, %v768_v36  ;;  %v779_v5 = vsel %vm773_vm5, %v768_v36, %v770_v1 }
 0x179   : > { %795 = vst [vmem:[#allocation2 + $0x68] sm:$0xf0] %v778_v13  ;;  %796 = vst [vmem:[#allocation2 + $0x70] sm:$0xf0] %v779_v5 }
 0x17b   : > { %v907_v2 = vpop.permute.xlu0 %906  ;;  %v772_v14 = vpop.permute.xlu1 %771 }
 0x17c   : > { %v916_v20 = vsel %vm734_vm4, %v2509_v26, %v907_v2  ;;  %v780_v25 = vsel %vm773_vm5, %v770_v1, %v772_v14  ;;  %v1305_v59 = vld [vmem:[#allocation2 + $0x60] sm:$0xff]  ;;  %vm1054_vm5 = vcmask 1044232  }
 0x17d   : > { %931 = vst [vmem:[#allocation2 + $0xa0] sm:$0xf0] %v916_v20  ;;  %797 = vst [vmem:[#allocation2 + $0x78] sm:$0xf0] %v780_v25  ;;  %v1337_v57 = vpack.c.bf16 %v1305_v59, %v1297_v15 }
 0x17f   : > { %v911_v33 = vpop.permute.xlu0 %910  ;;  %v909_v40 = vpop.permute.xlu1 %908 }
 0x180   : > { %935 = vst.msk [vmem:[#allocation2 + $0xb8] sm:$0xf0] %vm934_vm6, %v911_v33  ;;  %v917_v43 = vsel %vm734_vm4, %v907_v2, %v909_v40  ;;  %v918_v37 = vsel %vm734_vm4, %v909_v40, %v911_v33  ;;  %v1306_v6 = vld [vmem:[#allocation2 + $0x68] sm:$0xff]  ;;  %v1307_v45 = vld [vmem:[#allocation2 + $0x70] sm:$0xff]  ;;  %vm1052_vm4 = vcmask 789504  }
 0x181   : > { %937 = vst.msk [vmem:[#allocation2 + $0xb8] sm:$0xf0] %vm936_vm7, %v1768_v0  ;;  %932 = vst [vmem:[#allocation2 + $0xa8] sm:$0xf0] %v917_v43  ;;  %v1338_v26 = vpack.c.bf16 %v1306_v6, %v1298_v51  ;;  %v1339_v10 = vpack.c.bf16 %v1307_v45, %v1299_v52 }
 0x182   : > { %933 = vst [vmem:[#allocation2 + $0xb0] sm:$0xf0] %v918_v37 }
 0x183   : > { %v1027_v41 = vpop.permute.xlu0 %1026  ;;  %1474 = vmatprep.subr.bf16.mxu0 %v1338_v26  ;;  %v1025_v48 = vpop.permute.xlu1 %1024 }
 0x184   : > { %v1034_v49 = vsel %vm614_vm3, %v2459_v62, %v1025_v48  ;;  %v1035_v63 = vsel %vm614_vm3, %v1025_v48, %v1027_v41  ;;  %1475 = vmatpush1.bf16.msra.mxu0 %v1337_v57  ;;  %v1308_v39 = vld [vmem:[#allocation2 + $0x78] sm:$0xff]  ;;  %v1313_v53 = vld [vmem:[#allocation2 + $0xa0] sm:$0xff] }
 0x185   : > { %1049 = vst [vmem:[#allocation2 + $0xe0] sm:$0xf] %v1034_v49  ;;  %1050 = vst [vmem:[#allocation2 + $0xe8] sm:$0xf] %v1035_v63  ;;  %v1340_v28 = vpack.c.bf16 %v1308_v39, %v1300_v12 }
 0x187   : > { %v1143_v19 = vpop.permute.xlu0 %1142  ;;  %1515 = vmatprep.subr.bf16.mxu1 %v1340_v28  ;;  %v1029_v56 = vpop.permute.xlu1 %1028 }
 0x188   : > { %v1152_v18 = vsel %vm494_vm2, %v2524_v38, %v1143_v19  ;;  %v1036_v62 = vsel %vm614_vm3, %v1027_v41, %v1029_v56  ;;  %1053 = vst.msk [vmem:[#allocation2 + $0xf8] sm:$0xf] %vm1052_vm4, %v1029_v56  ;;  %1516 = vmatpush1.bf16.msra.mxu1 %v1339_v10  ;;  %vm1288_vm3 = vcmask 773120   ;;  %v1314_v31 = vld [vmem:[#allocation2 + $0xa8] sm:$0xff]  ;;  %v1316_v46 = vld [vmem:[#allocation2 + $0xb8] sm:$0xff]  ;;  %v1769_v56 = vmov (!%p1724_p4), 0.0  }
 0x189   : > { %1167 = vst [vmem:[#allocation2 + $0xe0] sm:$0xf0] %v1152_v18  ;;  %1051 = vst [vmem:[#allocation2 + $0xf0] sm:$0xf] %v1036_v62  ;;  %v1315_v60 = vld [vmem:[#allocation2 + $0xb0] sm:$0xff] }
 0x18a   : > { %1055 = vst.msk [vmem:[#allocation2 + $0xf8] sm:$0xf] %vm1054_vm5, %v1768_v0 }
 0x18b   : > { %v1147_v8 = vpop.permute.xlu0 %1146  ;;  %v1145_v11 = vpop.permute.xlu1 %1144 }
 0x18c   : > { %1171 = vst.msk [vmem:[#allocation2 + $0xf8] sm:$0xf0] %vm1170_vm11, %v1147_v8  ;;  %v1153_v58 = vsel %vm494_vm2, %v1143_v19, %v1145_v11  ;;  %v1154_v34 = vsel %vm494_vm2, %v1145_v11, %v1147_v8 }
 0x18d   : > { %1173 = vst.msk [vmem:[#allocation2 + $0xf8] sm:$0xf0] %vm1172_vm12, %v1768_v0  ;;  %1168 = vst [vmem:[#allocation2 + $0xe8] sm:$0xf0] %v1153_v58 }
 0x18e   : > { %1169 = vst [vmem:[#allocation2 + $0xf0] sm:$0xf0] %v1154_v34 }
 0x18f   : > { %v1263_v38 = vpop.permute.xlu0 %1262  ;;  %v1261_v54 = vpop.permute.xlu1 %1260 }
 0x190   : > { %v1270_v55 = vsel %vm374_vm1, %v2471_v24, %v1261_v54  ;;  %v1271_v61 = vsel %vm374_vm1, %v1261_v54, %v1263_v38  ;;  %v1321_v29 = vld [vmem:[#allocation2 + $0xe0] sm:$0xff] }
 0x191   : > { %1285 = vst [vmem:[#allocation2 + $0x120] sm:$0xf] %v1270_v55  ;;  %1286 = vst [vmem:[#allocation2 + $0x128] sm:$0xf] %v1271_v61  ;;  %v1345_v42 = vpack.c.bf16 %v1321_v29, %v1313_v53 }
 0x193   : > { %v1265_v44 = vpop.permute.xlu1 %1264 }
 0x194   : > { %v1272_v32 = vsel %vm374_vm1, %v1263_v38, %v1265_v44  ;;  %1289 = vst.msk [vmem:[#allocation2 + $0x138] sm:$0xf] %vm1288_vm3, %v1265_v44  ;;  %v1322_v3 = vld [vmem:[#allocation2 + $0xe8] sm:$0xff]  ;;  %v1324_v4 = vld [vmem:[#allocation2 + $0xf8] sm:$0xff]  ;;  %vm1580_vm1 = vcmask (!%p1724_p4), 11264  }
 0x195   : > { %v1323_v22 = vld [vmem:[#allocation2 + $0xf0] sm:$0xff]  ;;  %1287 = vst [vmem:[#allocation2 + $0x130] sm:$0xf] %v1272_v32  ;;  %1291 = vst.msk [vmem:[#allocation2 + $0x138] sm:$0xf] %vm1290_vm13, %v1768_v0  ;;  %v1346_v24 = vpack.c.bf16 %v1322_v3, %v1314_v31  ;;  %v1348_v9 = vpack.c.bf16 %v1324_v4, %v1316_v46 }
 0x196   : > { %v1347_v23 = vpack.c.bf16 %v1323_v22, %v1315_v60  ;;  %1581 = vst.msk [vmem:[%s2642_s7] sm:$0xf] (!%p1724_p4), %vm1580_vm1, %v1769_v56 }
 0x197   : > { %1476 = vmatprep.subr.bf16.mxu0 %v1346_v24  ;;  %1517 = vmatprep.subr.bf16.mxu1 %v1348_v9 }
 0x198   : > { %1477 = vmatpush1.bf16.msra.mxu0 %v1345_v42  ;;  %1518 = vmatpush1.bf16.msra.mxu1 %v1347_v23  ;;  %v1330_v27 = vld [vmem:[#allocation2 + $0x128] sm:$0xf]  ;;  %v1329_v47 = vld [vmem:[#allocation2 + $0x120] sm:$0xf] }
 0x199   : > { %v1354_v21 = vpack.c.bf16 %v1330_v27, %v1330_v27  ;;  %v1353_v30 = vpack.c.bf16 %v1329_v47, %v1329_v47 }
 0x19b   : > { %1720 = vmatprep.subr.msk.bf16.mxu0 %vm1367_vm10, %v1354_v21  ;;  %v1381_v16 = vsel %vm1367_vm10, %v1353_v30, 0 }
 0x19c   : > { %1479 = vmatpush1.bf16.msra.mxu0 %v1381_v16  ;;  %v1332_v0 = vld [vmem:[#allocation2 + $0x138] sm:$0xf]  ;;  %v1331_v50 = vld [vmem:[#allocation2 + $0x130] sm:$0xf] }
 0x19d   : > { %v1356_v35 = vpack.c.bf16 %v1332_v0, %v1332_v0  ;;  %v1355_v7 = vpack.c.bf16 %v1331_v50, %v1331_v50 }
 0x19f   : > { %1721 = vmatmul.mubr.msk.bf16.vlgmr.msra.gmra.mrb[4].mxu0 %vm1363_vm8, %v2546_v17  ;;  %1722 = vmatprep.subr.msk.bf16.mxu1 %vm1367_vm10, %v1356_v35  ;;  %v1387_v1 = vsel %vm1367_vm10, %v1355_v7, 0 }
 0x1a0   : > { %1520 = vmatpush1.bf16.msra.mxu1 %v1387_v1  ;;  %v1361_v36 = vpop.permute.xlu0 %1360 }
 0x1a3   : > { %1723 = vmatmul.mubr.msk.bf16.vlgmr.msra.gmra.mrb[4].mxu1 %vm1363_vm8, %v2546_v17 }
 0x23f   : > { %v1426_v13 = vpop.f32.mrb[0].mxu0 }
 0x240   : > { %v1427_v5 = vadd.f32 %v1426_v13, %v1361_v36  ;;  %v1428_v2 = vpop.f32.mrb[1].mxu0 }
 0x241   : > { %v1429_v14 = vadd.f32 %v1428_v2, %v1361_v36  ;;  %v1430_v20 = vpop.f32.mrb[2].mxu0 }
 0x242   : > { %v1431_v25 = vpop.f32.mrb[3].mxu0 }
 0x243   : > { %v1564_v33 = vcombine.low %v1427_v5, %v1429_v14  ;;  %v1467_v40 = vpop.f32.mrb[0].mxu1 }
 0x244   : > { %v1468_v59 = vadd.f32 %v1467_v40, %v1361_v36  ;;  %v1469_v43 = vpop.f32.mrb[1].mxu1 }
 0x245   : > { %1572 = vst [vmem:[%s276_s16] sm:$0xff] %v1564_v33  ;;  %v1470_v37 = vadd.f32 %v1469_v43, %v1361_v36  ;;  %v1471_v51 = vpop.f32.mrb[2].mxu1 }
 0x246   : > { %v1472_v17 = vpop.f32.mrb[3].mxu1 }
 0x247   : > { %v1565_v6 = vcombine.low %v1468_v59, %v1470_v37 }
 0x249   : > { %1573 = vst [vmem:[%s276_s16 + $0x8] sm:$0xff] %v1565_v6 }
 0x272   : > { %v1508_v26 = vpop.f32.mrb[4].mxu0 }
 0x273   : > { %v1509_v15 = vadd.f32 %v1508_v26, %v1361_v36  ;;  %v1510_v57 = vpop.f32.mrb[5].mxu0 }
 0x274   : > { %v1511_v41 = vadd.f32 %v1510_v57, %v1361_v36  ;;  %v1512_v48 = vpop.f32.mrb[6].mxu0 }
 0x275   : > { %v1513_v45 = vpop.f32.mrb[7].mxu0 }
 0x276   : > { %v1566_v49 = vcombine.low %v1509_v15, %v1511_v41  ;;  %v1549_v63 = vpop.f32.mrb[4].mxu1  ;;  %1579 = sbr.rel (%p1724_p4) target bundleno = 637 (0x27d), region = 48 }
 0x277   : > { %v1550_v12 = vadd.f32 %v1549_v63, %v1361_v36  ;;  %v1551_v39 = vpop.f32.mrb[5].mxu1 }
 0x278   : > { %1574 = vst [vmem:[%s276_s16 + $0x10] sm:$0xff] %v1566_v49  ;;  %v1552_v28 = vadd.f32 %v1551_v39, %v1361_v36  ;;  %v1553_v52 = vpop.f32.mrb[6].mxu1 }
 0x279   : > { %v1554_v10 = vpop.f32.mrb[7].mxu1 }
 0x27a   : > { %v1567_v19 = vcombine.low %v1550_v12, %v1552_v28 }
 0x27c   : > { %1575 = vst [vmem:[%s276_s16 + $0x18] sm:$0xff] %v1567_v19 }
 0x27d PF: > { %v1583_v18 = vsel %vm372_vm0, %v1427_v5, 0.0  ;;  %v1584_v62 = vsel %vm372_vm0, %v1429_v14, 0.0  ;;  %v1586_v8 = vsel %vm372_vm0, %v1468_v59, 0.0  ;;  %v1588_v58 = vsel %vm372_vm0, %v1470_v37, 0.0 }
 0x27e   : > { %v1585_v11 = vadd.f32 %v1584_v62, %v1583_v18  ;;  %v1604_v34 = vmul.f32 %v1427_v5, %v1427_v5  ;;  %v1605_v38 = vmul.f32 %v1429_v14, %v1429_v14  ;;  %v1606_v54 = vmul.f32 %v1468_v59, %v1468_v59  ;;  %v1582_v14 = vld [vmem:[%s2642_s7] sm:$0xf] }
 0x27f   : > { %v1607_v61 = vmul.f32 %v1470_v37, %v1470_v37  ;;  %v1590_v31 = vsel %vm372_vm0, %v1509_v15, 0.0  ;;  %v1608_v44 = vmul.f32 %v1509_v15, %v1509_v15  ;;  %v1592_v4 = vsel %vm372_vm0, %v1511_v41, 0.0 }
 0x280   : > { %v1587_v55 = vadd.f32 %v1586_v8, %v1585_v11  ;;  %v1612_v46 = vsel %vm372_vm0, %v1604_v34, 0.0  ;;  %v1613_v29 = vsel %vm372_vm0, %v1605_v38, 0.0  ;;  %v1615_v3 = vsel %vm372_vm0, %v1606_v54, 0.0 }
 0x281   : > { %v1614_v32 = vadd.f32 %v1613_v29, %v1612_v46  ;;  %v1609_v22 = vmul.f32 %v1511_v41, %v1511_v41  ;;  %v1617_v24 = vsel %vm372_vm0, %v1607_v61, 0.0  ;;  %v1594_v23 = vsel %vm372_vm0, %v1550_v12, 0.0 }
 0x282   : > { %v1589_v60 = vadd.f32 %v1588_v58, %v1587_v55  ;;  %v1610_v42 = vmul.f32 %v1550_v12, %v1550_v12  ;;  %v1619_v27 = vsel %vm372_vm0, %v1608_v44, 0.0  ;;  %v1596_v30 = vsel %vm372_vm0, %v1552_v28, 0.0 }
 0x283   : > { %v1616_v53 = vadd.f32 %v1615_v3, %v1614_v32  ;;  %v1611_v16 = vmul.f32 %v1552_v28, %v1552_v28  ;;  %v1621_v0 = vsel %vm372_vm0, %v1609_v22, 0.0  ;;  %vm1601_vm2 = vcmask 3072  }
 0x284   : > { %v1591_v9 = vadd.f32 %v1590_v31, %v1589_v60  ;;  %v1623_v7 = vsel %vm372_vm0, %v1610_v42, 0.0  ;;  %vm1630_vm14 = vcmask 11272  }
 0x285   : > { %v1618_v21 = vadd.f32 %v1617_v24, %v1616_v53  ;;  %v1625_v13 = vsel %vm372_vm0, %v1611_v16, 0.0 }
 0x286   : > { %v1593_v47 = vadd.f32 %v1592_v4, %v1591_v9 }
 0x287   : > { %v1620_v35 = vadd.f32 %v1619_v27, %v1618_v21 }
 0x288   : > { %v1595_v50 = vadd.f32 %v1594_v23, %v1593_v47 }
 0x289   : > { %v1622_v36 = vadd.f32 %v1621_v0, %v1620_v35 }
 0x28a   : > { %v1597_v1 = vadd.f32 %v1596_v30, %v1595_v50 }
 0x28b   : > { %v1624_v5 = vadd.f32 %v1623_v7, %v1622_v36 }
 0x28c   : > { %1598 = vadd.xlane.f32.xlu0 %v1597_v1 }
 0x28d   : > { %v1626_v2 = vadd.f32 %v1625_v13, %v1624_v5 }
 0x290   : > { %1627 = vadd.xlane.f32.xlu0 %v1626_v2 }
 0x319   : > { %v1599_v20 = vpop.xlane.xlu0 %1598 }
 0x31a   : > { %v1600_v25 = vadd.f32 %v1599_v20, %v1582_v14 }
 0x31c   : > { %1602 = vst.msk [vmem:[%s2642_s7] sm:$0xf] %vm1601_vm2, %v1600_v25 }
 0x31d   : > { %v1628_v33 = vpop.xlane.xlu0 %1627 }
 0x323   : > { %v1603_v40 = vld [vmem:[%s2642_s7] sm:$0xf] }
 0x324   : > { %v1629_v59 = vadd.f32 %v1628_v33, %v1603_v40 }
 0x326   : > { %1631 = vst.msk [vmem:[%s2642_s7] sm:$0xf] %vm1630_vm14, %v1629_v59 }
 0x327 PF: > { %s18_s24 = sadd.s32 1, %s1756_s24  }
 0x328   : > { %p15_p5 = scmp.ge.s32.totalorder %s18_s24, 4  }
 0x32a   :  { %17 = sbr.rel (!%p15_p5) target bundleno = 1 (0x1), region = 93 }

// kernel: stack_decoder_forward.5
= control target key start
LH: loop header
LB: loop body
LE: loop exit
PB: predicated region body
PF: predicated region fallthrough
CT: control target
= control target key end

     0   :  { %s2793_s21 = smov 0   ;;  %s4351_s0 = inlined_call_operand.vmem [shape: f32[2,4,1024], index: 0, kind: input, shape index: {}]   ;;  %s4352_s1 = inlined_call_operand.vmem [shape: f32[2,4,1024], index: 1, kind: input, shape index: {}]   ;;  %s4353_s2 = inlined_call_operand.vmem [shape: f32[9,1024], index: 2, kind: input, shape index: {}]   ;;  %s4354_s3 = inlined_call_operand.vmem [shape: bf16[4,72], index: 3, kind: input, shape index: {}]   ;;  %s4355_s4 = inlined_call_operand.vmem [shape: f32[4,1], index: 4, kind: input, shape index: {}]   ;;  %s4356_s5 = inlined_call_operand.vmem [shape: f32[2,4,1024], index: 5, kind: output, shape index: {0}]   ;;  %s4357_s6 = inlined_call_operand.vmem [shape: f32[4,2], index: 6, kind: output, shape index: {1}]  }
   0x1 LB: > { %s2799_s22 = sadd.s32 4294967295, %s2745_s21   ;;  %p2670_p0 = scmp.ge.s32.totalorder %s2745_s21, 1  ;;  %s2745_s21 = sphi %s2793_s21, %s17_s21  }
   0x2   : > { %p220_p1 = scmp.lt.s32.totalorder %s2745_s21, 3 }
   0x4   : > { %p221_p2 = pnand %p2670_p0, %p220_p1 }
   0x6   : > { %224 = sbr.rel (%p221_p2) target bundleno = 922 (0x39a), region = 40 }
   0xd   : > { %v275_v0 = vld [vmem:[%s4353_s2] ss:$8 sm:$0xf]  ;;  %v279_v2 = vlaneseq  ;;  %v2677_v3 = vld [vmem:[%s4353_s2 + $0x1] ss:$8 sm:$0xf] }
   0xe   : > { %v276_v1 = vld [vmem:[%s4353_s2] ss:$8 sm:$0xf0]  ;;  %v2678_v6 = vld [vmem:[%s4353_s2 + $0x1] ss:$8 sm:$0xf0] }
   0xf   : > { %v2812_v4 = vor.u32 %v276_v1, %v275_v0  ;;  %v2814_v5 = vshrl.u32 %v279_v2, 7  ;;  %v2819_v7 = vor.u32 %v2678_v6, %v2677_v3  ;;  %v2679_v8 = vld [vmem:[%s4353_s2 + $0x2] ss:$8 sm:$0xf]  ;;  %s2747_s15 = smov 95   ;;  %s2748_s20 = smov 96  }
  0x10   : > { %v2680_v9 = vld [vmem:[%s4353_s2 + $0x2] ss:$8 sm:$0xf0]  ;;  %v2681_v30 = vld [vmem:[%s4353_s2 + $0x3] ss:$8 sm:$0xf] }
  0x11   : > { %v2828_v10 = vsub.s32 4, %v2814_v5  ;;  %v2831_v11 = vsub.s32 5, %v2814_v5  ;;  %v2834_v12 = vsub.s32 0, %v2814_v5  ;;  %v2837_v13 = vsub.s32 1, %v2814_v5  ;;  %p255_p3 = scmp.lt.s32.totalorder %s2799_s22, 1  ;;  %s2749_s18 = smov 97  }
  0x12   : > { %v2840_v14 = vsub.s32 2, %v2814_v5  ;;  %v2843_v15 = vsub.s32 3, %v2814_v5  ;;  %v2845_v16 = vor.u32 %v2680_v9, %v2679_v8  ;;  %v2682_v31 = vld [vmem:[%s4353_s2 + $0x3] ss:$8 sm:$0xf0]  ;;  %s2750_s29 = smov 127  }
  0x13   : > { %v298_v17 = vrot.slane %v2812_v4, %v2828_v10  ;;  %v302_v18 = vrot.slane %v2812_v4, %v2831_v11  ;;  %v282_v19 = vrot.slane %v2812_v4, %v2834_v12  ;;  %v286_v20 = vrot.slane %v2812_v4, %v2837_v13  ;;  %v2683_v35 = vld [vmem:[%s4353_s2 + $0x5] ss:$8 sm:$0xf]  ;;  %v2685_v52 = vld [vmem:[%s4353_s2 + $0x6] ss:$8 sm:$0xf] }
  0x14   : > { %v403_v21 = vrot.slane %v2819_v7, %v2834_v12  ;;  %v407_v22 = vrot.slane %v2819_v7, %v2837_v13  ;;  %v290_v23 = vrot.slane %v2812_v4, %v2840_v14  ;;  %v294_v24 = vrot.slane %v2812_v4, %v2843_v15  ;;  %v2684_v36 = vld [vmem:[%s4353_s2 + $0x5] ss:$8 sm:$0xf0]  ;;  %v2686_v53 = vld [vmem:[%s4353_s2 + $0x6] ss:$8 sm:$0xf0] }
  0x15   : > { %v313_v25 = vcombine.low %v298_v17, %v302_v18  ;;  %v311_v26 = vcombine.low %v282_v19, %v286_v20  ;;  %v419_v28 = vrot.slane %v2819_v7, %v2828_v10  ;;  %v423_v29 = vrot.slane %v2819_v7, %v2831_v11  ;;  %v2687_v61 = vld [vmem:[%s4353_s2 + $0x7] ss:$8 sm:$0xf]  ;;  %v2689_v0 = vld [vmem:[%s4353_s2 + $0x40] ss:$8 sm:$0xf] }
  0x16   : > { %v432_v27 = vcombine.low %v403_v21, %v407_v22  ;;  %v312_v32 = vcombine.low %v290_v23, %v294_v24  ;;  %v411_v33 = vrot.slane %v2819_v7, %v2840_v14  ;;  %v415_v34 = vrot.slane %v2819_v7, %v2843_v15  ;;  %v2688_v62 = vld [vmem:[%s4353_s2 + $0x7] ss:$8 sm:$0xf0]  ;;  %s256_s9 = scalar_select %p255_p3, %s2799_s22, 1 }
  0x17   : > { %319 = vrot.lane.b32.xlu1 %v313_v25, %s2747_s15  ;;  %315 = vrot.lane.b32.xlu0 %v311_v26, %s2747_s15  ;;  %v531_v37 = vrot.slane %v2845_v16, %v2840_v14  ;;  %v535_v38 = vrot.slane %v2845_v16, %v2843_v15  ;;  %v2889_v39 = vor.u32 %v2682_v31, %v2681_v30  ;;  %v2690_v3 = vld [vmem:[%s4353_s2 + $0x40] ss:$8 sm:$0xf0]  ;;  %s2751_s10 = smov 1   ;;  %s2752_s16 = smov 31   ;;  %vm327_vm0 = vcmask 1043456  }
  0x18   : > { %v434_v40 = vcombine.low %v419_v28, %v423_v29  ;;  %v2891_v41 = vor.u32 %v2684_v36, %v2683_v35  ;;  %v433_v42 = vcombine.low %v411_v33, %v415_v34  ;;  %v523_v43 = vrot.slane %v2845_v16, %v2834_v12  ;;  %v1251_v6 = vld [vmem:[%s4353_s2] ss:$8 sm:$0xf]  ;;  %s2959_s17 = sshll.u32 %s256_s9, 5  ;;  %s2753_s19 = smov 32  }
  0x19   : > { %v527_v44 = vrot.slane %v2845_v16, %v2837_v13  ;;  %v553_v45 = vcombine.low %v531_v37, %v535_v38  ;;  %v539_v46 = vrot.slane %v2845_v16, %v2828_v10  ;;  %v543_v47 = vrot.slane %v2845_v16, %v2831_v11  ;;  %v1252_v19 = vld [vmem:[%s4353_s2] ss:$8 sm:$0xf0]  ;;  %s2973_s24 = scalar_lea.vmem %s4351_s0, %s2959_s17  ;;  %v2691_v37 = vld [vmem:[%s4353_s2 + $0x1] ss:$8 sm:$0xf]  ;;  %s3226_s26 = scalar_lea.vmem %s4352_s1, %s2959_s17 }
  0x1a   : > { %v643_v48 = vrot.slane %v2889_v39, %v2834_v12  ;;  %v647_v49 = vrot.slane %v2889_v39, %v2837_v13  ;;  %v659_v50 = vrot.slane %v2889_v39, %v2828_v10  ;;  %v663_v51 = vrot.slane %v2889_v39, %v2831_v11  ;;  %v2987_v28 = vld [vmem:[%s2973_s24] sm:$0xff]  ;;  %s2754_s27 = smov 33   ;;  %s269_s30 = scalar_lea.vmem %s4356_s5, %s2959_s17 }
  0x1b   : > { %436 = vrot.lane.b32.xlu1 %v432_v27, %s2748_s20  ;;  %317 = vrot.lane.b32.xlu0 %v312_v32, %s2747_s15  ;;  %v651_v54 = vrot.slane %v2889_v39, %v2840_v14  ;;  %v655_v55 = vrot.slane %v2889_v39, %v2843_v15  ;;  %v791_v56 = vrot.slane %v2891_v41, %v2840_v14  ;;  %v2984_v27 = vld [vmem:[%s2973_s24 + $0x8] sm:$0xff]  ;;  %vm329_vm1 = vcmask 777216   ;;  %p2713_p4 = scmp.ne.s32.totalorder %s2799_s22, 0 }
  0x1c   : > { %v795_v57 = vrot.slane %v2891_v41, %v2843_v15  ;;  %v552_v58 = vcombine.low %v523_v43, %v527_v44  ;;  %v783_v59 = vrot.slane %v2891_v41, %v2834_v12  ;;  %v787_v60 = vrot.slane %v2891_v41, %v2837_v13  ;;  %769 = vst [vmem:[#allocation2 + $0x90] sm:$0xf] %v2984_v27  ;;  %v2692_v38 = vld [vmem:[%s4353_s2 + $0x1] ss:$8 sm:$0xf0] }
  0x1d   : > { %v2938_v63 = vor.u32 %v2686_v53, %v2685_v52  ;;  %v672_v1 = vcombine.low %v643_v48, %v647_v49  ;;  %v554_v2 = vcombine.low %v539_v46, %v543_v47  ;;  %v674_v8 = vcombine.low %v659_v50, %v663_v51  ;;  %767 = vst [vmem:[#allocation2 + $0x80] sm:$0xf] %v2987_v28  ;;  %v2693_v48 = vld [vmem:[%s4353_s2 + $0x2] ss:$8 sm:$0xf] }
  0x1e   : > { %v673_v9 = vcombine.low %v651_v54, %v655_v55  ;;  %v2952_v17 = vcombine.low %v791_v56, %v795_v57  ;;  %v2954_v18 = vor.u32 %v2688_v62, %v2687_v61  ;;  %v2963_v20 = vcombine.low %v783_v59, %v787_v60  ;;  %v2694_v53 = vld [vmem:[%s4353_s2 + $0x2] ss:$8 sm:$0xf0]  ;;  %v2695_v59 = vld [vmem:[%s4353_s2 + $0x3] ss:$8 sm:$0xf] }
  0x1f   : > { %440 = vrot.lane.b32.xlu1 %v434_v40, %s2748_s20  ;;  %438 = vrot.lane.b32.xlu0 %v433_v42, %s2748_s20  ;;  %v799_v21 = vrot.slane %v2891_v41, %v2828_v10  ;;  %v803_v22 = vrot.slane %v2891_v41, %v2831_v11  ;;  %v901_v23 = vrot.slane %v2938_v63, %v2834_v12  ;;  %v3042_v54 = vld [vmem:[%s2973_s24 + $0x10] sm:$0xff]  ;;  %vm449_vm2 = vcmask 785408  }
  0x20   : > { %v905_v24 = vrot.slane %v2938_v63, %v2837_v13  ;;  %v909_v25 = vrot.slane %v2938_v63, %v2840_v14  ;;  %v2981_v26 = vor.u32 %v2690_v3, %v2689_v0  ;;  %v913_v29 = vrot.slane %v2938_v63, %v2843_v15  ;;  %v2696_v60 = vld [vmem:[%s4353_s2 + $0x3] ss:$8 sm:$0xf0]  ;;  %771 = vst [vmem:[#allocation2 + $0xa0] sm:$0xf] %v3042_v54 }
  0x21   : > { %v917_v30 = vrot.slane %v2938_v63, %v2828_v10  ;;  %v921_v31 = vrot.slane %v2938_v63, %v2831_v11  ;;  %v2995_v32 = vor.u32 %v1252_v19, %v1251_v6  ;;  %v1019_v33 = vrot.slane %v2954_v18, %v2834_v12  ;;  %v2698_v19 = vld [vmem:[%s4353_s2 + $0x5] ss:$8 sm:$0xf0] }
  0x22   : > { %v1023_v34 = vrot.slane %v2954_v18, %v2837_v13  ;;  %v1035_v35 = vrot.slane %v2954_v18, %v2828_v10  ;;  %v1039_v36 = vrot.slane %v2954_v18, %v2831_v11  ;;  %v3015_v40 = vcombine.low %v799_v21, %v803_v22 }
  0x23   : > { %558 = vrot.lane.b32.xlu1 %v553_v45, %s2749_s18  ;;  %556 = vrot.lane.b32.xlu0 %v552_v58, %s2749_s18  ;;  %v1027_v42 = vrot.slane %v2954_v18, %v2840_v14  ;;  %v1031_v43 = vrot.slane %v2954_v18, %v2843_v15  ;;  %v1137_v44 = vrot.slane %v2981_v26, %v2834_v12  ;;  %vm569_vm3 = vcmask 793600  }
  0x24   : > { %v1141_v45 = vrot.slane %v2981_v26, %v2837_v13  ;;  %v1145_v46 = vrot.slane %v2981_v26, %v2840_v14  ;;  %v1149_v47 = vrot.slane %v2981_v26, %v2843_v15  ;;  %v930_v49 = vcombine.low %v901_v23, %v905_v24 }
  0x25   : > { %v1258_v50 = vrot.slane %v2995_v32, %v2834_v12  ;;  %v1262_v51 = vrot.slane %v2995_v32, %v2837_v13  ;;  %v3036_v52 = vor.u32 %v2692_v38, %v2691_v37  ;;  %v3044_v55 = vcombine.low %v1019_v33, %v1023_v34 }
  0x26   : > { %v3046_v56 = vcombine.low %v909_v25, %v913_v29  ;;  %v3048_v57 = vcombine.low %v1035_v35, %v1039_v36  ;;  %v3050_v58 = vcombine.low %v917_v30, %v921_v31  ;;  %v3061_v61 = vcombine.low %v1027_v42, %v1031_v43  ;;  %v2699_v25 = vld [vmem:[%s4353_s2 + $0x6] ss:$8 sm:$0xf]  ;;  %v2701_v35 = vld [vmem:[%s4353_s2 + $0x7] ss:$8 sm:$0xf] }
  0x27   : > { %676 = vrot.lane.b32.xlu1 %v672_v1, %s2750_s29  ;;  %560 = vrot.lane.b32.xlu0 %v554_v2, %s2749_s18  ;;  %v1274_v62 = vrot.slane %v2995_v32, %v2828_v10  ;;  %v1278_v0 = vrot.slane %v2995_v32, %v2831_v11  ;;  %v3068_v1 = vsub.s32 6, %v2814_v5  ;;  %v3070_v2 = vcombine.low %v1137_v44, %v1141_v45  ;;  %v2700_v29 = vld [vmem:[%s4353_s2 + $0x6] ss:$8 sm:$0xf0] }
  0x28   : > { %v3072_v3 = vcombine.low %v1145_v46, %v1149_v47  ;;  %v1266_v6 = vrot.slane %v2995_v32, %v2840_v14  ;;  %v3084_v21 = vcombine.low %v1258_v50, %v1262_v51  ;;  %v1270_v22 = vrot.slane %v2995_v32, %v2843_v15  ;;  %v2702_v36 = vld [vmem:[%s4353_s2 + $0x7] ss:$8 sm:$0xf0]  ;;  %v2703_v43 = vld [vmem:[%s4353_s2 + $0x40] ss:$8 sm:$0xf] }
  0x29   : > { %v3090_v24 = vor.u32 %v2696_v60, %v2695_v59  ;;  %v1387_v30 = vrot.slane %v3036_v52, %v2843_v15  ;;  %v1153_v33 = vrot.slane %v2981_v26, %v2828_v10  ;;  %v1157_v34 = vrot.slane %v2981_v26, %v2831_v11  ;;  %v2704_v44 = vld [vmem:[%s4353_s2 + $0x40] ss:$8 sm:$0xf0] }
  0x2a   : > { %v3116_v37 = vcombine.low %v1274_v62, %v1278_v0  ;;  %v3142_v51 = vor.u32 %v2700_v29, %v2699_v25  ;;  %v3146_v59 = vor.u32 %v2702_v36, %v2701_v35  ;;  %v3148_v60 = vor.u32 %v2704_v44, %v2703_v43 }
  0x2b   : > { %680 = vrot.lane.b32.xlu1 %v674_v8, %s2750_s29  ;;  %678 = vrot.lane.b32.xlu0 %v673_v9, %s2750_s29  ;;  %v3076_v8 = vor.u32 %v2694_v53, %v2693_v48  ;;  %v2697_v9 = vld [vmem:[%s4353_s2 + $0x5] ss:$8 sm:$0xf]  ;;  %v1609_v38 = vrot.slane %v3090_v24, %v2834_v12  ;;  %v1613_v42 = vrot.slane %v3090_v24, %v2837_v13  ;;  %vm689_vm4 = vcmask 1039360  }
  0x2c   : > { %v1629_v45 = vrot.slane %v3090_v24, %v2831_v11  ;;  %v1617_v46 = vrot.slane %v3090_v24, %v2840_v14  ;;  %v1621_v48 = vrot.slane %v3090_v24, %v2843_v15  ;;  %v3140_v50 = vor.u32 %v2698_v19, %v2697_v9 }
  0x2d   : > { %v3136_v47 = vcombine.low %v1609_v38, %v1613_v42  ;;  %v427_v62 = vrot.slane %v2819_v7, %v3068_v1  ;;  %v1867_v35 = vrot.slane %v3142_v51, %v2837_v13  ;;  %v1879_v44 = vrot.slane %v3142_v51, %v2828_v10 }
  0x2e   : > { %v3155_v0 = vcombine.low %v1617_v46, %v1621_v48  ;;  %v1754_v9 = vrot.slane %v3140_v50, %v2840_v14  ;;  %v1758_v19 = vrot.slane %v3140_v50, %v2843_v15  ;;  %v1746_v25 = vrot.slane %v3140_v50, %v2834_v12 }
  0x2f   : > { %818 = vrot.lane.b32.xlu1 %v2952_v17, %s2751_s10  ;;  %816 = vrot.lane.b32.xlu0 %v2963_v20, %s2751_s10  ;;  %v3128_v17 = vcombine.low %v1153_v33, %v1157_v34  ;;  %v1625_v20 = vrot.slane %v3090_v24, %v2828_v10  ;;  %v1750_v29 = vrot.slane %v3140_v50, %v2837_v13  ;;  %v3196_v48 = vsub.s32 7, %v2814_v5 }
  0x30   : > { %v3169_v33 = vcombine.low %v1754_v9, %v1758_v19  ;;  %v1863_v34 = vrot.slane %v3142_v51, %v2834_v12  ;;  %v1762_v36 = vrot.slane %v3140_v50, %v2828_v10  ;;  %v1766_v43 = vrot.slane %v3140_v50, %v2831_v11 }
  0x31   : > { %v3144_v53 = vcombine.low %v1625_v20, %v1629_v45  ;;  %v3177_v38 = vcombine.low %v1746_v25, %v1750_v29  ;;  %v1883_v45 = vrot.slane %v3142_v51, %v2831_v11  ;;  %v1988_v46 = vrot.slane %v3146_v59, %v2840_v14 }
  0x32   : > { %v3189_v20 = vcombine.low %v1863_v34, %v1867_v35  ;;  %v3198_v9 = vcombine.low %v1762_v36, %v1766_v43  ;;  %v1984_v19 = vrot.slane %v3146_v59, %v2837_v13  ;;  %v2105_v29 = vrot.slane %v3148_v60, %v2840_v14 }
  0x33   : > { %934 = vrot.lane.b32.xlu1 %v930_v49, %s2752_s16  ;;  %820 = vrot.lane.b32.xlu0 %v3015_v40, %s2751_s10  ;;  %v1871_v49 = vrot.slane %v3142_v51, %v2840_v14  ;;  %v1875_v40 = vrot.slane %v3142_v51, %v2843_v15  ;;  %v3206_v25 = vcombine.low %v1879_v44, %v1883_v45  ;;  %vm728_vm5 = vcmask 7168  }
  0x34   : > { %v2109_v5 = vrot.slane %v3148_v60, %v2843_v15  ;;  %v2101_v35 = vrot.slane %v3148_v60, %v2837_v13  ;;  %v1996_v36 = vrot.slane %v3146_v59, %v2828_v10  ;;  %v2000_v44 = vrot.slane %v3146_v59, %v2831_v11 }
  0x35   : > { %v3179_v42 = vcombine.low %v1871_v49, %v1875_v40  ;;  %v2097_v49 = vrot.slane %v3148_v60, %v2834_v12  ;;  %v2113_v45 = vrot.slane %v3148_v60, %v2828_v10  ;;  %v547_v23 = vrot.slane %v2845_v16, %v3068_v1 }
  0x36   : > { %v3232_v43 = vcombine.low %v2105_v29, %v2109_v5  ;;  %v310_v29 = vrot.slane %v2812_v4, %v3196_v48  ;;  %v667_v5 = vrot.slane %v2889_v39, %v3068_v1  ;;  %vm608_vm6 = vcmask 252928  }
  0x37   : > { %1052 = vrot.lane.b32.xlu1 %v3044_v55, %s2753_s19  ;;  %936 = vrot.lane.b32.xlu0 %v3046_v56, %s2752_s16  ;;  %v1992_v55 = vrot.slane %v3146_v59, %v2843_v15  ;;  %v1980_v56 = vrot.slane %v3146_v59, %v2834_v12  ;;  %vm488_vm7 = vcmask 261120   ;;  %vm368_vm8 = vcmask 269312  }
  0x38   : > { %vm384_vm9 = vcmask 1043720   ;;  %vm393_vm10 = vcmask 265216   ;;  %vm504_vm11 = vcmask 1047812   ;;  %vm513_vm12 = vcmask 261124  }
  0x39   : > { %v3214_v40 = vcombine.low %v1988_v46, %v1992_v55  ;;  %v3216_v34 = vcombine.low %v1980_v56, %v1984_v19  ;;  %v3239_v46 = vld [vmem:[%s3226_s26 + $0x8] sm:$0xff]  ;;  %v3241_v55 = vcombine.low %v2097_v49, %v2101_v35  ;;  %v2117_v56 = vrot.slane %v3148_v60, %v2831_v11  ;;  %v3259_v35 = vld [vmem:[%s3226_s26] sm:$0xff] }
  0x3a   : > { %1734 = vst [vmem:[#allocation2 + $0x198] sm:$0xf0] %v3239_v46  ;;  %v3250_v19 = vcombine.low %v1996_v36, %v2000_v44  ;;  %v671_v49 = vrot.slane %v2889_v39, %v3196_v48  ;;  %v551_v36 = vrot.slane %v2845_v16, %v3196_v48  ;;  %1732 = vst [vmem:[#allocation2 + $0x188] sm:$0xf0] %v3259_v35  ;;  %vm624_vm13 = vcmask 1043704  }
  0x3b   : > { %1056 = vrot.lane.b32.xlu1 %v3048_v57, %s2753_s19  ;;  %1054 = vrot.lane.b32.xlu0 %v3061_v61, %s2753_s19  ;;  %v431_v57 = vrot.slane %v2819_v7, %v3196_v48  ;;  %v306_v61 = vrot.slane %v2812_v4, %v3068_v1  ;;  %v3261_v31 = vcombine.low %v2113_v45, %v2117_v56  ;;  %vm633_vm14 = vcmask 248832  }
  0x3c   : > { %v3276_v39 = vcombine.low %v667_v5, %v671_v49  ;;  %v3280_v44 = vcombine.low %v547_v23, %v551_v36  ;;  %v929_v16 = vrot.slane %v2938_v63, %v3196_v48  ;;  %v807_v45 = vrot.slane %v2891_v41, %v3068_v1 }
  0x3d   : > { %v3263_v7 = vcombine.low %v427_v62, %v431_v57  ;;  %v3274_v4 = vcombine.low %v306_v61, %v310_v29  ;;  %v925_v62 = vrot.slane %v2938_v63, %v3068_v1  ;;  %v1165_v56 = vrot.slane %v2981_v26, %v3196_v48 }
  0x3e   : > { %v1043_v57 = vrot.slane %v2954_v18, %v3068_v1  ;;  %v1047_v23 = vrot.slane %v2954_v18, %v3196_v48  ;;  %v1288_v63 = vcombine.low %v1266_v6, %v1270_v22  ;;  %v1282_v5 = vrot.slane %v2995_v32, %v3068_v1 }
  0x3f   : > { %1170 = vrot.lane.b32.xlu1 %v3070_v2, %s2754_s27  ;;  %938 = vrot.lane.b32.xlu0 %v3050_v58, %s2752_s16  ;;  %v811_v2 = vrot.slane %v2891_v41, %v3196_v48  ;;  %v1161_v58 = vrot.slane %v2981_v26, %v3068_v1  ;;  %v1379_v41 = vrot.slane %v3036_v52, %v2837_v13  ;;  %vm744_vm15 = vcmask 1047564  }
  0x40   : > { %v933_v61 = vcombine.low %v925_v62, %v929_v16  ;;  %v1051_v18 = vcombine.low %v1043_v57, %v1047_v23  ;;  %v1286_v49 = vrot.slane %v2995_v32, %v3196_v48  ;;  %v4379_v6 = vrot.slane %v3036_v52, %v2840_v14 }
  0x41   : > { %v815_v29 = vcombine.low %v807_v45, %v811_v2  ;;  %v1169_v26 = vcombine.low %v1161_v58, %v1165_v56  ;;  %v4380_v32 = vrot.slane %v3036_v52, %v2834_v12  ;;  %v1391_v16 = vrot.slane %v3036_v52, %v2828_v10 }
  0x42   : > { %v1405_v22 = vcombine.low %v4379_v6, %v1387_v30  ;;  %v1290_v36 = vcombine.low %v1282_v5, %v1286_v49  ;;  %v1395_v30 = vrot.slane %v3036_v52, %v2831_v11  ;;  %v1512_v2 = vrot.slane %v3076_v8, %v2831_v11  ;;  %v3355_v11 = vld [vmem:[%s3226_s26 + $0x10] sm:$0xff] }
  0x43   : > { %1291 = vrot.lane.b32.xlu1 %v3084_v21, %s2747_s15  ;;  %1172 = vrot.lane.b32.xlu0 %v3072_v3, %s2754_s27  ;;  %v1492_v21 = vrot.slane %v3076_v8, %v2834_v12  ;;  %v1496_v3 = vrot.slane %v3076_v8, %v2837_v13  ;;  %v1404_v62 = vcombine.low %v4380_v32, %v1379_v41 }
  0x44   : > { %v1508_v13 = vrot.slane %v3076_v8, %v2828_v10  ;;  %v1406_v12 = vcombine.low %v1391_v16, %v1395_v30  ;;  %v1504_v58 = vrot.slane %v3076_v8, %v2843_v15  ;;  %1736 = vst [vmem:[#allocation2 + $0x1a8] sm:$0xf0] %v3355_v11  ;;  %v3395_v15 = vld [vmem:[%s3226_s26 + $0x18] sm:$0xff] }
  0x45   : > { %v1521_v45 = vcombine.low %v1492_v21, %v1496_v3  ;;  %1738 = vst [vmem:[#allocation2 + $0x1b8] sm:$0xf0] %v3395_v15 }
  0x46   : > { %v1523_v10 = vcombine.low %v1508_v13, %v1512_v2 }
  0x47   : > { %1295 = vrot.lane.b32.xlu1 %v3116_v37, %s2747_s15  ;;  %1293 = vrot.lane.b32.xlu0 %v1288_v63, %s2747_s15  ;;  %v1500_v37 = vrot.slane %v3076_v8, %v2840_v14  ;;  %v3375_v14 = vld [vmem:[%s2973_s24 + $0x18] sm:$0xff] }
  0x48   : > { %773 = vst [vmem:[#allocation2 + $0xb0] sm:$0xf] %v3375_v14 }
  0x49   : > { %v1522_v56 = vcombine.low %v1500_v37, %v1504_v58 }
  0x4b   : > { %1410 = vrot.lane.b32.xlu1 %v1405_v22, %s2748_s20  ;;  %1408 = vrot.lane.b32.xlu0 %v1404_v62, %s2748_s20 }
  0x4f   : > { %1525 = vrot.lane.b32.xlu1 %v1521_v45, %s2749_s18  ;;  %1412 = vrot.lane.b32.xlu0 %v1406_v12, %s2748_s20 }
  0x53   : > { %1529 = vrot.lane.b32.xlu1 %v1523_v10, %s2749_s18  ;;  %1527 = vrot.lane.b32.xlu0 %v1522_v56, %s2749_s18 }
  0x57   : > { %1642 = vrot.lane.b32.xlu1 %v3136_v47, %s2750_s29  ;;  %1174 = vrot.lane.b32.xlu0 %v3128_v17, %s2754_s27  ;;  %v1399_v17 = vrot.slane %v3036_v52, %v3068_v1 }
  0x5b   : > { %1646 = vrot.lane.b32.xlu1 %v3144_v53, %s2750_s29  ;;  %1644 = vrot.lane.b32.xlu0 %v3155_v0, %s2750_s29  ;;  %v1633_v53 = vrot.slane %v3090_v24, %v3068_v1  ;;  %v1637_v0 = vrot.slane %v3090_v24, %v3196_v48 }
  0x5d   : > { %v1641_v24 = vcombine.low %v1633_v53, %v1637_v0 }
  0x5f   : > { %1781 = vrot.lane.b32.xlu1 %v3169_v33, %s2751_s10  ;;  %1779 = vrot.lane.b32.xlu0 %v3177_v38, %s2751_s10  ;;  %v1516_v33 = vrot.slane %v3076_v8, %v3068_v1  ;;  %v1887_v38 = vrot.slane %v3142_v51, %v3068_v1 }
  0x63   : > { %1898 = vrot.lane.b32.xlu1 %v3179_v42, %s2752_s16  ;;  %1896 = vrot.lane.b32.xlu0 %v3189_v20, %s2752_s16  ;;  %v1891_v42 = vrot.slane %v3142_v51, %v3196_v48  ;;  %v1770_v20 = vrot.slane %v3140_v50, %v3068_v1  ;;  %v2121_v51 = vrot.slane %v3148_v60, %v3068_v1 }
  0x67   : > { %1783 = vrot.lane.b32.xlu1 %v3198_v9, %s2751_s10  ;;  %1900 = vrot.lane.b32.xlu0 %v3206_v25, %s2752_s16  ;;  %v1774_v9 = vrot.slane %v3140_v50, %v3196_v48  ;;  %v2125_v50 = vrot.slane %v3148_v60, %v3196_v48 }
  0x69   : > { %v2129_v23 = vcombine.low %v2121_v51, %v2125_v50 }
  0x6b   : > { %2015 = vrot.lane.b32.xlu1 %v3214_v40, %s2753_s19  ;;  %2013 = vrot.lane.b32.xlu0 %v3216_v34, %s2753_s19  ;;  %v1895_v34 = vcombine.low %v1887_v38, %v1891_v42 }
  0x6f   : > { %2132 = vrot.lane.b32.xlu1 %v3232_v43, %s2754_s27  ;;  %2130 = vrot.lane.b32.xlu0 %v3241_v55, %s2754_s27  ;;  %v1778_v43 = vcombine.low %v1770_v20, %v1774_v9  ;;  %v2004_v55 = vrot.slane %v3146_v59, %v3068_v1 }
  0x73   : > { %2017 = vrot.lane.b32.xlu1 %v3250_v19, %s2753_s19  ;;  %2134 = vrot.lane.b32.xlu0 %v3261_v31, %s2754_s27  ;;  %v1403_v31 = vrot.slane %v3036_v52, %v3196_v48  ;;  %v1520_v52 = vrot.slane %v3076_v8, %v3196_v48  ;;  %v2008_v19 = vrot.slane %v3146_v59, %v3196_v48 }
  0x75   : > { %v1407_v47 = vcombine.low %v1399_v17, %v1403_v31  ;;  %v1524_v25 = vcombine.low %v1516_v33, %v1520_v52  ;;  %v2012_v60 = vcombine.low %v2004_v55, %v2008_v19 }
  0x77   : > { %442 = vrot.lane.b32.xlu1 %v3263_v7, %s2748_s20  ;;  %321 = vrot.lane.b32.xlu0 %v3274_v4, %s2747_s15 }
  0x7b   : > { %682 = vrot.lane.b32.xlu1 %v3276_v39, %s2750_s29  ;;  %562 = vrot.lane.b32.xlu0 %v3280_v44, %s2749_s18 }
  0x7f   : > { %940 = vrot.lane.b32.xlu1 %v933_v61, %s2752_s16  ;;  %822 = vrot.lane.b32.xlu0 %v815_v29, %s2751_s10 }
  0x83   : > { %1176 = vrot.lane.b32.xlu1 %v1169_v26, %s2754_s27  ;;  %1058 = vrot.lane.b32.xlu0 %v1051_v18, %s2753_s19 }
  0x87   : > { %1414 = vrot.lane.b32.xlu1 %v1407_v47, %s2748_s20  ;;  %1297 = vrot.lane.b32.xlu0 %v1290_v36, %s2747_s15 }
  0x89   : > { %v3424_v40 = vpop.permute.xlu1 %319  ;;  %v316_v8 = vpop.permute.xlu0 %315 }
  0x8a   : > { %v4371_v39 = vrot.slane %v3424_v40, 4  ;;  %v323_v44 = vrot.slane %v316_v8, 4 }
  0x8b   : > { %1648 = vrot.lane.b32.xlu1 %v1641_v24, %s2750_s29  ;;  %1531 = vrot.lane.b32.xlu0 %v1524_v25, %s2749_s18 }
  0x8d   : > { %v437_v7 = vpop.permute.xlu1 %436  ;;  %v318_v4 = vpop.permute.xlu0 %317 }
  0x8e   : > { %v324_v57 = vrot.slane %v318_v4, 4  ;;  %v444_v61 = vrot.slane %v437_v7, 4 }
  0x8f   : > { %1902 = vrot.lane.b32.xlu1 %v1895_v34, %s2752_s16  ;;  %1785 = vrot.lane.b32.xlu0 %v1778_v43, %s2751_s10 }
  0x90   : > { %v331_v1 = vsel %vm327_vm0, %v324_v57, %v4371_v39  ;;  %v328_v59 = vsel %vm327_vm0, %v323_v44, %v324_v57 }
  0x91   : > { %v3443_v48 = vpop.permute.xlu1 %440  ;;  %v439_v63 = vpop.permute.xlu0 %438  ;;  %v330_v41 = vsel %vm329_vm1, %v316_v8, %v328_v59  ;;  %v332_v29 = vsel %vm329_vm1, %v318_v4, %v331_v1 }
  0x92   : > { %v445_v26 = vrot.slane %v439_v63, 4  ;;  %v340_v18 = vmul.f32 %v330_v41, %v2987_v28  ;;  %v4370_v5 = vrot.slane %v3443_v48, 4  ;;  %v341_v3 = vmul.f32 %v332_v29, %v2984_v27 }
  0x93   : > { %2136 = vrot.lane.b32.xlu1 %v2129_v23, %s2754_s27  ;;  %2019 = vrot.lane.b32.xlu0 %v2012_v60, %s2753_s19 }
  0x94   : > { %v448_v49 = vsel %vm327_vm0, %v444_v61, %v445_v26  ;;  %v348_v6 = vcombine.high %v340_v18, %v340_v18  ;;  %v451_v32 = vsel %vm327_vm0, %v445_v26, %v4370_v5  ;;  %v349_v13 = vcombine.high %v341_v3, %v341_v3 }
  0x95   : > { %v559_v22 = vpop.permute.xlu1 %558  ;;  %v557_v21 = vpop.permute.xlu0 %556  ;;  %v450_v36 = vsel %vm449_vm2, %v437_v7, %v448_v49  ;;  %v452_v12 = vsel %vm449_vm2, %v439_v63, %v451_v32  ;;  %v759_v63 = vcombine.high %v2987_v28, %v2987_v28 }
  0x96   : > { %v565_v62 = vrot.slane %v559_v22, 4  ;;  %v564_v16 = vrot.slane %v557_v21, 4  ;;  %v460_v2 = vmul.f32 %v450_v36, %v2987_v28  ;;  %v461_v10 = vmul.f32 %v452_v12, %v2984_v27 }
  0x97   : > { %352 = vrot.lane.b32.xlu0 %v340_v18, %s2754_s27  ;;  %354 = vrot.lane.b32.xlu1 %v348_v6, %s2754_s27  ;;  %768 = vst [vmem:[#allocation2 + $0x88] sm:$0xf] %v759_v63  ;;  %v760_v6 = vcombine.high %v2984_v27, %v2984_v27 }
  0x98   : > { %v568_v37 = vsel %vm327_vm0, %v564_v16, %v565_v62  ;;  %v468_v31 = vcombine.low %v460_v2, %v460_v2  ;;  %v469_v42 = vcombine.low %v461_v10, %v461_v10 }
  0x99   : > { %v677_v30 = vpop.permute.xlu1 %676  ;;  %v3459_v45 = vpop.permute.xlu0 %560  ;;  %v570_v47 = vsel %vm569_vm3, %v557_v21, %v568_v37  ;;  %770 = vst [vmem:[#allocation2 + $0x98] sm:$0xf] %v760_v6 }
  0x9a   : > { %v4369_v58 = vrot.slane %v3459_v45, 4  ;;  %v684_v33 = vrot.slane %v677_v30, 4  ;;  %v580_v20 = vmul.f32 %v570_v47, %v2987_v28 }
  0x9b   : > { %356 = vrot.lane.b32.xlu0 %v341_v3, %s2754_s27  ;;  %358 = vrot.lane.b32.xlu1 %v349_v13, %s2754_s27 }
  0x9c   : > { %v571_v0 = vsel %vm327_vm0, %v565_v62, %v4369_v58  ;;  %v588_v43 = vcombine.high %v580_v20, %v580_v20  ;;  %v4374_v58 = vmov 0.0  }
  0x9d   : > { %v3468_v56 = vpop.permute.xlu1 %680  ;;  %v679_v17 = vpop.permute.xlu0 %678  ;;  %v572_v9 = vsel %vm569_vm3, %v559_v22, %v571_v0 }
  0x9e   : > { %v685_v53 = vrot.slane %v679_v17, 4  ;;  %v4368_v24 = vrot.slane %v3468_v56, 4  ;;  %v581_v51 = vmul.f32 %v572_v9, %v2984_v27 }
  0x9f   : > { %472 = vrot.lane.b32.xlu0 %v468_v31, %s2753_s19  ;;  %474 = vrot.lane.b32.xlu1 %v460_v2, %s2753_s19 }
  0xa0   : > { %v688_v25 = vsel %vm327_vm0, %v684_v33, %v685_v53  ;;  %v691_v55 = vsel %vm327_vm0, %v685_v53, %v4368_v24  ;;  %v589_v57 = vcombine.high %v581_v51, %v581_v51 }
  0xa1   : > { %v819_v52 = vpop.permute.xlu1 %818  ;;  %v817_v38 = vpop.permute.xlu0 %816  ;;  %v690_v50 = vsel %vm689_vm4, %v677_v30, %v688_v25  ;;  %v692_v60 = vsel %vm689_vm4, %v679_v17, %v691_v55 }
  0xa2   : > { %v825_v19 = vrot.slane %v819_v52, 4  ;;  %v824_v7 = vrot.slane %v817_v38, 4  ;;  %v700_v23 = vmul.f32 %v690_v50, %v2987_v28  ;;  %v701_v41 = vmul.f32 %v692_v60, %v2984_v27 }
  0xa3   : > { %476 = vrot.lane.b32.xlu0 %v469_v42, %s2753_s19  ;;  %478 = vrot.lane.b32.xlu1 %v461_v10, %s2753_s19 }
  0xa4   : > { %v829_v1 = vsel %vm327_vm0, %v824_v7, %v825_v19  ;;  %v708_v26 = vcombine.low %v700_v23, %v700_v23  ;;  %v709_v3 = vcombine.low %v701_v41, %v701_v41  ;;  %v828_v32 = vsel %vm728_vm5, %v824_v7, %v817_v38 }
  0xa5   : > { %v935_v8 = vpop.permute.xlu1 %934  ;;  %v3482_v34 = vpop.permute.xlu0 %820  ;;  %v830_v18 = vsel %vm728_vm5, %v829_v1, %v819_v52  ;;  %v3530_v37 = vmul.f32 %v828_v32, %v2987_v28 }
  0xa6   : > { %v4367_v59 = vrot.slane %v3482_v34, 4  ;;  %v840_v36 = vmul.f32 %v830_v18, %v2984_v27  ;;  %v942_v62 = vrot.slane %v935_v8, 4 }
  0xa7   : > { %592 = vrot.lane.b32.xlu0 %v580_v20, %s2752_s16  ;;  %594 = vrot.lane.b32.xlu1 %v588_v43, %s2752_s16 }
  0xa8   : > { %v831_v49 = vsel %vm327_vm0, %v825_v19, %v4367_v59  ;;  %v848_v10 = vcombine.low %v840_v36, %v840_v36  ;;  %v946_v17 = vsel %vm608_vm6, %v942_v62, %v935_v8 }
  0xa9   : > { %v3491_v4 = vpop.permute.xlu1 %1052  ;;  %v937_v44 = vpop.permute.xlu0 %936  ;;  %v832_v16 = vsel %vm728_vm5, %v831_v49, %v3482_v34  ;;  %v957_v0 = vmul.f32 %v946_v17, %v2987_v28 }
  0xaa   : > { %v943_v30 = vrot.slane %v937_v44, 4  ;;  %v3523_v13 = vmul.f32 %v832_v16, %v3042_v54  ;;  %v1060_v33 = vrot.slane %v3491_v4, 4 }
  0xab   : > { %596 = vrot.lane.b32.xlu0 %v581_v51, %s2752_s16  ;;  %598 = vrot.lane.b32.xlu1 %v589_v57, %s2752_s16  ;;  %v965_v50 = vcombine.high %v957_v0, %v957_v0 }
  0xac   : > { %v947_v31 = vsel %vm327_vm0, %v942_v62, %v943_v30  ;;  %v849_v42 = vcombine.low %v3523_v13, %v3523_v13 }
  0xad   : > { %v3502_v61 = vpop.permute.xlu1 %1056  ;;  %v1055_v29 = vpop.permute.xlu0 %1054  ;;  %v948_v20 = vsel %vm608_vm6, %v947_v31, %v937_v44 }
  0xae   : > { %v1061_v47 = vrot.slane %v1055_v29, 4  ;;  %v4363_v9 = vrot.slane %v3502_v61, 4  ;;  %v958_v55 = vmul.f32 %v948_v20, %v2984_v27 }
  0xaf   : > { %712 = vrot.lane.b32.xlu0 %v708_v26, %s2751_s10  ;;  %714 = vrot.lane.b32.xlu1 %v700_v23, %s2751_s10 }
  0xb0   : > { %v1065_v25 = vsel %vm327_vm0, %v1060_v33, %v1061_v47  ;;  %v1067_v44 = vsel %vm327_vm0, %v1061_v47, %v4363_v9  ;;  %v966_v1 = vcombine.high %v958_v55, %v958_v55 }
  0xb1   : > { %v3512_v22 = vpop.permute.xlu1 %1170  ;;  %v3514_v21 = vpop.permute.xlu0 %938  ;;  %v1066_v19 = vsel %vm488_vm7, %v1065_v25, %v1055_v29  ;;  %v1068_v29 = vsel %vm488_vm7, %v1067_v44, %v3502_v61 }
  0xb2   : > { %v4365_v53 = vrot.slane %v3514_v21, 4  ;;  %v1076_v57 = vmul.f32 %v1066_v19, %v2984_v27 }
  0xb3   : > { %716 = vrot.lane.b32.xlu0 %v709_v3, %s2751_s10  ;;  %718 = vrot.lane.b32.xlu1 %v701_v41, %s2751_s10  ;;  %v1064_v41 = vsel %vm488_vm7, %v1060_v33, %v3491_v4  ;;  %v3588_v3 = vmul.f32 %v1068_v29, %v3042_v54  ;;  %v1178_v4 = vrot.slane %v3512_v22, 4 }
  0xb4   : > { %v949_v8 = vsel %vm327_vm0, %v943_v30, %v4365_v53  ;;  %v1075_v49 = vmul.f32 %v1064_v41, %v2987_v28  ;;  %v1084_v6 = vcombine.low %v1076_v57, %v1076_v57 }
  0xb5   : > { %v3525_v2 = vpop.permute.xlu1 %1291  ;;  %v3527_v12 = vpop.permute.xlu0 %1172  ;;  %v950_v7 = vsel %vm608_vm6, %v949_v8, %v3514_v21  ;;  %v1085_v16 = vcombine.low %v3588_v3, %v3588_v3  ;;  %v1182_v30 = vsel %vm368_vm8, %v1178_v4, %v3512_v22  ;;  %v847_v22 = vcombine.low %v3530_v37, %v3530_v37 }
  0xb6   : > { %v3573_v63 = vmul.f32 %v950_v7, %v3042_v54  ;;  %v3607_v31 = vmul.f32 %v1182_v30, %v2987_v28  ;;  %v1299_v47 = vrot.slane %v3525_v2, 4  ;;  %v1083_v19 = vcombine.low %v1075_v49, %v1075_v49 }
  0xb7   : > { %853 = vrot.lane.b32.xlu0 %v3530_v37, %s2750_s29  ;;  %855 = vrot.lane.b32.xlu1 %v848_v10, %s2750_s29 }
  0xb8   : > { %v1201_v37 = vcombine.high %v3607_v31, %v3607_v31 }
  0xb9   : > { %v3540_v52 = vpop.permute.xlu1 %1295  ;;  %v3542_v38 = vpop.permute.xlu0 %1293 }
  0xba   : > { %v1300_v17 = vrot.slane %v3542_v38, 4  ;;  %v4361_v25 = vrot.slane %v3540_v52, 4 }
  0xbb   : > { %857 = vrot.lane.b32.xlu0 %v840_v36, %s2750_s29  ;;  %859 = vrot.lane.b32.xlu1 %v849_v42, %s2750_s29  ;;  %v1179_v36 = vrot.slane %v3527_v12, 4 }
  0xbc   : > { %v1303_v8 = vsel %vm327_vm0, %v1299_v47, %v1300_v17  ;;  %v1305_v44 = vsel %vm327_vm0, %v1300_v17, %v4361_v25 }
  0xbd   : > { %v3554_v43 = vpop.permute.xlu1 %1410  ;;  %v3556_v51 = vpop.permute.xlu0 %1408  ;;  %v1183_v10 = vsel %vm327_vm0, %v1178_v4, %v1179_v36  ;;  %v1304_v7 = vsel %vm329_vm1, %v3525_v2, %v1303_v8  ;;  %v1306_v2 = vsel %vm329_vm1, %v3542_v38, %v1305_v44 }
  0xbe   : > { %v1184_v20 = vsel %vm368_vm8, %v1183_v10, %v3527_v12  ;;  %v1314_v41 = vmul.f32 %v1304_v7, %v3259_v35  ;;  %v1315_v4 = vmul.f32 %v1306_v2, %v3239_v46 }
  0xbf   : > { %971 = vrot.lane.b32.xlu0 %v965_v50, %s2749_s18  ;;  %973 = vrot.lane.b32.xlu1 %v958_v55, %s2749_s18  ;;  %v1194_v12 = vmul.f32 %v1184_v20, %v2984_v27 }
  0xc0   : > { %v1322_v38 = vcombine.low %v1314_v41, %v1314_v41 }
  0xc1   : > { %v3568_v23 = vpop.permute.xlu1 %1525  ;;  %v3570_v60 = vpop.permute.xlu0 %1412  ;;  %v1202_v27 = vcombine.high %v1194_v12, %v1194_v12 }
  0xc2   : > { %v4360_v17 = vrot.slane %v3570_v60, 4  ;;  %v1533_v20 = vrot.slane %v3568_v23, 4 }
  0xc3   : > { %975 = vrot.lane.b32.xlu0 %v966_v1, %s2749_s18  ;;  %977 = vrot.lane.b32.xlu1 %v3573_v63, %s2749_s18 }
  0xc5   : > { %v3582_v26 = vpop.permute.xlu1 %1529  ;;  %v3584_v18 = vpop.permute.xlu0 %1527 }
  0xc6   : > { %v1534_v47 = vrot.slane %v3584_v18, 4  ;;  %v4358_v7 = vrot.slane %v3582_v26, 4 }
  0xc7   : > { %1089 = vrot.lane.b32.xlu0 %v1075_v49, %s2748_s20  ;;  %1091 = vrot.lane.b32.xlu1 %v1084_v6, %s2748_s20  ;;  %v1417_v49 = vrot.slane %v3554_v43, 4  ;;  %v1416_v6 = vrot.slane %v3556_v51, 4 }
  0xc8   : > { %v1537_v44 = vsel %vm327_vm0, %v1533_v20, %v1534_v47 }
  0xc9   : > { %v3594_v32 = vpop.permute.xlu1 %1642  ;;  %v3596_v62 = vpop.permute.xlu0 %1174  ;;  %v1420_v10 = vsel %vm327_vm0, %v1416_v6, %v1417_v49 }
  0xca   : > { %v4362_v50 = vrot.slane %v3596_v62, 4 }
  0xcb   : > { %1093 = vrot.lane.b32.xlu0 %v1076_v57, %s2748_s20  ;;  %1095 = vrot.lane.b32.xlu1 %v1085_v16, %s2748_s20 }
  0xcd   : > { %v3610_v33 = vpop.permute.xlu1 %1646  ;;  %v3612_v42 = vpop.permute.xlu0 %1644 }
  0xcf   : > { %851 = vrot.lane.b32.xlu0 %v847_v22, %s2750_s29  ;;  %969 = vrot.lane.b32.xlu1 %v957_v0, %s2749_s18  ;;  %v1185_v0 = vsel %vm327_vm0, %v1179_v36, %v4362_v50  ;;  %v1323_v22 = vcombine.low %v1315_v4, %v1315_v4 }
  0xd0   : > { %v1186_v29 = vsel %vm368_vm8, %v1185_v0, %v3596_v62 }
  0xd1   : > { %v3623_v28 = vpop.permute.xlu1 %1781  ;;  %v3625_v55 = vpop.permute.xlu0 %1779  ;;  %v3655_v36 = vmul.f32 %v1186_v29, %v3042_v54 }
  0xd3   : > { %1087 = vrot.lane.b32.xlu0 %v1083_v19, %s2748_s20  ;;  %1207 = vrot.lane.b32.xlu1 %v1201_v37, %s2747_s15  ;;  %v1421_v37 = vsel %vm449_vm2, %v3556_v51, %v1420_v10  ;;  %v1538_v51 = vsel %vm569_vm3, %v3568_v23, %v1537_v44 }
  0xd4   : > { %v1431_v0 = vmul.f32 %v1421_v37, %v3259_v35  ;;  %v1548_v23 = vmul.f32 %v1538_v51, %v3259_v35 }
  0xd5   : > { %v3640_v57 = vpop.permute.xlu1 %1898  ;;  %v3642_v1 = vpop.permute.xlu0 %1896 }
  0xd6   : > { %v1556_v44 = vcombine.low %v1548_v23, %v1548_v23 }
  0xd7   : > { %1209 = vrot.lane.b32.xlu0 %v1194_v12, %s2747_s15  ;;  %1211 = vrot.lane.b32.xlu1 %v1202_v27, %s2747_s15  ;;  %v1422_v12 = vsel %vm327_vm0, %v1417_v49, %v4360_v17  ;;  %v1539_v49 = vsel %vm327_vm0, %v1534_v47, %v4358_v7  ;;  %v1650_v47 = vrot.slane %v3594_v32, 4  ;;  %v1787_v7 = vrot.slane %v3625_v55, 4 }
  0xd8   : > { %v1423_v29 = vsel %vm449_vm2, %v3554_v43, %v1422_v12  ;;  %v1540_v43 = vsel %vm569_vm3, %v3584_v18, %v1539_v49 }
  0xd9   : > { %v3657_v16 = vpop.permute.xlu1 %1783  ;;  %v3659_v30 = vpop.permute.xlu0 %1900  ;;  %v1432_v10 = vmul.f32 %v1423_v29, %v3239_v46 }
  0xdb   : > { %1213 = vrot.lane.b32.xlu0 %v3655_v36, %s2747_s15  ;;  %1326 = vrot.lane.b32.xlu1 %v1322_v38, %s2754_s27  ;;  %v1440_v12 = vcombine.high %v1432_v10, %v1432_v10 }
  0xdd   : > { %v3668_v8 = vpop.permute.xlu1 %2015  ;;  %v3670_v19 = vpop.permute.xlu0 %2013 }
  0xdf   : > { %1328 = vrot.lane.b32.xlu0 %v1314_v41, %s2754_s27  ;;  %1330 = vrot.lane.b32.xlu1 %v1323_v22, %s2754_s27  ;;  %v1439_v41 = vcombine.high %v1431_v0, %v1431_v0  ;;  %v1651_v22 = vrot.slane %v3612_v42, 4 }
  0xe1   : > { %v3682_v27 = vpop.permute.xlu1 %2132  ;;  %v3684_v2 = vpop.permute.xlu0 %2130  ;;  %v1654_v18 = vsel %vm327_vm0, %v1650_v47, %v1651_v22 }
  0xe3   : > { %1332 = vrot.lane.b32.xlu0 %v1315_v4, %s2754_s27  ;;  %1443 = vrot.lane.b32.xlu1 %v1431_v0, %s2753_s19  ;;  %v1549_v4 = vmul.f32 %v1540_v43, %v3239_v46  ;;  %v4359_v0 = vrot.slane %v3610_v33, 4 }
  0xe5   : > { %v3695_v6 = vpop.permute.xlu1 %2017  ;;  %v3697_v38 = vpop.permute.xlu0 %2134  ;;  %v1557_v51 = vcombine.low %v1549_v4, %v1549_v4 }
  0xe7   : > { %1445 = vrot.lane.b32.xlu0 %v1439_v41, %s2753_s19  ;;  %1447 = vrot.lane.b32.xlu1 %v1432_v10, %s2753_s19  ;;  %v1655_v41 = vsel %vm689_vm4, %v3594_v32, %v1654_v18  ;;  %v1656_v10 = vsel %vm327_vm0, %v1651_v22, %v4359_v0  ;;  %v1788_v32 = vrot.slane %v3623_v28, 4  ;;  %v1904_v0 = vrot.slane %v3642_v1, 4 }
  0xe9   : > { %v3708_v20 = vpop.permute.xlu1 %442  ;;  %v3710_v37 = vpop.permute.xlu0 %321 }
  0xeb   : > { %1449 = vrot.lane.b32.xlu0 %v1440_v12, %s2753_s19  ;;  %1560 = vrot.lane.b32.xlu1 %v1556_v44, %s2752_s16  ;;  %v1665_v12 = vmul.f32 %v1655_v41, %v3259_v35  ;;  %v1657_v44 = vsel %vm689_vm4, %v3612_v42, %v1656_v10  ;;  %v1724_v41 = vcombine.low %v3239_v46, %v3239_v46 }
  0xec   : > { %v1791_v42 = vsel %vm728_vm5, %v1787_v7, %v3625_v55  ;;  %v1792_v10 = vsel %vm327_vm0, %v1787_v7, %v1788_v32 }
  0xed   : > { %v3716_v29 = vpop.permute.xlu1 %682  ;;  %v3718_v49 = vpop.permute.xlu0 %562  ;;  %1733 = vst [vmem:[#allocation2 + $0x190] sm:$0xf0] %v1724_v41  ;;  %v3755_v17 = vmul.f32 %v1791_v42, %v3259_v35  ;;  %v1793_v7 = vsel %vm728_vm5, %v1792_v10, %v3623_v28 }
  0xee   : > { %v1803_v28 = vmul.f32 %v1793_v7, %v3239_v46 }
  0xef   : > { %1562 = vrot.lane.b32.xlu0 %v1548_v23, %s2752_s16  ;;  %1564 = vrot.lane.b32.xlu1 %v1557_v51, %s2752_s16  ;;  %v1666_v23 = vmul.f32 %v1657_v44, %v3239_v46  ;;  %v1673_v51 = vcombine.high %v1665_v12, %v1665_v12  ;;  %v1810_v41 = vcombine.high %v3755_v17, %v3755_v17 }
  0xf0   : > { %v1811_v53 = vcombine.high %v1803_v28, %v1803_v28 }
  0xf1   : > { %v3727_v43 = vpop.permute.xlu1 %940  ;;  %v3729_v47 = vpop.permute.xlu0 %822  ;;  %v1674_v44 = vcombine.high %v1666_v23, %v1666_v23 }
  0xf3   : > { %1566 = vrot.lane.b32.xlu0 %v1549_v4, %s2752_s16  ;;  %1205 = vrot.lane.b32.xlu1 %v3607_v31, %s2747_s15  ;;  %v1905_v4 = vrot.slane %v3640_v57, 4  ;;  %v4364_v31 = vrot.slane %v3657_v16, 4 }
  0xf5   : > { %v3740_v22 = vpop.permute.xlu1 %1176  ;;  %v3742_v18 = vpop.permute.xlu0 %1058  ;;  %v1909_v50 = vsel %vm327_vm0, %v1904_v0, %v1905_v4 }
  0xf6   : > { %v1910_v10 = vsel %vm608_vm6, %v1909_v50, %v3640_v57  ;;  %v1908_v57 = vsel %vm608_vm6, %v1904_v0, %v3642_v1  ;;  %v1723_v1 = vcombine.low %v3259_v35, %v3259_v35  ;;  %v2021_v0 = vrot.slane %v3670_v19, 4 }
  0xf7   : > { %1677 = vrot.lane.b32.xlu0 %v1665_v12, %s2751_s10  ;;  %1679 = vrot.lane.b32.xlu1 %v1673_v51, %s2751_s10  ;;  %v1794_v12 = vsel %vm327_vm0, %v1788_v32, %v4364_v31  ;;  %v4366_v51 = vrot.slane %v3659_v30, 4  ;;  %v1920_v50 = vmul.f32 %v1910_v10, %v3239_v46 }
  0xf8   : > { %v1795_v32 = vsel %vm728_vm5, %v1794_v12, %v3657_v16  ;;  %v1919_v12 = vmul.f32 %v1908_v57, %v3259_v35  ;;  %1731 = vst [vmem:[#allocation2 + $0x180] sm:$0xf0] %v1723_v1 }
  0xf9   : > { %v3757_v25 = vpop.permute.xlu1 %1414  ;;  %v3759_v55 = vpop.permute.xlu0 %1297  ;;  %v1928_v10 = vcombine.low %v1920_v50, %v1920_v50 }
  0xfb   : > { %1681 = vrot.lane.b32.xlu0 %v1666_v23, %s2751_s10  ;;  %1683 = vrot.lane.b32.xlu1 %v1674_v44, %s2751_s10  ;;  %v1911_v23 = vsel %vm327_vm0, %v1905_v4, %v4366_v51  ;;  %v3787_v44 = vmul.f32 %v1795_v32, %v3355_v11  ;;  %v2025_v51 = vsel %vm488_vm7, %v2021_v0, %v3670_v19  ;;  %v2138_v19 = vrot.slane %v3684_v2, 4 }
  0xfc   : > { %v1912_v4 = vsel %vm608_vm6, %v1911_v23, %v3659_v30  ;;  %v2036_v1 = vmul.f32 %v2025_v51, %v3259_v35 }
  0xfd   : > { %v3772_v42 = vpop.permute.xlu1 %1648  ;;  %v3774_v9 = vpop.permute.xlu0 %1531 }
  0xfe   : > { %v2044_v51 = vcombine.high %v2036_v1, %v2036_v1 }
  0xff   : > { %1816 = vrot.lane.b32.xlu0 %v1810_v41, %s2750_s29  ;;  %1818 = vrot.lane.b32.xlu1 %v1803_v28, %s2750_s29  ;;  %v3803_v41 = vmul.f32 %v1912_v4, %v3355_v11 }
 0x101   : > { %v3789_v31 = vpop.permute.xlu1 %1902  ;;  %v3791_v7 = vpop.permute.xlu0 %1785  ;;  %v1929_v23 = vcombine.low %v3803_v41, %v3803_v41 }
 0x103   : > { %1820 = vrot.lane.b32.xlu0 %v1811_v53, %s2750_s29  ;;  %1822 = vrot.lane.b32.xlu1 %v3787_v44, %s2750_s29  ;;  %v2022_v53 = vrot.slane %v3668_v8, 4 }
 0x105   : > { %v3805_v32 = vpop.permute.xlu1 %2136  ;;  %v3807_v28 = vpop.permute.xlu0 %2019  ;;  %v2026_v24 = vsel %vm327_vm0, %v2021_v0, %v2022_v53 }
 0x107   : > { %1933 = vrot.lane.b32.xlu0 %v1919_v12, %s2749_s18  ;;  %1935 = vrot.lane.b32.xlu1 %v1928_v10, %s2749_s18  ;;  %v1927_v10 = vcombine.low %v1919_v12, %v1919_v12 }
 0x109   : > { %v353_v57 = vpop.permute.xlu0 %352  ;;  %v355_v4 = vpop.permute.xlu1 %354 }
 0x10a   : > { %385 = vst.msk [vmem:[#allocation2] sm:$0xf] %vm384_vm9, %v353_v57  ;;  %v369_v59 = vsel %vm368_vm8, %v353_v57, %v355_v4  ;;  %vm753_vm9 = vcmask 7172  }
 0x10b   : > { %394 = vst.msk [vmem:[#allocation2] sm:$0xf] %vm393_vm10, %v4374_v58  ;;  %386 = vst [vmem:[#allocation2 + $0x8] sm:$0xf] %v369_v59  ;;  %1937 = vrot.lane.b32.xlu0 %v1920_v50, %s2749_s18  ;;  %1939 = vrot.lane.b32.xlu1 %v1929_v23, %s2749_s18  ;;  %v2027_v59 = vsel %vm488_vm7, %v2026_v24, %v3668_v8  ;;  %v2139_v50 = vrot.slane %v3682_v27, 4  ;;  %v4372_v23 = vrot.slane %v3695_v6, 4 }
 0x10c   : > { %v2142_v24 = vsel %vm368_vm8, %v2138_v19, %v3684_v2  ;;  %vm1357_vm10 = vcmask 1047820  }
 0x10d   : > { %v357_v5 = vpop.permute.xlu0 %356  ;;  %v3825_v39 = vpop.permute.xlu1 %358  ;;  %v2153_v2 = vmul.f32 %v2142_v24, %v3259_v35  ;;  %v326_v35 = vrot.slane %v3710_v37, 4 }
 0x10e   : > { %v370_v57 = vsel %vm368_vm8, %v355_v4, %v357_v5  ;;  %v371_v0 = vsel %vm368_vm8, %v357_v5, %v3825_v39  ;;  %v2037_v5 = vmul.f32 %v2027_v59, %v3239_v46 }
 0x10f   : > { %387 = vst [vmem:[#allocation2 + $0x10] sm:$0xf] %v370_v57  ;;  %388 = vst [vmem:[#allocation2 + $0x18] sm:$0xf] %v371_v0  ;;  %1814 = vrot.lane.b32.xlu0 %v3755_v17, %s2750_s29  ;;  %1931 = vrot.lane.b32.xlu1 %v1927_v10, %s2749_s18  ;;  %v2143_v57 = vsel %vm327_vm0, %v2138_v19, %v2139_v50  ;;  %v2028_v17 = vsel %vm327_vm0, %v2022_v53, %v4372_v23  ;;  %v4373_v10 = vrot.slane %v3697_v38, 4 }
 0x110   : > { %v2144_v19 = vsel %vm368_vm8, %v2143_v57, %v3682_v27  ;;  %v2029_v53 = vsel %vm488_vm7, %v2028_v17, %v3695_v6  ;;  %v2161_v27 = vcombine.low %v2153_v2, %v2153_v2 }
 0x111   : > { %v473_v12 = vpop.permute.xlu0 %472  ;;  %v475_v4 = vpop.permute.xlu1 %474  ;;  %v2154_v57 = vmul.f32 %v2144_v19, %v3239_v46 }
 0x112   : > { %505 = vst.msk [vmem:[#allocation2] sm:$0xf0] %vm504_vm11, %v473_v12  ;;  %v489_v8 = vsel %vm488_vm7, %v473_v12, %v475_v4  ;;  %v2045_v12 = vcombine.high %v2037_v5, %v2037_v5  ;;  %vm1366_vm11 = vcmask 269316  }
 0x113   : > { %514 = vst.msk [vmem:[#allocation2] sm:$0xf0] %vm513_vm12, %v4374_v58  ;;  %506 = vst [vmem:[#allocation2 + $0x8] sm:$0xf0] %v489_v8  ;;  %2048 = vrot.lane.b32.xlu0 %v2036_v1, %s2748_s20  ;;  %2050 = vrot.lane.b32.xlu1 %v2044_v51, %s2748_s20  ;;  %v2145_v1 = vsel %vm327_vm0, %v2139_v50, %v4373_v10  ;;  %v3867_v51 = vmul.f32 %v2029_v53, %v3355_v11  ;;  %vm1474_vm12 = vcmask 1043712  }
 0x114   : > { %v2146_v50 = vsel %vm368_vm8, %v2145_v1, %v3697_v38  ;;  %v2162_v19 = vcombine.low %v2154_v57, %v2154_v57 }
 0x115   : > { %v477_v0 = vpop.permute.xlu0 %476  ;;  %v3851_v59 = vpop.permute.xlu1 %478  ;;  %v3881_v46 = vmul.f32 %v2146_v50, %v3355_v11 }
 0x116   : > { %4381 = vst [vmem:[#allocation3_spill] sm:$0xff] %v3851_v59  ;;  %v490_v23 = vsel %vm488_vm7, %v475_v4, %v477_v0  ;;  %v491_v8 = vsel %vm488_vm7, %v477_v0, %v3851_v59 }
 0x117   : > { %507 = vst [vmem:[#allocation2 + $0x10] sm:$0xf0] %v490_v23  ;;  %508 = vst [vmem:[#allocation2 + $0x18] sm:$0xf0] %v491_v8  ;;  %2052 = vrot.lane.b32.xlu0 %v2037_v5, %s2748_s20  ;;  %2054 = vrot.lane.b32.xlu1 %v2045_v12, %s2748_s20  ;;  %v4382_v5 = vrot.slane %v3424_v40, 4 }
 0x119   : > { %v593_v4 = vpop.permute.xlu0 %592  ;;  %v595_v24 = vpop.permute.xlu1 %594  ;;  %v333_v17 = vsel %vm327_vm0, %v4382_v5, %v326_v35 }
 0x11a   : > { %625 = vst.msk [vmem:[#allocation2 + $0x40] sm:$0xf] %vm624_vm13, %v593_v4  ;;  %v609_v23 = vsel %vm608_vm6, %v593_v4, %v595_v24  ;;  %v334_v1 = vsel %vm329_vm1, %v3424_v40, %v333_v17  ;;  %v447_v4 = vrot.slane %v3708_v20, 4  ;;  %v335_v40 = vsel %vm329_vm1, %v3710_v37, %v326_v35 }
 0x11b   : > { %634 = vst.msk [vmem:[#allocation2 + $0x40] sm:$0xf] %vm633_vm14, %v4374_v58  ;;  %626 = vst [vmem:[#allocation2 + $0x48] sm:$0xf] %v609_v23  ;;  %2056 = vrot.lane.b32.xlu0 %v3867_v51, %s2748_s20  ;;  %2165 = vrot.lane.b32.xlu1 %v2161_v27, %s2747_s15  ;;  %v2163_v27 = vcombine.low %v3881_v46, %v3881_v46  ;;  %v342_v23 = vmul.f32 %v334_v1, %v3042_v54  ;;  %v4384_v17 = vrot.slane %v3443_v48, 4  ;;  %vm1483_vm13 = vcmask 257024  }
 0x11c   : > { %vm1591_vm14 = vcmask 1047804  }
 0x11d   : > { %v597_v0 = vpop.permute.xlu0 %596  ;;  %v3883_v12 = vpop.permute.xlu1 %598  ;;  %v350_v37 = vcombine.high %v342_v23, %v342_v23 }
 0x11e   : > { %4383 = vst [vmem:[#allocation4_spill] sm:$0xff] %v3883_v12  ;;  %v610_v53 = vsel %vm608_vm6, %v595_v24, %v597_v0  ;;  %v611_v8 = vsel %vm608_vm6, %v597_v0, %v3883_v12  ;;  %v343_v0 = vmul.f32 %v335_v40, %v3375_v14  ;;  %v2210_v59 = vld [vmem:[#allocation2 + $0x10] sm:$0xff] }
 0x11f   : > { %627 = vst [vmem:[#allocation2 + $0x50] sm:$0xf] %v610_v53  ;;  %628 = vst [vmem:[#allocation2 + $0x58] sm:$0xf] %v611_v8  ;;  %2167 = vrot.lane.b32.xlu0 %v2153_v2, %s2747_s15  ;;  %2169 = vrot.lane.b32.xlu1 %v2162_v19, %s2747_s15  ;;  %v453_v2 = vsel %vm327_vm0, %v4384_v17, %v447_v4 }
 0x120   : > { %v454_v35 = vsel %vm449_vm2, %v3443_v48, %v453_v2  ;;  %v2209_v2 = vld [vmem:[#allocation2 + $0x8] sm:$0xff] }
 0x121   : > { %v713_v24 = vpop.permute.xlu0 %712  ;;  %v715_v50 = vpop.permute.xlu1 %714  ;;  %v462_v48 = vmul.f32 %v454_v35, %v3042_v54 }
 0x122   : > { %745 = vst.msk [vmem:[#allocation2 + $0x40] sm:$0xf0] %vm744_vm15, %v713_v24  ;;  %v729_v5 = vsel %vm728_vm5, %v713_v24, %v715_v50  ;;  %v567_v24 = vrot.slane %v3718_v49, 4  ;;  %vm1600_vm15 = vcmask 252932  }
 0x123   : > { %754 = vst.msk [vmem:[#allocation2 + $0x40] sm:$0xf0] %vm753_vm9, %v4374_v58  ;;  %746 = vst [vmem:[#allocation2 + $0x48] sm:$0xf0] %v729_v5  ;;  %2171 = vrot.lane.b32.xlu0 %v2154_v57, %s2747_s15  ;;  %2173 = vrot.lane.b32.xlu1 %v2163_v27, %s2747_s15  ;;  %v2208_v57 = vld [vmem:[#allocation2] sm:$0xff]  ;;  %v351_v27 = vcombine.high %v343_v0, %v343_v0  ;;  %v470_v58 = vcombine.low %v462_v48, %v462_v48  ;;  %vm1708_vm9 = vcmask 1043464  }
 0x125   : > { %v717_v19 = vpop.permute.xlu0 %716  ;;  %v3906_v53 = vpop.permute.xlu1 %718 }
 0x126   : > { %4385 = vst [vmem:[#allocation5_spill] sm:$0xff] %v3906_v53  ;;  %v730_v8 = vsel %vm728_vm5, %v715_v50, %v717_v19  ;;  %v731_v1 = vsel %vm728_vm5, %v717_v19, %v3906_v53  ;;  %v455_v50 = vsel %vm449_vm2, %v3708_v20, %v447_v4  ;;  %v2211_v53 = vld [vmem:[#allocation2 + $0x18] sm:$0xff] }
 0x127   : > { %747 = vst [vmem:[#allocation2 + $0x50] sm:$0xf0] %v730_v8  ;;  %748 = vst [vmem:[#allocation2 + $0x58] sm:$0xf0] %v731_v1  ;;  %360 = vrot.lane.b32.xlu0 %v342_v23, %s2754_s27  ;;  %362 = vrot.lane.b32.xlu1 %v350_v37, %s2754_s27  ;;  %v4386_v23 = vrot.slane %v3459_v45, 4  ;;  %v463_v10 = vmul.f32 %v455_v50, %v3375_v14 }
 0x129   : > { %v3916_v40 = vpop.permute.xlu0 %853  ;;  %v856_v5 = vpop.permute.xlu1 %855  ;;  %v573_v37 = vsel %vm327_vm0, %v4386_v23, %v567_v24 }
 0x12a   : > { %v868_v17 = vsel %vm689_vm4, %v3916_v40, %v856_v5  ;;  %v2217_v19 = vld [vmem:[#allocation2 + $0x48] sm:$0xff]  ;;  %v2216_v8 = vld [vmem:[#allocation2 + $0x40] sm:$0xff] }
 0x12b   : > { %883 = vst [vmem:[#allocation2 + $0x88] sm:$0xf0] %v868_v17  ;;  %364 = vrot.lane.b32.xlu0 %v343_v0, %s2754_s27  ;;  %366 = vrot.lane.b32.xlu1 %v351_v27, %s2754_s27  ;;  %v2281_v1 = vpack.c.bf16 %v2217_v19, %v2209_v2  ;;  %v2280_v35 = vpack.c.bf16 %v2216_v8, %v2208_v57  ;;  %v687_v57 = vrot.slane %v3716_v29, 4 }
 0x12c   : > { %v574_v27 = vsel %vm569_vm3, %v3459_v45, %v573_v37  ;;  %v471_v2 = vcombine.low %v463_v10, %v463_v10  ;;  %v575_v45 = vsel %vm569_vm3, %v3718_v49, %v567_v24 }
 0x12d   : > { %v858_v20 = vpop.permute.xlu0 %857  ;;  %2354 = vmatprep.subr.bf16.mxu0 %v2281_v1  ;;  %v3929_v4 = vpop.permute.xlu1 %859  ;;  %v582_v1 = vmul.f32 %v574_v27, %v3042_v54 }
 0x12e   : > { %v869_v12 = vsel %vm689_vm4, %v856_v5, %v858_v20  ;;  %v870_v23 = vsel %vm689_vm4, %v858_v20, %v3929_v4  ;;  %v2219_v17 = vld [vmem:[#allocation2 + $0x58] sm:$0xff]  ;;  %v2218_v0 = vld [vmem:[#allocation2 + $0x50] sm:$0xff]  ;;  %2355 = vmatpush1.bf16.msra.mxu0 %v2280_v35 }
 0x12f   : > { %884 = vst [vmem:[#allocation2 + $0x90] sm:$0xf0] %v869_v12  ;;  %885 = vst [vmem:[#allocation2 + $0x98] sm:$0xf0] %v870_v23  ;;  %480 = vrot.lane.b32.xlu0 %v470_v58, %s2753_s19  ;;  %482 = vrot.lane.b32.xlu1 %v462_v48, %s2753_s19  ;;  %v2283_v50 = vpack.c.bf16 %v2219_v17, %v2211_v53  ;;  %v2282_v5 = vpack.c.bf16 %v2218_v0, %v2210_v59  ;;  %v4387_v12 = vrot.slane %v3468_v56, 4 }
 0x130   : > { %v583_v59 = vmul.f32 %v575_v45, %v3375_v14  ;;  %v590_v35 = vcombine.high %v582_v1, %v582_v1  ;;  %v827_v23 = vrot.slane %v3729_v47, 4 }
 0x131   : > { %v972_v19 = vpop.permute.xlu0 %971  ;;  %2395 = vmatprep.subr.bf16.mxu1 %v2283_v50  ;;  %v974_v8 = vpop.permute.xlu1 %973  ;;  %v693_v58 = vsel %vm327_vm0, %v4387_v12, %v687_v57 }
 0x132   : > { %v986_v37 = vsel %vm569_vm3, %v972_v19, %v974_v8  ;;  %2396 = vmatpush1.bf16.msra.mxu1 %v2282_v5  ;;  %v694_v49 = vsel %vm689_vm4, %v3468_v56, %v693_v58  ;;  %v695_v56 = vsel %vm689_vm4, %v3716_v29, %v687_v57  ;;  %v4388_v5 = vrot.slane %v3482_v34, 4 }
 0x133   : > { %1001 = vst [vmem:[#allocation2 + $0xc8] sm:$0xf] %v986_v37  ;;  %484 = vrot.lane.b32.xlu0 %v471_v2, %s2753_s19  ;;  %486 = vrot.lane.b32.xlu1 %v463_v10, %s2753_s19  ;;  %v591_v10 = vcombine.high %v583_v59, %v583_v59  ;;  %v702_v27 = vmul.f32 %v694_v49, %v3042_v54 }
 0x134   : > { %v833_v2 = vsel %vm327_vm0, %v4388_v5, %v827_v23  ;;  %v703_v29 = vmul.f32 %v695_v56, %v3375_v14  ;;  %v1063_v56 = vrot.slane %v3742_v18, 4 }
 0x135   : > { %v976_v53 = vpop.permute.xlu0 %975  ;;  %v3949_v48 = vpop.permute.xlu1 %977  ;;  %v710_v34 = vcombine.low %v702_v27, %v702_v27  ;;  %v834_v37 = vsel %vm728_vm5, %v833_v2, %v3729_v47 }
 0x136   : > { %v987_v24 = vsel %vm569_vm3, %v974_v8, %v976_v53  ;;  %v988_v20 = vsel %vm569_vm3, %v976_v53, %v3949_v48  ;;  %v2756_v8 = vmov 0   ;;  %v842_v53 = vmul.f32 %v834_v37, %v3375_v14 }
 0x137   : > { %1002 = vst [vmem:[#allocation2 + $0xd0] sm:$0xf] %v987_v24  ;;  %1003 = vst [vmem:[#allocation2 + $0xd8] sm:$0xf] %v988_v20  ;;  %600 = vrot.lane.b32.xlu0 %v582_v1, %s2752_s16  ;;  %602 = vrot.lane.b32.xlu1 %v590_v35, %s2752_s16  ;;  %v761_v1 = vcombine.high %v3042_v54, %v3042_v54  ;;  %v711_v54 = vcombine.low %v703_v29, %v703_v29  ;;  %v2225_v20 = vld [vmem:[#allocation2 + $0x88] sm:$0xff]  ;;  %v4390_v37 = vrot.slane %v3502_v61, 4 }
 0x138   : > { %2386 = vmatprep.mubr.bf16.mxu0 %v2756_v8  ;;  %2427 = vmatprep.mubr.bf16.mxu1 %v2756_v8 }
 0x139   : > { %v1090_v17 = vpop.permute.xlu0 %1089  ;;  %v1092_v0 = vpop.permute.xlu1 %1091  ;;  %2738 = vset.pattern.permute.xlu0 %v2756_v8  ;;  %772 = vst [vmem:[#allocation2 + $0xa8] sm:$0xf] %v761_v1 }
 0x13a   : > { %v1104_v50 = vsel %vm449_vm2, %v1090_v17, %v1092_v0 }
 0x13b   : > { %1119 = vst [vmem:[#allocation2 + $0xc8] sm:$0xf0] %v1104_v50  ;;  %604 = vrot.lane.b32.xlu0 %v583_v59, %s2752_s16  ;;  %606 = vrot.lane.b32.xlu1 %v591_v10, %s2752_s16  ;;  %v945_v59 = vrot.slane %v3727_v43, 4  ;;  %v4389_v10 = vrot.slane %v3514_v21, 4  ;;  %v850_v50 = vcombine.low %v842_v53, %v842_v53 }
 0x13d   : > { %v1094_v57 = vpop.permute.xlu0 %1093  ;;  %v3973_v45 = vpop.permute.xlu1 %1095 }
 0x13e   : > { %v1105_v12 = vsel %vm449_vm2, %v1092_v0, %v1094_v57  ;;  %v1106_v58 = vsel %vm449_vm2, %v1094_v57, %v3973_v45  ;;  %v951_v0 = vsel %vm327_vm0, %v4389_v10, %v945_v59  ;;  %v2226_v57 = vld [vmem:[#allocation2 + $0x90] sm:$0xff] }
 0x13f   : > { %1120 = vst [vmem:[#allocation2 + $0xd0] sm:$0xf0] %v1105_v12  ;;  %1121 = vst [vmem:[#allocation2 + $0xd8] sm:$0xf0] %v1106_v58  ;;  %720 = vrot.lane.b32.xlu0 %v710_v34, %s2751_s10  ;;  %722 = vrot.lane.b32.xlu1 %v702_v27, %s2751_s10  ;;  %v952_v21 = vsel %vm608_vm6, %v951_v0, %v3727_v43  ;;  %v1069_v12 = vsel %vm327_vm0, %v4390_v37, %v1063_v56 }
 0x140   : > { %v967_v43 = vcombine.high %v3573_v63, %v3573_v63  ;;  %v1070_v61 = vsel %vm488_vm7, %v1069_v12, %v3742_v18  ;;  %v762_v63 = vcombine.high %v3375_v14, %v3375_v14 }
 0x141   : > { %v852_v35 = vpop.permute.xlu0 %851  ;;  %v970_v49 = vpop.permute.xlu1 %969 }
 0x142   : > { %v867_v47 = vsel %vm689_vm4, %v852_v35, %v3916_v40  ;;  %v985_v24 = vsel %vm569_vm3, %v970_v49, %v972_v19  ;;  %v2233_v23 = vld [vmem:[#allocation2 + $0xc8] sm:$0xff]  ;;  %v2227_v19 = vld [vmem:[#allocation2 + $0x98] sm:$0xff]  ;;  %v1181_v49 = vrot.slane %v3740_v22, 4  ;;  %774 = vst [vmem:[#allocation2 + $0xb8] sm:$0xf] %v762_v63 }
 0x143   : > { %882 = vst [vmem:[#allocation2 + $0x80] sm:$0xf0] %v867_v47  ;;  %1000 = vst [vmem:[#allocation2 + $0xc0] sm:$0xf] %v985_v24  ;;  %724 = vrot.lane.b32.xlu0 %v711_v54, %s2751_s10  ;;  %726 = vrot.lane.b32.xlu1 %v703_v29, %s2751_s10  ;;  %v2289_v27 = vpack.c.bf16 %v2233_v23, %v2225_v20  ;;  %v1078_v47 = vmul.f32 %v1070_v61, %v3375_v14 }
 0x145   : > { %v1088_v5 = vpop.permute.xlu0 %1087  ;;  %2356 = vmatprep.subr.bf16.mxu0 %v2289_v27  ;;  %v3994_v40 = vpop.permute.xlu1 %1207  ;;  %v1302_v27 = vrot.slane %v3759_v55, 4 }
 0x146   : > { %v1103_v2 = vsel %vm449_vm2, %v1088_v5, %v1090_v17  ;;  %v2235_v1 = vld [vmem:[#allocation2 + $0xd8] sm:$0xff]  ;;  %v2234_v34 = vld [vmem:[#allocation2 + $0xd0] sm:$0xff]  ;;  %v960_v17 = vmul.f32 %v952_v21, %v3375_v14 }
 0x147   : > { %1118 = vst [vmem:[#allocation2 + $0xc0] sm:$0xf0] %v1103_v2  ;;  %861 = vrot.lane.b32.xlu0 %v3523_v13, %s2750_s29  ;;  %863 = vrot.lane.b32.xlu1 %v850_v50, %s2750_s29  ;;  %v2291_v29 = vpack.c.bf16 %v2235_v1, %v2227_v19  ;;  %v2290_v58 = vpack.c.bf16 %v2234_v34, %v2226_v57  ;;  %v4392_v50 = vmov 0.0   ;;  %v4393_v34 = vrot.slane %v3540_v52, 4 }
 0x148   : > { %v968_v18 = vcombine.high %v960_v17, %v960_v17  ;;  %v1086_v19 = vcombine.low %v1078_v47, %v1078_v47 }
 0x149   : > { %v1210_v59 = vpop.permute.xlu0 %1209  ;;  %2397 = vmatprep.subr.bf16.mxu1 %v2291_v29  ;;  %v1212_v54 = vpop.permute.xlu1 %1211  ;;  %v1307_v37 = vsel %vm327_vm0, %v4393_v34, %v1302_v27 }
 0x14a   : > { %v1222_v35 = vsel %vm329_vm1, %v3994_v40, %v1210_v59  ;;  %v1223_v13 = vsel %vm329_vm1, %v1210_v59, %v1212_v54  ;;  %2398 = vmatpush1.bf16.msra.mxu1 %v2290_v58  ;;  %v2224_v10 = vld [vmem:[#allocation2 + $0x80] sm:$0xff] }
 0x14b   : > { %1237 = vst [vmem:[#allocation2 + $0x108] sm:$0xf] %v1222_v35  ;;  %1238 = vst [vmem:[#allocation2 + $0x110] sm:$0xf] %v1223_v13  ;;  %865 = vrot.lane.b32.xlu0 %v842_v53, %s2750_s29  ;;  %979 = vrot.lane.b32.xlu1 %v967_v43, %s2749_s18  ;;  %v4391_v53 = vrot.slane %v3596_v62, 4  ;;  %v1308_v43 = vsel %vm329_vm1, %v3540_v52, %v1307_v37  ;;  %v1309_v52 = vsel %vm329_vm1, %v3759_v55, %v1302_v27 }
 0x14c   : > { %v4394_v13 = vrot.slane %v3570_v60, 4  ;;  %v1317_v63 = vmul.f32 %v1309_v52, %v3395_v15 }
 0x14d   : > { %v4019_v24 = vpop.permute.xlu0 %1213  ;;  %v1327_v20 = vpop.permute.xlu1 %1326  ;;  %v1187_v56 = vsel %vm327_vm0, %v4391_v53, %v1181_v49 }
 0x14e   : > { %v1224_v23 = vsel %vm329_vm1, %v1212_v54, %v4019_v24  ;;  %1358 = vst.msk [vmem:[#allocation2 + $0x100] sm:$0xf0] %vm1357_vm10, %v1327_v20  ;;  %v2232_v0 = vld [vmem:[#allocation2 + $0xc0] sm:$0xff]  ;;  %v1188_v1 = vsel %vm368_vm8, %v1187_v56, %v3740_v22  ;;  %v1203_v22 = vcombine.high %v3655_v36, %v3655_v36  ;;  %v1316_v54 = vmul.f32 %v1308_v43, %v3355_v11 }
 0x14f   : > { %1239 = vst [vmem:[#allocation2 + $0x118] sm:$0xf] %v1224_v23  ;;  %1367 = vst.msk [vmem:[#allocation2 + $0x100] sm:$0xf0] %vm1366_vm11, %v4392_v50  ;;  %981 = vrot.lane.b32.xlu0 %v960_v17, %s2749_s18  ;;  %983 = vrot.lane.b32.xlu1 %v968_v18, %s2749_s18  ;;  %v2288_v5 = vpack.c.bf16 %v2232_v0, %v2224_v10  ;;  %v1196_v12 = vmul.f32 %v1188_v1, %v3375_v14  ;;  %v1536_v10 = vrot.slane %v3774_v9, 4  ;;  %vm1717_vm10 = vcmask 3072  }
 0x150   : > { %v1325_v0 = vcombine.low %v1317_v63, %v1317_v63  ;;  %vm2326_vm11 = vcmask 588800  }
 0x151   : > { %v1329_v21 = vpop.permute.xlu0 %1328  ;;  %2357 = vmatpush1.bf16.msra.mxu0 %v2288_v5  ;;  %v1331_v2 = vpop.permute.xlu1 %1330  ;;  %v1204_v14 = vcombine.high %v1196_v12, %v1196_v12 }
 0x152   : > { %v1342_v62 = vsel %vm368_vm8, %v1327_v20, %v1329_v21  ;;  %v1343_v57 = vsel %vm368_vm8, %v1329_v21, %v1331_v2  ;;  %v4395_v21 = vrot.slane %v3582_v26, 4 }
 0x153   : > { %1359 = vst [vmem:[#allocation2 + $0x108] sm:$0xf0] %v1342_v62  ;;  %1360 = vst [vmem:[#allocation2 + $0x110] sm:$0xf0] %v1343_v57  ;;  %1097 = vrot.lane.b32.xlu0 %v3588_v3, %s2748_s20  ;;  %1099 = vrot.lane.b32.xlu1 %v1086_v19, %s2748_s20  ;;  %v1419_v3 = vrot.slane %v3757_v25, 4 }
 0x155   : > { %v4043_v29 = vpop.permute.xlu0 %1332  ;;  %v1444_v58 = vpop.permute.xlu1 %1443  ;;  %v1424_v49 = vsel %vm327_vm0, %v4394_v13, %v1419_v3  ;;  %v1426_v5 = vsel %vm449_vm2, %v3757_v25, %v1419_v3  ;;  %v1543_v3 = vsel %vm569_vm3, %v3774_v9, %v1536_v10  ;;  %v1725_v9 = vcombine.low %v3355_v11, %v3355_v11 }
 0x156   : > { %v1344_v17 = vsel %vm368_vm8, %v1331_v2, %v4043_v29  ;;  %1475 = vst.msk [vmem:[#allocation2 + $0x140] sm:$0xf] %vm1474_vm12, %v1444_v58  ;;  %v1425_v23 = vsel %vm449_vm2, %v3570_v60, %v1424_v49  ;;  %v1541_v2 = vsel %vm327_vm0, %v4395_v21, %v1536_v10  ;;  %v1434_v1 = vmul.f32 %v1426_v5, %v3395_v15 }
 0x157   : > { %1361 = vst [vmem:[#allocation2 + $0x118] sm:$0xf0] %v1344_v17  ;;  %1484 = vst.msk [vmem:[#allocation2 + $0x140] sm:$0xf] %vm1483_vm13, %v4392_v50  ;;  %1101 = vrot.lane.b32.xlu0 %v1078_v47, %s2748_s20  ;;  %1215 = vrot.lane.b32.xlu1 %v1203_v22, %s2747_s15  ;;  %v1324_v47 = vcombine.low %v1316_v54, %v1316_v54  ;;  %v1433_v27 = vmul.f32 %v1425_v23, %v3355_v11  ;;  %vm889_vm12 = vcmask 1039364   ;;  %vm891_vm13 = vcmask 1048572  }
 0x158   : > { %v1542_v34 = vsel %vm569_vm3, %v3582_v26, %v1541_v2  ;;  %1735 = vst [vmem:[#allocation2 + $0x1a0] sm:$0xf0] %v1725_v9 }
 0x159   : > { %v1446_v36 = vpop.permute.xlu0 %1445  ;;  %v1448_v59 = vpop.permute.xlu1 %1447  ;;  %v1441_v25 = vcombine.high %v1433_v27, %v1433_v27  ;;  %v1550_v26 = vmul.f32 %v1542_v34, %v3355_v11  ;;  %v1790_v34 = vrot.slane %v3791_v7, 4 }
 0x15a   : > { %v1459_v61 = vsel %vm488_vm7, %v1444_v58, %v1446_v36  ;;  %v1460_v35 = vsel %vm488_vm7, %v1446_v36, %v1448_v59  ;;  %v1442_v58 = vcombine.high %v1434_v1, %v1434_v1  ;;  %v2242_v5 = vld [vmem:[#allocation2 + $0x110] sm:$0xff] }
 0x15b   : > { %1476 = vst [vmem:[#allocation2 + $0x148] sm:$0xf] %v1459_v61  ;;  %1477 = vst [vmem:[#allocation2 + $0x150] sm:$0xf] %v1460_v35  ;;  %1217 = vrot.lane.b32.xlu0 %v1196_v12, %s2747_s15  ;;  %1219 = vrot.lane.b32.xlu1 %v1204_v14, %s2747_s15  ;;  %v1653_v12 = vrot.slane %v3772_v42, 4  ;;  %v2241_v14 = vld [vmem:[#allocation2 + $0x108] sm:$0xff]  ;;  %v1551_v35 = vmul.f32 %v1543_v3, %v3395_v15 }
 0x15d   : > { %v4064_v18 = vpop.permute.xlu0 %1449  ;;  %v1561_v55 = vpop.permute.xlu1 %1560  ;;  %v1559_v21 = vcombine.low %v1551_v35, %v1551_v35 }
 0x15e   : > { %v1461_v20 = vsel %vm488_vm7, %v1448_v59, %v4064_v18  ;;  %1592 = vst.msk [vmem:[#allocation2 + $0x140] sm:$0xf0] %vm1591_vm14, %v1561_v55  ;;  %v4396_v59 = vrot.slane %v3610_v33, 4  ;;  %v2243_v10 = vld [vmem:[#allocation2 + $0x118] sm:$0xff]  ;;  %vm1007_vm14 = vcmask 789504  }
 0x15f   : > { %1478 = vst [vmem:[#allocation2 + $0x158] sm:$0xf] %v1461_v20  ;;  %1601 = vst.msk [vmem:[#allocation2 + $0x140] sm:$0xf0] %vm1600_vm15, %v4392_v50  ;;  %1334 = vrot.lane.b32.xlu0 %v1324_v47, %s2754_s27  ;;  %1336 = vrot.lane.b32.xlu1 %v1316_v54, %s2754_s27  ;;  %vm1009_vm15 = vcmask 1044232  }
 0x160   : > { %v1658_v54 = vsel %vm327_vm0, %v4396_v59, %v1653_v12 }
 0x161   : > { %v1563_v53 = vpop.permute.xlu0 %1562  ;;  %v1565_v56 = vpop.permute.xlu1 %1564 }
 0x162   : > { %v1576_v19 = vsel %vm608_vm6, %v1561_v55, %v1563_v53  ;;  %v1577_v60 = vsel %vm608_vm6, %v1563_v53, %v1565_v56  ;;  %v1659_v53 = vsel %vm689_vm4, %v3610_v33, %v1658_v54  ;;  %v4398_v54 = vrot.slane %v3659_v30, 4 }
 0x163   : > { %1593 = vst [vmem:[#allocation2 + $0x148] sm:$0xf0] %v1576_v19  ;;  %1594 = vst [vmem:[#allocation2 + $0x150] sm:$0xf0] %v1577_v60  ;;  %1338 = vrot.lane.b32.xlu0 %v1325_v0, %s2754_s27  ;;  %1340 = vrot.lane.b32.xlu1 %v1317_v63, %s2754_s27  ;;  %v1558_v63 = vcombine.low %v1550_v26, %v1550_v26  ;;  %v1726_v60 = vcombine.low %v3395_v15, %v3395_v15 }
 0x164   : > { %v1667_v33 = vmul.f32 %v1659_v53, %v3355_v11  ;;  %v2141_v53 = vrot.slane %v3805_v32, 4 }
 0x165   : > { %v4085_v62 = vpop.permute.xlu0 %1566  ;;  %v1206_v57 = vpop.permute.xlu1 %1205  ;;  %1737 = vst [vmem:[#allocation2 + $0x1b0] sm:$0xf0] %v1726_v60 }
 0x166   : > { %v1578_v37 = vsel %vm608_vm6, %v1565_v56, %v4085_v62  ;;  %v1221_v22 = vsel %vm329_vm1, %v1206_v57, %v3994_v40  ;;  %v2248_v61 = vld [vmem:[#allocation2 + $0x140] sm:$0xff]  ;;  %v1660_v57 = vsel %vm689_vm4, %v3772_v42, %v1653_v12  ;;  %v1675_v11 = vcombine.high %v1667_v33, %v1667_v33 }
 0x167   : > { %1595 = vst [vmem:[#allocation2 + $0x158] sm:$0xf0] %v1578_v37  ;;  %1236 = vst [vmem:[#allocation2 + $0x100] sm:$0xf] %v1221_v22  ;;  %1451 = vrot.lane.b32.xlu0 %v1433_v27, %s2753_s19  ;;  %1453 = vrot.lane.b32.xlu1 %v1441_v25, %s2753_s19  ;;  %v1668_v37 = vmul.f32 %v1660_v57, %v3395_v15  ;;  %v1907_v12 = vrot.slane %v3789_v31, 4 }
 0x169   : > { %v1678_v43 = vpop.permute.xlu0 %1677  ;;  %v1680_v17 = vpop.permute.xlu1 %1679  ;;  %v1676_v3 = vcombine.high %v1668_v37, %v1668_v37 }
 0x16a   : > { %1709 = vst.msk [vmem:[#allocation2 + $0x180] sm:$0xf] %vm1708_vm9, %v1678_v43  ;;  %v1693_v40 = vsel %vm728_vm5, %v1678_v43, %v1680_v17  ;;  %v2249_v36 = vld [vmem:[#allocation2 + $0x148] sm:$0xff]  ;;  %v2250_v55 = vld [vmem:[#allocation2 + $0x150] sm:$0xff]  ;;  %vm1125_vm9 = vcmask 785412  }
 0x16b   : > { %1718 = vst.msk [vmem:[#allocation2 + $0x180] sm:$0xf] %vm1717_vm10, %v4392_v50  ;;  %1710 = vst [vmem:[#allocation2 + $0x188] sm:$0xf] %v1693_v40  ;;  %1455 = vrot.lane.b32.xlu0 %v1434_v1, %s2753_s19  ;;  %1457 = vrot.lane.b32.xlu1 %v1442_v58, %s2753_s19  ;;  %v2297_v52 = vpack.c.bf16 %v2249_v36, %v2241_v14  ;;  %v2298_v19 = vpack.c.bf16 %v2250_v55, %v2242_v5 }
 0x16d   : > { %v1682_v13 = vpop.permute.xlu0 %1681  ;;  %2358 = vmatprep.subr.bf16.mxu0 %v2297_v52  ;;  %v4110_v49 = vpop.permute.xlu1 %1683  ;;  %v1812_v52 = vcombine.high %v3787_v44, %v3787_v44 }
 0x16e   : > { %v1694_v47 = vsel %vm728_vm5, %v1680_v17, %v1682_v13  ;;  %v1695_v20 = vsel %vm728_vm5, %v1682_v13, %v4110_v49  ;;  %v2240_v23 = vld [vmem:[#allocation2 + $0x100] sm:$0xff]  ;;  %v2251_v0 = vld [vmem:[#allocation2 + $0x158] sm:$0xff]  ;;  %v4397_v17 = vrot.slane %v3657_v16, 4  ;;  %v1913_v16 = vsel %vm327_vm0, %v4398_v54, %v1907_v12 }
 0x16f   : > { %1711 = vst [vmem:[#allocation2 + $0x190] sm:$0xf] %v1694_v47  ;;  %1712 = vst [vmem:[#allocation2 + $0x198] sm:$0xf] %v1695_v20  ;;  %1568 = vrot.lane.b32.xlu0 %v1558_v63, %s2752_s16  ;;  %1570 = vrot.lane.b32.xlu1 %v1550_v26, %s2752_s16  ;;  %v2296_v56 = vpack.c.bf16 %v2248_v61, %v2240_v23  ;;  %v2299_v27 = vpack.c.bf16 %v2251_v0, %v2243_v10  ;;  %v2024_v63 = vrot.slane %v3807_v28, 4 }
 0x170   : > { %v1796_v26 = vsel %vm327_vm0, %v4397_v17, %v1790_v34  ;;  %v4400_v34 = vrot.slane %v3697_v38, 4 }
 0x171   : > { %v1817_v2 = vpop.permute.xlu0 %1816  ;;  %2359 = vmatpush1.bf16.msra.mxu0 %v2296_v56  ;;  %2399 = vmatprep.subr.bf16.mxu1 %v2299_v27  ;;  %v1819_v1 = vpop.permute.xlu1 %1818  ;;  %v1797_v36 = vsel %vm728_vm5, %v1796_v26, %v3791_v7  ;;  %v1914_v7 = vsel %vm608_vm6, %v1913_v16, %v3789_v31  ;;  %v4399_v56 = vrot.slane %v3695_v6, 4 }
 0x172   : > { %v1831_v25 = vsel %vm689_vm4, %v1817_v2, %v1819_v1  ;;  %2400 = vmatpush1.bf16.msra.mxu1 %v2298_v19  ;;  %v1805_v61 = vmul.f32 %v1797_v36, %v3395_v15  ;;  %v1922_v44 = vmul.f32 %v1914_v7, %v3395_v15  ;;  %v2257_v10 = vld [vmem:[#allocation2 + $0x188] sm:$0xff] }
 0x173   : > { %1846 = vst [vmem:[#allocation2 + $0x1c8] sm:$0xf] %v1831_v25  ;;  %1572 = vrot.lane.b32.xlu0 %v1559_v21, %s2752_s16  ;;  %1574 = vrot.lane.b32.xlu1 %v1551_v35, %s2752_s16  ;;  %v2030_v27 = vsel %vm327_vm0, %v4399_v56, %v2024_v63 }
 0x174   : > { %v1813_v55 = vcombine.high %v1805_v61, %v1805_v61  ;;  %v1930_v19 = vcombine.low %v1922_v44, %v1922_v44 }
 0x175   : > { %v1821_v22 = vpop.permute.xlu0 %1820  ;;  %v4129_v58 = vpop.permute.xlu1 %1822 }
 0x176   : > { %v1832_v43 = vsel %vm689_vm4, %v1819_v1, %v1821_v22  ;;  %v1833_v42 = vsel %vm689_vm4, %v1821_v22, %v4129_v58  ;;  %v2031_v1 = vsel %vm488_vm7, %v2030_v27, %v3807_v28  ;;  %v2258_v57 = vld [vmem:[#allocation2 + $0x190] sm:$0xff]  ;;  %v2046_v28 = vcombine.high %v3867_v51, %v3867_v51 }
 0x177   : > { %1847 = vst [vmem:[#allocation2 + $0x1d0] sm:$0xf] %v1832_v43  ;;  %1848 = vst [vmem:[#allocation2 + $0x1d8] sm:$0xf] %v1833_v42  ;;  %1685 = vrot.lane.b32.xlu0 %v1667_v33, %s2751_s10  ;;  %1687 = vrot.lane.b32.xlu1 %v1675_v11, %s2751_s10  ;;  %v2256_v11 = vld [vmem:[#allocation2 + $0x180] sm:$0xff]  ;;  %v2039_v43 = vmul.f32 %v2031_v1, %v3395_v15 }
 0x179   : > { %v1934_v40 = vpop.permute.xlu0 %1933  ;;  %v1936_v14 = vpop.permute.xlu1 %1935 }
 0x17a   : > { %v1948_v59 = vsel %vm569_vm3, %v1934_v40, %v1936_v14 }
 0x17b   : > { %1963 = vst [vmem:[#allocation2 + $0x1c8] sm:$0xf0] %v1948_v59  ;;  %1689 = vrot.lane.b32.xlu0 %v1668_v37, %s2751_s10  ;;  %1691 = vrot.lane.b32.xlu1 %v1676_v3, %s2751_s10  ;;  %v2147_v37 = vsel %vm327_vm0, %v4400_v34, %v2141_v53 }
 0x17c   : > { %v2148_v38 = vsel %vm368_vm8, %v2147_v37, %v3805_v32 }
 0x17d   : > { %v1938_v9 = vpop.permute.xlu0 %1937  ;;  %v4151_v35 = vpop.permute.xlu1 %1939 }
 0x17e   : > { %v1949_v30 = vsel %vm569_vm3, %v1936_v14, %v1938_v9  ;;  %v1950_v13 = vsel %vm569_vm3, %v1938_v9, %v4151_v35  ;;  %v2047_v14 = vcombine.high %v2039_v43, %v2039_v43 }
 0x17f   : > { %1964 = vst [vmem:[#allocation2 + $0x1d0] sm:$0xf0] %v1949_v30  ;;  %1965 = vst [vmem:[#allocation2 + $0x1d8] sm:$0xf0] %v1950_v13  ;;  %1824 = vrot.lane.b32.xlu0 %v1812_v52, %s2750_s29  ;;  %1826 = vrot.lane.b32.xlu1 %v1805_v61, %s2750_s29 }
 0x181   : > { %v1815_v47 = vpop.permute.xlu0 %1814  ;;  %v1932_v20 = vpop.permute.xlu1 %1931 }
 0x182   : > { %v1830_v31 = vsel %vm689_vm4, %v1815_v47, %v1817_v2  ;;  %v1947_v23 = vsel %vm569_vm3, %v1932_v20, %v1934_v40  ;;  %v2265_v0 = vld [vmem:[#allocation2 + $0x1c8] sm:$0xff]  ;;  %v2259_v2 = vld [vmem:[#allocation2 + $0x198] sm:$0xff]  ;;  %v2156_v40 = vmul.f32 %v2148_v38, %v3395_v15 }
 0x183   : > { %1845 = vst [vmem:[#allocation2 + $0x1c0] sm:$0xf] %v1830_v31  ;;  %1962 = vst [vmem:[#allocation2 + $0x1c0] sm:$0xf0] %v1947_v23  ;;  %1828 = vrot.lane.b32.xlu0 %v1813_v55, %s2750_s29  ;;  %1941 = vrot.lane.b32.xlu1 %v3803_v41, %s2749_s18  ;;  %v2305_v5 = vpack.c.bf16 %v2265_v0, %v2257_v10 }
 0x184   : > { %v2164_v54 = vcombine.low %v2156_v40, %v2156_v40 }
 0x185   : > { %v2049_v60 = vpop.permute.xlu0 %2048  ;;  %2360 = vmatprep.subr.bf16.mxu0 %v2305_v5  ;;  %v2051_v21 = vpop.permute.xlu1 %2050 }
 0x186   : > { %v2064_v6 = vsel %vm449_vm2, %v2049_v60, %v2051_v21  ;;  %v2267_v33 = vld [vmem:[#allocation2 + $0x1d8] sm:$0xff]  ;;  %v2266_v25 = vld [vmem:[#allocation2 + $0x1d0] sm:$0xff]  ;;  %v4218_v60 = vld [vmem:[%s4354_s3] sm:$0x3] }
 0x187   : > { %2079 = vst [vmem:[#allocation2 + $0x200] sm:$0xf] %v2064_v6  ;;  %1943 = vrot.lane.b32.xlu0 %v1930_v19, %s2749_s18  ;;  %1945 = vrot.lane.b32.xlu1 %v1922_v44, %s2749_s18  ;;  %v2307_v41 = vpack.c.bf16 %v2267_v33, %v2259_v2  ;;  %v2306_v22 = vpack.c.bf16 %v2266_v25, %v2258_v57  ;;  %v4401_v57 = vld [vmem:[#allocation3_spill] sm:$0xff] }
 0x189   : > { %v2053_v42 = vpop.permute.xlu0 %2052  ;;  %2401 = vmatprep.subr.bf16.mxu1 %v2307_v41  ;;  %v2055_v12 = vpop.permute.xlu1 %2054 }
 0x18a   : > { %v2065_v17 = vsel %vm449_vm2, %v2051_v21, %v2053_v42  ;;  %v2066_v26 = vsel %vm449_vm2, %v2053_v42, %v2055_v12  ;;  %2402 = vmatpush1.bf16.msra.mxu1 %v2306_v22  ;;  %v2264_v3 = vld [vmem:[#allocation2 + $0x1c0] sm:$0xff]  ;;  %v4402_v42 = vld [vmem:[#allocation4_spill] sm:$0xff] }
 0x18b   : > { %2080 = vst [vmem:[#allocation2 + $0x208] sm:$0xf] %v2065_v17  ;;  %2081 = vst [vmem:[#allocation2 + $0x210] sm:$0xf] %v2066_v26  ;;  %2058 = vrot.lane.b32.xlu0 %v2046_v28, %s2748_s20  ;;  %2060 = vrot.lane.b32.xlu1 %v2039_v43, %s2748_s20  ;;  %v2304_v51 = vpack.c.bf16 %v2264_v3, %v2256_v11 }
 0x18d   : > { %v4189_v36 = vpop.permute.xlu0 %2056  ;;  %2361 = vmatpush1.bf16.msra.mxu0 %v2304_v51  ;;  %v2166_v32 = vpop.permute.xlu1 %2165 }
 0x18e   : > { %v2067_v59 = vsel %vm449_vm2, %v2055_v12, %v4189_v36 }
 0x18f   : > { %2082 = vst [vmem:[#allocation2 + $0x218] sm:$0xf] %v2067_v59  ;;  %2062 = vrot.lane.b32.xlu0 %v2047_v14, %s2748_s20  ;;  %2175 = vrot.lane.b32.xlu1 %v3881_v46, %s2747_s15  ;;  %v2320_v46 = vld [vmem:[%s4355_s4] sm:$0xf]  ;;  %v4403_v14 = vld [vmem:[#allocation5_spill] sm:$0xff] }
 0x191   : > { %v2168_v16 = vpop.permute.xlu0 %2167  ;;  %v2170_v52 = vpop.permute.xlu1 %2169 }
 0x192   : > { %v2181_v61 = vsel %vm329_vm1, %v2166_v32, %v2168_v16  ;;  %v2182_v15 = vsel %vm329_vm1, %v2168_v16, %v2170_v52 }
 0x193   : > { %2196 = vst [vmem:[#allocation2 + $0x200] sm:$0xf0] %v2181_v61  ;;  %2197 = vst [vmem:[#allocation2 + $0x208] sm:$0xf0] %v2182_v15  ;;  %2177 = vrot.lane.b32.xlu0 %v2164_v54, %s2747_s15  ;;  %2179 = vrot.lane.b32.xlu1 %v2156_v40, %s2747_s15 }
 0x195   : > { %v2172_v9 = vpop.permute.xlu0 %2171  ;;  %v4200_v7 = vpop.permute.xlu1 %2173 }
 0x196   : > { %v2183_v30 = vsel %vm329_vm1, %v2170_v52, %v2172_v9  ;;  %v2184_v13 = vsel %vm329_vm1, %v2172_v9, %v4200_v7 }
 0x197   : > { %2198 = vst [vmem:[#allocation2 + $0x210] sm:$0xf0] %v2183_v30  ;;  %2199 = vst [vmem:[#allocation2 + $0x218] sm:$0xf0] %v2184_v13  ;;  %2323 = vperm.xlu0 %2738, %v2320_v46  }
 0x199   : > { %v361_v63 = vpop.permute.xlu0 %360  ;;  %v363_v44 = vpop.permute.xlu1 %362 }
 0x19a   : > { %v372_v55 = vsel %vm368_vm8, %v3825_v39, %v361_v63  ;;  %v373_v47 = vsel %vm368_vm8, %v361_v63, %v363_v44  ;;  %v2273_v20 = vld [vmem:[#allocation2 + $0x208] sm:$0xff]  ;;  %v2272_v31 = vld [vmem:[#allocation2 + $0x200] sm:$0xff] }
 0x19b   : > { %389 = vst [vmem:[#allocation2 + $0x20] sm:$0xf] %v372_v55  ;;  %390 = vst [vmem:[#allocation2 + $0x28] sm:$0xf] %v373_v47  ;;  %v2313_v23 = vpack.c.bf16 %v2273_v20, %v2273_v20  ;;  %v2312_v10 = vpack.c.bf16 %v2272_v31, %v2272_v31 }
 0x19d   : > { %v365_v0 = vpop.permute.xlu0 %364  ;;  %2705 = vmatprep.subr.msk.bf16.mxu0 %vm327_vm0, %v2313_v23  ;;  %v367_v53 = vpop.permute.xlu1 %366  ;;  %v2331_v56 = vsel %vm327_vm0, %v2312_v10, 0 }
 0x19e   : > { %v374_v27 = vsel %vm368_vm8, %v363_v44, %v365_v0  ;;  %v375_v5 = vsel %vm368_vm8, %v365_v0, %v367_v53  ;;  %2363 = vmatpush1.bf16.msra.mxu0 %v2331_v56  ;;  %v2275_v39 = vld [vmem:[#allocation2 + $0x218] sm:$0xff]  ;;  %v2274_v19 = vld [vmem:[#allocation2 + $0x210] sm:$0xff] }
 0x19f   : > { %391 = vst [vmem:[#allocation2 + $0x30] sm:$0xf] %v374_v27  ;;  %392 = vst [vmem:[#allocation2 + $0x38] sm:$0xf] %v375_v5  ;;  %v2315_v21 = vpack.c.bf16 %v2275_v39, %v2275_v39  ;;  %v2314_v2 = vpack.c.bf16 %v2274_v19, %v2274_v19 }
 0x1a1   : > { %v481_v1 = vpop.permute.xlu0 %480  ;;  %2707 = vmatprep.subr.msk.bf16.mxu1 %vm327_vm0, %v2315_v21  ;;  %v483_v6 = vpop.permute.xlu1 %482  ;;  %v2337_v33 = vsel %vm327_vm0, %v2314_v2, 0  ;;  %2706 = vmatmul.mubr.msk.bf16.vlgmr.msra.gmra.mrb[0].mxu0 %vm2326_vm11, %v4218_v60 }
 0x1a2   : > { %v492_v25 = vsel %vm488_vm7, %v4401_v57, %v481_v1  ;;  %v493_v34 = vsel %vm488_vm7, %v481_v1, %v483_v6  ;;  %2404 = vmatpush1.bf16.msra.mxu1 %v2337_v33  ;;  %2468 = vmatprep.mubr.bf16.mxu0 %v2756_v8 }
 0x1a3   : > { %509 = vst [vmem:[#allocation2 + $0x20] sm:$0xf0] %v492_v25  ;;  %510 = vst [vmem:[#allocation2 + $0x28] sm:$0xf0] %v493_v34 }
 0x1a5   : > { %v485_v37 = vpop.permute.xlu0 %484  ;;  %v487_v41 = vpop.permute.xlu1 %486  ;;  %2708 = vmatmul.mubr.msk.bf16.vlgmr.msra.gmra.mrb[0].mxu1 %vm2326_vm11, %v4218_v60 }
 0x1a6   : > { %v494_v22 = vsel %vm488_vm7, %v483_v6, %v485_v37  ;;  %v495_v11 = vsel %vm488_vm7, %v485_v37, %v487_v41  ;;  %2509 = vmatprep.mubr.bf16.mxu1 %v2756_v8 }
 0x1a7   : > { %511 = vst [vmem:[#allocation2 + $0x30] sm:$0xf0] %v494_v22  ;;  %512 = vst [vmem:[#allocation2 + $0x38] sm:$0xf0] %v495_v11 }
 0x1a9   : > { %v601_v28 = vpop.permute.xlu0 %600  ;;  %v603_v43 = vpop.permute.xlu1 %602 }
 0x1aa   : > { %v612_v12 = vsel %vm608_vm6, %v4402_v42, %v601_v28  ;;  %v613_v38 = vsel %vm608_vm6, %v601_v28, %v603_v43  ;;  %v2213_v46 = vld [vmem:[#allocation2 + $0x28] sm:$0xff]  ;;  %v2212_v44 = vld [vmem:[#allocation2 + $0x20] sm:$0xff] }
 0x1ab   : > { %629 = vst [vmem:[#allocation2 + $0x60] sm:$0xf] %v612_v12  ;;  %630 = vst [vmem:[#allocation2 + $0x68] sm:$0xf] %v613_v38 }
 0x1ad   : > { %v605_v17 = vpop.permute.xlu0 %604  ;;  %v607_v26 = vpop.permute.xlu1 %606 }
 0x1ae   : > { %v614_v3 = vsel %vm608_vm6, %v603_v43, %v605_v17  ;;  %v615_v51 = vsel %vm608_vm6, %v605_v17, %v607_v26  ;;  %v2215_v10 = vld [vmem:[#allocation2 + $0x38] sm:$0xff]  ;;  %v2214_v56 = vld [vmem:[#allocation2 + $0x30] sm:$0xff] }
 0x1af   : > { %631 = vst [vmem:[#allocation2 + $0x70] sm:$0xf] %v614_v3  ;;  %632 = vst [vmem:[#allocation2 + $0x78] sm:$0xf] %v615_v51 }
 0x1b1   : > { %v721_v8 = vpop.permute.xlu0 %720  ;;  %v723_v40 = vpop.permute.xlu1 %722 }
 0x1b2   : > { %v732_v32 = vsel %vm728_vm5, %v4403_v14, %v721_v8  ;;  %v733_v59 = vsel %vm728_vm5, %v721_v8, %v723_v40 }
 0x1b3   : > { %749 = vst [vmem:[#allocation2 + $0x60] sm:$0xf0] %v732_v32  ;;  %750 = vst [vmem:[#allocation2 + $0x68] sm:$0xf0] %v733_v59 }
 0x1b5   : > { %v725_v54 = vpop.permute.xlu0 %724  ;;  %v727_v16 = vpop.permute.xlu1 %726 }
 0x1b6   : > { %v734_v52 = vsel %vm728_vm5, %v723_v40, %v725_v54  ;;  %v735_v61 = vsel %vm728_vm5, %v725_v54, %v727_v16 }
 0x1b7   : > { %751 = vst [vmem:[#allocation2 + $0x70] sm:$0xf0] %v734_v52  ;;  %752 = vst [vmem:[#allocation2 + $0x78] sm:$0xf0] %v735_v61 }
 0x1b9   : > { %v862_v15 = vpop.permute.xlu0 %861  ;;  %v864_v9 = vpop.permute.xlu1 %863 }
 0x1ba   : > { %v871_v30 = vsel %vm689_vm4, %v3929_v4, %v862_v15  ;;  %v872_v13 = vsel %vm689_vm4, %v862_v15, %v864_v9  ;;  %v2221_v63 = vld [vmem:[#allocation2 + $0x68] sm:$0xff]  ;;  %v2220_v55 = vld [vmem:[#allocation2 + $0x60] sm:$0xff] }
 0x1bb   : > { %886 = vst [vmem:[#allocation2 + $0xa0] sm:$0xf0] %v871_v30  ;;  %887 = vst [vmem:[#allocation2 + $0xa8] sm:$0xf0] %v872_v13  ;;  %v2285_v47 = vpack.c.bf16 %v2221_v63, %v2213_v46  ;;  %v2284_v20 = vpack.c.bf16 %v2220_v55, %v2212_v44 }
 0x1bd   : > { %v866_v31 = vpop.permute.xlu0 %865  ;;  %2436 = vmatprep.subr.bf16.mxu0 %v2285_v47  ;;  %v980_v23 = vpop.permute.xlu1 %979 }
 0x1be   : > { %v873_v0 = vsel %vm689_vm4, %v864_v9, %v866_v31  ;;  %890 = vst.msk [vmem:[#allocation2 + $0xb8] sm:$0xf0] %vm889_vm12, %v866_v31  ;;  %v989_v4 = vsel %vm569_vm3, %v3949_v48, %v980_v23  ;;  %2437 = vmatpush1.bf16.msra.mxu0 %v2284_v20  ;;  %v2223_v53 = vld [vmem:[#allocation2 + $0x78] sm:$0xff]  ;;  %v2222_v27 = vld [vmem:[#allocation2 + $0x70] sm:$0xff]  ;;  %vm1127_vm12 = vcmask 1048324  }
 0x1bf   : > { %888 = vst [vmem:[#allocation2 + $0xb0] sm:$0xf0] %v873_v0  ;;  %892 = vst.msk [vmem:[#allocation2 + $0xb8] sm:$0xf0] %vm891_vm13, %v4392_v50  ;;  %v2287_v5 = vpack.c.bf16 %v2223_v53, %v2215_v10  ;;  %v2286_v39 = vpack.c.bf16 %v2222_v27, %v2214_v56  ;;  %vm1243_vm13 = vcmask 773120  }
 0x1c0   : > { %1004 = vst [vmem:[#allocation2 + $0xe0] sm:$0xf] %v989_v4 }
 0x1c1   : > { %v982_v19 = vpop.permute.xlu0 %981  ;;  %2477 = vmatprep.subr.bf16.mxu1 %v2287_v5  ;;  %v984_v21 = vpop.permute.xlu1 %983 }
 0x1c2   : > { %v990_v2 = vsel %vm569_vm3, %v980_v23, %v982_v19  ;;  %v991_v1 = vsel %vm569_vm3, %v982_v19, %v984_v21  ;;  %1008 = vst.msk [vmem:[#allocation2 + $0xf8] sm:$0xf] %vm1007_vm14, %v984_v21  ;;  %2478 = vmatpush1.bf16.msra.mxu1 %v2286_v39  ;;  %vm1245_vm14 = vcmask 1044216   ;;  %v2229_v11 = vld [vmem:[#allocation2 + $0xa8] sm:$0xff]  ;;  %v2228_v12 = vld [vmem:[#allocation2 + $0xa0] sm:$0xff] }
 0x1c3   : > { %1005 = vst [vmem:[#allocation2 + $0xe8] sm:$0xf] %v990_v2  ;;  %1006 = vst [vmem:[#allocation2 + $0xf0] sm:$0xf] %v991_v1 }
 0x1c4   : > { %1010 = vst.msk [vmem:[#allocation2 + $0xf8] sm:$0xf] %vm1009_vm15, %v4392_v50  ;;  %vm2088_vm15 = vcmask 1044224  }
 0x1c5   : > { %v1098_v48 = vpop.permute.xlu0 %1097  ;;  %v1100_v6 = vpop.permute.xlu1 %1099 }
 0x1c6   : > { %v1107_v33 = vsel %vm449_vm2, %v3973_v45, %v1098_v48  ;;  %v1108_v57 = vsel %vm449_vm2, %v1098_v48, %v1100_v6  ;;  %v2231_v26 = vld [vmem:[#allocation2 + $0xb8] sm:$0xff]  ;;  %v2230_v32 = vld [vmem:[#allocation2 + $0xb0] sm:$0xff] }
 0x1c7   : > { %1122 = vst [vmem:[#allocation2 + $0xe0] sm:$0xf0] %v1107_v33  ;;  %1123 = vst [vmem:[#allocation2 + $0xe8] sm:$0xf0] %v1108_v57 }
 0x1c9   : > { %v1102_v25 = vpop.permute.xlu0 %1101  ;;  %v1216_v34 = vpop.permute.xlu1 %1215 }
 0x1ca   : > { %v1109_v37 = vsel %vm449_vm2, %v1100_v6, %v1102_v25  ;;  %1126 = vst.msk [vmem:[#allocation2 + $0xf8] sm:$0xf0] %vm1125_vm9, %v1102_v25  ;;  %v1225_v41 = vsel %vm329_vm1, %v4019_v24, %v1216_v34  ;;  %vm2205_vm9 = vcmask 1048316  }
 0x1cb   : > { %1124 = vst [vmem:[#allocation2 + $0xf0] sm:$0xf0] %v1109_v37  ;;  %1128 = vst.msk [vmem:[#allocation2 + $0xf8] sm:$0xf0] %vm1127_vm12, %v4392_v50 }
 0x1cc   : > { %1240 = vst [vmem:[#allocation2 + $0x120] sm:$0xf] %v1225_v41 }
 0x1cd   : > { %v1218_v45 = vpop.permute.xlu0 %1217  ;;  %v1220_v22 = vpop.permute.xlu1 %1219 }
 0x1ce   : > { %v1226_v28 = vsel %vm329_vm1, %v1216_v34, %v1218_v45  ;;  %v1227_v43 = vsel %vm329_vm1, %v1218_v45, %v1220_v22  ;;  %1244 = vst.msk [vmem:[#allocation2 + $0x138] sm:$0xf] %vm1243_vm13, %v1220_v22  ;;  %v2237_v42 = vld [vmem:[#allocation2 + $0xe8] sm:$0xff]  ;;  %v2236_v38 = vld [vmem:[#allocation2 + $0xe0] sm:$0xff] }
 0x1cf   : > { %1241 = vst [vmem:[#allocation2 + $0x128] sm:$0xf] %v1226_v28  ;;  %1242 = vst [vmem:[#allocation2 + $0x130] sm:$0xf] %v1227_v43  ;;  %v2293_v24 = vpack.c.bf16 %v2237_v42, %v2229_v11  ;;  %v2292_v17 = vpack.c.bf16 %v2236_v38, %v2228_v12 }
 0x1d0   : > { %1246 = vst.msk [vmem:[#allocation2 + $0x138] sm:$0xf] %vm1245_vm14, %v4392_v50 }
 0x1d1   : > { %v1335_v3 = vpop.permute.xlu0 %1334  ;;  %2438 = vmatprep.subr.bf16.mxu0 %v2293_v24  ;;  %v1337_v51 = vpop.permute.xlu1 %1336 }
 0x1d2   : > { %v1345_v8 = vsel %vm368_vm8, %v4043_v29, %v1335_v3  ;;  %v1346_v40 = vsel %vm368_vm8, %v1335_v3, %v1337_v51  ;;  %2439 = vmatpush1.bf16.msra.mxu0 %v2292_v17  ;;  %v2239_v14 = vld [vmem:[#allocation2 + $0xf8] sm:$0xff]  ;;  %v2238_v59 = vld [vmem:[#allocation2 + $0xf0] sm:$0xff] }
 0x1d3   : > { %1362 = vst [vmem:[#allocation2 + $0x120] sm:$0xf0] %v1345_v8  ;;  %1363 = vst [vmem:[#allocation2 + $0x128] sm:$0xf0] %v1346_v40  ;;  %v2295_v54 = vpack.c.bf16 %v2239_v14, %v2231_v26  ;;  %v2294_v16 = vpack.c.bf16 %v2238_v59, %v2230_v32 }
 0x1d5   : > { %v1339_v52 = vpop.permute.xlu0 %1338  ;;  %2479 = vmatprep.subr.bf16.mxu1 %v2295_v54  ;;  %v1341_v61 = vpop.permute.xlu1 %1340 }
 0x1d6   : > { %v1347_v15 = vsel %vm368_vm8, %v1337_v51, %v1339_v52  ;;  %v1348_v9 = vsel %vm368_vm8, %v1339_v52, %v1341_v61  ;;  %2480 = vmatpush1.bf16.msra.mxu1 %v2294_v16  ;;  %vm1971_vm8 = vcmask 1048332  }
 0x1d7   : > { %1364 = vst [vmem:[#allocation2 + $0x130] sm:$0xf0] %v1347_v15  ;;  %1365 = vst [vmem:[#allocation2 + $0x138] sm:$0xf0] %v1348_v9 }
 0x1d9   : > { %v1452_v29 = vpop.permute.xlu0 %1451  ;;  %v1454_v46 = vpop.permute.xlu1 %1453 }
 0x1da   : > { %v1462_v30 = vsel %vm488_vm7, %v4064_v18, %v1452_v29  ;;  %v1463_v13 = vsel %vm488_vm7, %v1452_v29, %v1454_v46  ;;  %v2245_v5 = vld [vmem:[#allocation2 + $0x128] sm:$0xff]  ;;  %v2244_v21 = vld [vmem:[#allocation2 + $0x120] sm:$0xff] }
 0x1db   : > { %1479 = vst [vmem:[#allocation2 + $0x160] sm:$0xf] %v1462_v30  ;;  %1480 = vst [vmem:[#allocation2 + $0x168] sm:$0xf] %v1463_v13 }
 0x1dd   : > { %v1456_v63 = vpop.permute.xlu0 %1455  ;;  %v1458_v44 = vpop.permute.xlu1 %1457 }
 0x1de   : > { %v1464_v55 = vsel %vm488_vm7, %v1454_v46, %v1456_v63  ;;  %v1465_v47 = vsel %vm488_vm7, %v1456_v63, %v1458_v44  ;;  %v2247_v57 = vld [vmem:[#allocation2 + $0x138] sm:$0xff]  ;;  %vm1969_vm7 = vcmask 793604  }
 0x1df   : > { %1481 = vst [vmem:[#allocation2 + $0x170] sm:$0xf] %v1464_v55  ;;  %1482 = vst [vmem:[#allocation2 + $0x178] sm:$0xf] %v1465_v47 }
 0x1e1   : > { %v1569_v20 = vpop.permute.xlu0 %1568  ;;  %v1571_v31 = vpop.permute.xlu1 %1570 }
 0x1e2   : > { %v1579_v23 = vsel %vm608_vm6, %v4085_v62, %v1569_v20  ;;  %v1580_v10 = vsel %vm608_vm6, %v1569_v20, %v1571_v31 }
 0x1e3   : > { %1596 = vst [vmem:[#allocation2 + $0x160] sm:$0xf0] %v1579_v23  ;;  %1597 = vst [vmem:[#allocation2 + $0x168] sm:$0xf0] %v1580_v10 }
 0x1e5   : > { %v1573_v18 = vpop.permute.xlu0 %1572  ;;  %v1575_v0 = vpop.permute.xlu1 %1574 }
 0x1e6   : > { %v1581_v4 = vsel %vm608_vm6, %v1571_v31, %v1573_v18  ;;  %v1582_v53 = vsel %vm608_vm6, %v1573_v18, %v1575_v0  ;;  %vm1854_vm6 = vcmask 1044472  }
 0x1e7   : > { %1598 = vst [vmem:[#allocation2 + $0x170] sm:$0xf0] %v1581_v4  ;;  %1599 = vst [vmem:[#allocation2 + $0x178] sm:$0xf0] %v1582_v53 }
 0x1e9   : > { %v1686_v56 = vpop.permute.xlu0 %1685  ;;  %v1688_v27 = vpop.permute.xlu1 %1687 }
 0x1ea   : > { %v1696_v39 = vsel %vm728_vm5, %v4110_v49, %v1686_v56  ;;  %v1697_v62 = vsel %vm728_vm5, %v1686_v56, %v1688_v27  ;;  %v2253_v19 = vld [vmem:[#allocation2 + $0x168] sm:$0xff]  ;;  %v2252_v2 = vld [vmem:[#allocation2 + $0x160] sm:$0xff]  ;;  %v2246_v49 = vld [vmem:[#allocation2 + $0x130] sm:$0xff] }
 0x1eb   : > { %1713 = vst [vmem:[#allocation2 + $0x1a0] sm:$0xf] %v1696_v39  ;;  %1714 = vst [vmem:[#allocation2 + $0x1a8] sm:$0xf] %v1697_v62  ;;  %v2301_v1 = vpack.c.bf16 %v2253_v19, %v2245_v5  ;;  %v2300_v48 = vpack.c.bf16 %v2252_v2, %v2244_v21 }
 0x1ed   : > { %v1690_v6 = vpop.permute.xlu0 %1689  ;;  %2440 = vmatprep.subr.bf16.mxu0 %v2301_v1  ;;  %v1692_v33 = vpop.permute.xlu1 %1691 }
 0x1ee   : > { %v1698_v25 = vsel %vm728_vm5, %v1688_v27, %v1690_v6  ;;  %v1699_v34 = vsel %vm728_vm5, %v1690_v6, %v1692_v33  ;;  %2441 = vmatpush1.bf16.msra.mxu0 %v2300_v48  ;;  %v2255_v37 = vld [vmem:[#allocation2 + $0x178] sm:$0xff]  ;;  %v2254_v41 = vld [vmem:[#allocation2 + $0x170] sm:$0xff]  ;;  %vm1852_vm5 = vcmask 1035264  }
 0x1ef   : > { %1715 = vst [vmem:[#allocation2 + $0x1b0] sm:$0xf] %v1698_v25  ;;  %1716 = vst [vmem:[#allocation2 + $0x1b8] sm:$0xf] %v1699_v34  ;;  %v2303_v45 = vpack.c.bf16 %v2255_v37, %v2247_v57  ;;  %v2302_v22 = vpack.c.bf16 %v2254_v41, %v2246_v49 }
 0x1f1   : > { %v1825_v11 = vpop.permute.xlu0 %1824  ;;  %2481 = vmatprep.subr.bf16.mxu1 %v2303_v45  ;;  %v1827_v28 = vpop.permute.xlu1 %1826 }
 0x1f2   : > { %v1834_v43 = vsel %vm689_vm4, %v4129_v58, %v1825_v11  ;;  %v1835_v42 = vsel %vm689_vm4, %v1825_v11, %v1827_v28  ;;  %2482 = vmatpush1.bf16.msra.mxu1 %v2302_v22  ;;  %v2261_v32 = vld [vmem:[#allocation2 + $0x1a8] sm:$0xff]  ;;  %v2260_v63 = vld [vmem:[#allocation2 + $0x1a0] sm:$0xff] }
 0x1f3   : > { %1849 = vst [vmem:[#allocation2 + $0x1e0] sm:$0xf] %v1834_v43  ;;  %1850 = vst [vmem:[#allocation2 + $0x1e8] sm:$0xf] %v1835_v42 }
 0x1f5   : > { %v1829_v12 = vpop.permute.xlu0 %1828  ;;  %v1942_v38 = vpop.permute.xlu1 %1941 }
 0x1f6   : > { %v1836_v24 = vsel %vm689_vm4, %v1827_v28, %v1829_v12  ;;  %1853 = vst.msk [vmem:[#allocation2 + $0x1f8] sm:$0xf] %vm1852_vm5, %v1829_v12  ;;  %v1951_v17 = vsel %vm569_vm3, %v4151_v35, %v1942_v38  ;;  %vm2086_vm4 = vcmask 781312   ;;  %v2263_v16 = vld [vmem:[#allocation2 + $0x1b8] sm:$0xff]  ;;  %v2262_v61 = vld [vmem:[#allocation2 + $0x1b0] sm:$0xff] }
 0x1f7   : > { %1851 = vst [vmem:[#allocation2 + $0x1f0] sm:$0xf] %v1836_v24  ;;  %1855 = vst.msk [vmem:[#allocation2 + $0x1f8] sm:$0xf] %vm1854_vm6, %v4392_v50 }
 0x1f8   : > { %1966 = vst [vmem:[#allocation2 + $0x1e0] sm:$0xf0] %v1951_v17 }
 0x1f9   : > { %v1944_v58 = vpop.permute.xlu0 %1943  ;;  %v1946_v26 = vpop.permute.xlu1 %1945 }
 0x1fa   : > { %v1952_v3 = vsel %vm569_vm3, %v1942_v38, %v1944_v58  ;;  %v1953_v51 = vsel %vm569_vm3, %v1944_v58, %v1946_v26  ;;  %1970 = vst.msk [vmem:[#allocation2 + $0x1f8] sm:$0xf0] %vm1969_vm7, %v1946_v26  ;;  %vm2203_vm3 = vcmask 777220  }
 0x1fb   : > { %1967 = vst [vmem:[#allocation2 + $0x1e8] sm:$0xf0] %v1952_v3  ;;  %1968 = vst [vmem:[#allocation2 + $0x1f0] sm:$0xf0] %v1953_v51  ;;  %v2757_v51 = vmov (!%p2713_p4), 0.0  }
 0x1fc   : > { %1972 = vst.msk [vmem:[#allocation2 + $0x1f8] sm:$0xf0] %vm1971_vm8, %v4392_v50 }
 0x1fd   : > { %v2059_v8 = vpop.permute.xlu0 %2058  ;;  %v2061_v40 = vpop.permute.xlu1 %2060 }
 0x1fe   : > { %v2068_v35 = vsel %vm449_vm2, %v4189_v36, %v2059_v8  ;;  %v2069_v14 = vsel %vm449_vm2, %v2059_v8, %v2061_v40 }
 0x1ff   : > { %2083 = vst [vmem:[#allocation2 + $0x220] sm:$0xf] %v2068_v35  ;;  %2084 = vst [vmem:[#allocation2 + $0x228] sm:$0xf] %v2069_v14  ;;  %v2268_v52 = vld [vmem:[#allocation2 + $0x1e0] sm:$0xff] }
 0x200   : > { %v2308_v55 = vpack.c.bf16 %v2268_v52, %v2260_v63 }
 0x201   : > { %v2063_v59 = vpop.permute.xlu0 %2062  ;;  %v2176_v54 = vpop.permute.xlu1 %2175 }
 0x202   : > { %v2070_v15 = vsel %vm449_vm2, %v2061_v40, %v2063_v59  ;;  %2087 = vst.msk [vmem:[#allocation2 + $0x238] sm:$0xf] %vm2086_vm4, %v2063_v59  ;;  %v2185_v9 = vsel %vm329_vm1, %v4200_v7, %v2176_v54  ;;  %v2269_v29 = vld [vmem:[#allocation2 + $0x1e8] sm:$0xff]  ;;  %v2270_v46 = vld [vmem:[#allocation2 + $0x1f0] sm:$0xff] }
 0x203   : > { %v2271_v36 = vld [vmem:[#allocation2 + $0x1f8] sm:$0xff]  ;;  %2085 = vst [vmem:[#allocation2 + $0x230] sm:$0xf] %v2070_v15  ;;  %2089 = vst.msk [vmem:[#allocation2 + $0x238] sm:$0xf] %vm2088_vm15, %v4392_v50  ;;  %v2309_v30 = vpack.c.bf16 %v2269_v29, %v2261_v32  ;;  %v2310_v44 = vpack.c.bf16 %v2270_v46, %v2262_v61 }
 0x204   : > { %2200 = vst [vmem:[#allocation2 + $0x220] sm:$0xf0] %v2185_v9  ;;  %v2311_v13 = vpack.c.bf16 %v2271_v36, %v2263_v16 }
 0x205   : > { %v2178_v47 = vpop.permute.xlu0 %2177  ;;  %2442 = vmatprep.subr.bf16.mxu0 %v2309_v30  ;;  %v2180_v20 = vpop.permute.xlu1 %2179 }
 0x206   : > { %2483 = vmatprep.subr.bf16.mxu1 %v2311_v13  ;;  %v2186_v7 = vsel %vm329_vm1, %v2176_v54, %v2178_v47  ;;  %v2187_v31 = vsel %vm329_vm1, %v2178_v47, %v2180_v20  ;;  %2204 = vst.msk [vmem:[#allocation2 + $0x238] sm:$0xf0] %vm2203_vm3, %v2180_v20  ;;  %2443 = vmatpush1.bf16.msra.mxu0 %v2308_v55  ;;  %vm2542_vm1 = vcmask (!%p2713_p4), 11264  }
 0x207   : > { %2484 = vmatpush1.bf16.msra.mxu1 %v2310_v44  ;;  %2201 = vst [vmem:[#allocation2 + $0x228] sm:$0xf0] %v2186_v7  ;;  %2202 = vst [vmem:[#allocation2 + $0x230] sm:$0xf0] %v2187_v31 }
 0x208   : > { %2206 = vst.msk [vmem:[#allocation2 + $0x238] sm:$0xf0] %vm2205_vm9, %v4392_v50 }
 0x209   : > { %2543 = vst.msk [vmem:[%s4357_s6] sm:$0xf] (!%p2713_p4), %vm2542_vm1, %v2757_v51 }
 0x20b   : > { %v2276_v23 = vld [vmem:[#allocation2 + $0x220] sm:$0xff] }
 0x20c   : > { %v2316_v10 = vpack.c.bf16 %v2276_v23, %v2276_v23 }
 0x20e   : > { %v2277_v18 = vld [vmem:[#allocation2 + $0x228] sm:$0xff]  ;;  %v2278_v4 = vld [vmem:[#allocation2 + $0x230] sm:$0xff]  ;;  %v2343_v5 = vsel %vm327_vm0, %v2316_v10, 0 }
 0x20f   : > { %v2279_v0 = vld [vmem:[#allocation2 + $0x238] sm:$0xff]  ;;  %v2317_v53 = vpack.c.bf16 %v2277_v18, %v2277_v18  ;;  %v2318_v27 = vpack.c.bf16 %v2278_v4, %v2278_v4 }
 0x210   : > { %v2319_v56 = vpack.c.bf16 %v2279_v0, %v2279_v0 }
 0x211   : > { %2709 = vmatprep.subr.msk.bf16.mxu0 %vm327_vm0, %v2317_v53  ;;  %v2349_v39 = vsel %vm327_vm0, %v2318_v27, 0 }
 0x212   : > { %2711 = vmatprep.subr.msk.bf16.mxu1 %vm327_vm0, %v2319_v56  ;;  %2445 = vmatpush1.bf16.msra.mxu0 %v2343_v5 }
 0x213   : > { %2486 = vmatpush1.bf16.msra.mxu1 %v2349_v39 }
 0x215   : > { %2710 = vmatmul.mubr.msk.bf16.vlgmr.msra.gmra.mrb[4].mxu0 %vm2326_vm11, %v4218_v60 }
 0x216   : > { %2712 = vmatmul.mubr.msk.bf16.vlgmr.msra.gmra.mrb[4].mxu1 %vm2326_vm11, %v4218_v60  ;;  %v2324_v50 = vpop.permute.xlu0 %2323 }
 0x274   : > { %v2388_v62 = vpop.f32.mrb[0].mxu0 }
 0x275   : > { %v2390_v19 = vpop.f32.mrb[1].mxu0  ;;  %v2389_v21 = vadd.f32 %v2388_v62, %v2324_v50 }
 0x276   : > { %v2392_v2 = vpop.f32.mrb[2].mxu0  ;;  %v2391_v1 = vadd.f32 %v2390_v19, %v2324_v50 }
 0x277   : > { %v2393_v48 = vpop.f32.mrb[3].mxu0 }
 0x278   : > { %v2429_v6 = vpop.f32.mrb[0].mxu1  ;;  %v2526_v33 = vcombine.low %v2389_v21, %v2391_v1 }
 0x279   : > { %v2431_v57 = vpop.f32.mrb[1].mxu1  ;;  %v2430_v25 = vadd.f32 %v2429_v6, %v2324_v50 }
 0x27a   : > { %v2433_v34 = vpop.f32.mrb[2].mxu1  ;;  %v2432_v37 = vadd.f32 %v2431_v57, %v2324_v50  ;;  %2534 = vst [vmem:[%s269_s30] sm:$0xff] %v2526_v33 }
 0x27b   : > { %v2434_v49 = vpop.f32.mrb[3].mxu1 }
 0x27c   : > { %v2527_v60 = vcombine.low %v2430_v25, %v2432_v37 }
 0x27e   : > { %2535 = vst [vmem:[%s269_s30 + $0x8] sm:$0xff] %v2527_v60 }
 0x2e8   : > { %v2470_v41 = vpop.f32.mrb[4].mxu0 }
 0x2e9   : > { %v2511_v45 = vpop.f32.mrb[4].mxu1  ;;  %v2471_v22 = vadd.f32 %v2470_v41, %v2324_v50  ;;  %v2472_v28 = vpop.f32.mrb[5].mxu0  ;;  %2541 = sbr.rel (%p2713_p4) target bundleno = 752 (0x2f0), region = 44 }
 0x2ea   : > { %v2512_v11 = vadd.f32 %v2511_v45, %v2324_v50  ;;  %v2513_v43 = vpop.f32.mrb[5].mxu1  ;;  %v2473_v42 = vadd.f32 %v2472_v28, %v2324_v50  ;;  %v2474_v38 = vpop.f32.mrb[6].mxu0 }
 0x2eb   : > { %v2514_v12 = vadd.f32 %v2513_v43, %v2324_v50  ;;  %v2515_v24 = vpop.f32.mrb[6].mxu1  ;;  %v2475_v17 = vpop.f32.mrb[7].mxu0 }
 0x2ec   : > { %v2516_v58 = vpop.f32.mrb[7].mxu1  ;;  %v2528_v26 = vcombine.low %v2471_v22, %v2473_v42 }
 0x2ed   : > { %v2529_v3 = vcombine.low %v2512_v11, %v2514_v12 }
 0x2ee   : > { %2536 = vst [vmem:[%s269_s30 + $0x10] sm:$0xff] %v2528_v26 }
 0x2ef   : > { %2537 = vst [vmem:[%s269_s30 + $0x18] sm:$0xff] %v2529_v3 }
 0x2f0 PF: > { %v2545_v8 = vsel %vm327_vm0, %v2389_v21, 0.0  ;;  %v2546_v40 = vsel %vm327_vm0, %v2391_v1, 0.0  ;;  %v2548_v35 = vsel %vm327_vm0, %v2430_v25, 0.0  ;;  %v2550_v32 = vsel %vm327_vm0, %v2432_v37, 0.0  ;;  %v2544_v2 = vld [vmem:[%s4357_s6] sm:$0xf] }
 0x2f1   : > { %v2547_v14 = vadd.f32 %v2546_v40, %v2545_v8  ;;  %v2565_v59 = vmul.f32 %v2389_v21, %v2389_v21  ;;  %v2566_v54 = vmul.f32 %v2391_v1, %v2391_v1  ;;  %v2567_v16 = vmul.f32 %v2430_v25, %v2430_v25 }
 0x2f2   : > { %v2568_v61 = vmul.f32 %v2432_v37, %v2432_v37  ;;  %v2552_v15 = vsel %vm327_vm0, %v2471_v22, 0.0  ;;  %v2569_v9 = vmul.f32 %v2471_v22, %v2471_v22  ;;  %v2554_v63 = vsel %vm327_vm0, %v2473_v42, 0.0 }
 0x2f3   : > { %v2549_v52 = vadd.f32 %v2548_v35, %v2547_v14  ;;  %v2573_v29 = vsel %vm327_vm0, %v2565_v59, 0.0  ;;  %v2574_v36 = vsel %vm327_vm0, %v2566_v54, 0.0  ;;  %v2576_v13 = vsel %vm327_vm0, %v2567_v16, 0.0 }
 0x2f4   : > { %v2575_v30 = vadd.f32 %v2574_v36, %v2573_v29  ;;  %v2570_v44 = vmul.f32 %v2473_v42, %v2473_v42  ;;  %v2578_v55 = vsel %vm327_vm0, %v2568_v61, 0.0  ;;  %v2556_v7 = vsel %vm327_vm0, %v2512_v11, 0.0 }
 0x2f5   : > { %v2551_v46 = vadd.f32 %v2550_v32, %v2549_v52  ;;  %v2571_v31 = vmul.f32 %v2512_v11, %v2512_v11  ;;  %v2580_v23 = vsel %vm327_vm0, %v2569_v9, 0.0  ;;  %v2558_v0 = vsel %vm327_vm0, %v2514_v12, 0.0 }
 0x2f6   : > { %v2577_v20 = vadd.f32 %v2576_v13, %v2575_v30  ;;  %v2572_v4 = vmul.f32 %v2514_v12, %v2514_v12  ;;  %v2582_v53 = vsel %vm327_vm0, %v2570_v44, 0.0  ;;  %vm2591_vm2 = vcmask 11272  }
 0x2f7   : > { %v2553_v47 = vadd.f32 %v2552_v15, %v2551_v46  ;;  %v2584_v5 = vsel %vm327_vm0, %v2571_v31, 0.0 }
 0x2f8   : > { %v2579_v18 = vadd.f32 %v2578_v55, %v2577_v20  ;;  %v2586_v62 = vsel %vm327_vm0, %v2572_v4, 0.0 }
 0x2f9   : > { %v2555_v10 = vadd.f32 %v2554_v63, %v2553_v47 }
 0x2fa   : > { %v2581_v27 = vadd.f32 %v2580_v23, %v2579_v18 }
 0x2fb   : > { %v2557_v56 = vadd.f32 %v2556_v7, %v2555_v10 }
 0x2fc   : > { %v2583_v50 = vadd.f32 %v2582_v53, %v2581_v27 }
 0x2fd   : > { %v2559_v39 = vadd.f32 %v2558_v0, %v2557_v56 }
 0x2fe   : > { %v2585_v19 = vadd.f32 %v2584_v5, %v2583_v50 }
 0x2ff   : > { %2560 = vadd.xlane.f32.xlu0 %v2559_v39 }
 0x300   : > { %v2587_v21 = vadd.f32 %v2586_v62, %v2585_v19 }
 0x303   : > { %2588 = vadd.xlane.f32.xlu0 %v2587_v21 }
 0x38c   : > { %v2561_v1 = vpop.xlane.xlu0 %2560 }
 0x38d   : > { %v2562_v48 = vadd.f32 %v2561_v1, %v2544_v2 }
 0x38f   : > { %2563 = vst.msk [vmem:[%s4357_s6] sm:$0xf] %vm1717_vm10, %v2562_v48 }
 0x390   : > { %v2589_v6 = vpop.xlane.xlu0 %2588 }
 0x396   : > { %v2564_v33 = vld [vmem:[%s4357_s6] sm:$0xf] }
 0x397   : > { %v2590_v57 = vadd.f32 %v2589_v6, %v2564_v33 }
 0x399   : > { %2592 = vst.msk [vmem:[%s4357_s6] sm:$0xf] %vm2591_vm2, %v2590_v57 }
 0x39a PF: > { %s17_s21 = sadd.s32 1, %s2745_s21  }
 0x39b   : > { %p14_p5 = scmp.ge.s32.totalorder %s17_s21, 4  }
 0x39d   :  { %16 = sbr.rel (!%p14_p5) target bundleno = 1 (0x1), region = 92 }

</bundles_post_ra>
